<compile_context>
chip_gen: v7x
topology: tpu7x:2x2x1
jax: 0.10.0
libtpu: 0.0.40
codegen_flags: <defaults>
</compile_context>

<pallas_src>
import functools
import math

import numpy as np
import jax
import jax.numpy as jnp
from jax.experimental import pallas as pl
from jax.experimental.pallas import tpu as pltpu

D_MODEL = 128          # hidden_size default
NHEAD = 8
HEAD_DIM = D_MODEL // NHEAD
DIM_FF = 2048          # nn.TransformerEncoderLayer default dim_feedforward
NLAYERS = 16
LN_EPS = 1e-5
DEC_PAD = 128          # decoder logits padded to a full 128-lane vreg width


# ----------------------------- kernel helpers -----------------------------

def _layer_norm(x, w, b):
    mean = jnp.mean(x, axis=-1, keepdims=True)
    var = jnp.mean(jnp.square(x - mean), axis=-1, keepdims=True)
    return (x - mean) * jax.lax.rsqrt(var + LN_EPS) * w + b


# ------------------------------- fused kernel -------------------------------

def fused_transformer_kernel(
        x_ref, encw_ref, encb_ref, pe_ref,
        inw_ref, inb_ref, ow_ref, ob_ref,
        ln1w_ref, ln1b_ref,
        l1w_ref, l1b_ref, l2w_ref, l2b_ref,
        ln2w_ref, ln2b_ref,
        decw_ref, decb_ref,
        o_ref,
        x_sc,
        *, scale, batch, seq):
    l = pl.program_id(0)

    # ---- step 0: input embedding * sqrt(num_actions) + positional encoding ----
    @pl.when(l == 0)
    def _():
        xin = x_ref[...].astype(jnp.bfloat16)
        y = jnp.dot(xin, encw_ref[...], preferred_element_type=jnp.float32)
        y = y + encb_ref[...]
        x_sc[...] = y * scale + pe_ref[...]

    # ---- one post-norm transformer encoder layer (weights of layer l) ----
    x = x_sc[...]                                   # (B*S, D) f32, resident
    xb = x.astype(jnp.bfloat16)

    qkv = jnp.dot(xb, inw_ref[0], preferred_element_type=jnp.float32) + inb_ref[0]
    q = qkv[:, 0 * D_MODEL:1 * D_MODEL].reshape(batch, seq, D_MODEL)
    k = qkv[:, 1 * D_MODEL:2 * D_MODEL].reshape(batch, seq, D_MODEL)
    v = qkv[:, 2 * D_MODEL:3 * D_MODEL].reshape(batch, seq, D_MODEL)

    inv_sqrt_dh = 1.0 / math.sqrt(HEAD_DIM)
    heads = []
    # TODO(synk): heads remain a static python loop over 16-lane slices; a
    # fully head-batched dot_general would need a lane-splitting reshape whose
    # lowering is risky, and attention is tiny next to the FFN here.  Batch is
    # handled as a batched einsum (no per-batch loop / grid).
    for h in range(NHEAD):
        lo = h * HEAD_DIM
        qh = q[..., lo:lo + HEAD_DIM]
        kh = k[..., lo:lo + HEAD_DIM]
        vh = v[..., lo:lo + HEAD_DIM]
        s = jnp.einsum('bqd,bkd->bqk', qh, kh,
                       preferred_element_type=jnp.float32) * inv_sqrt_dh
        s = s - jnp.max(s, axis=-1, keepdims=True)
        p = jnp.exp(s)
        p = p / jnp.sum(p, axis=-1, keepdims=True)
        heads.append(jnp.einsum('bqk,bkd->bqd', p, vh,
                                preferred_element_type=jnp.float32))
    attn = jnp.concatenate(heads, axis=-1).reshape(batch * seq, D_MODEL)
    attn = jnp.dot(attn.astype(jnp.bfloat16), ow_ref[0],
                   preferred_element_type=jnp.float32) + ob_ref[0]

    x = _layer_norm(x + attn, ln1w_ref[0], ln1b_ref[0])

    # --- feed-forward (relu) ---
    h1 = jnp.dot(x.astype(jnp.bfloat16), l1w_ref[0],
                 preferred_element_type=jnp.float32) + l1b_ref[0]
    h1 = jnp.maximum(h1, 0.0)
    h2 = jnp.dot(h1.astype(jnp.bfloat16), l2w_ref[0],
                 preferred_element_type=jnp.float32) + l2b_ref[0]

    x = _layer_norm(x + h2, ln2w_ref[0], ln2b_ref[0])
    x_sc[...] = x

    # ---- last step: decoder linear + softmax (lane-dense, 128-wide store) ----
    @pl.when(l == pl.num_programs(0) - 1)
    def _():
        logits = jnp.dot(x.astype(jnp.bfloat16), decw_ref[...],
                         preferred_element_type=jnp.float32) + decb_ref[...]
        logits = logits - jnp.max(logits, axis=-1, keepdims=True)
        e = jnp.exp(logits)
        o_ref[...] = e / jnp.sum(e, axis=-1, keepdims=True)


# ------------------------------ pallas wrapper ------------------------------

def _pallas_forward(x2d, pe2d, p, *, batch, seq):
    M, _ = x2d.shape

    def const_spec(a):
        return pl.BlockSpec(a.shape, lambda l: (0, 0))

    def layer_spec(a):
        return pl.BlockSpec((1,) + a.shape[1:], lambda l: (l, 0, 0))

    layer_ws = (p["in_w"], p["in_b"], p["out_w"], p["out_b"],
                p["ln1_w"], p["ln1_b"],
                p["l1_w"], p["l1_b"], p["l2_w"], p["l2_b"],
                p["ln2_w"], p["ln2_b"])

    in_specs = ([const_spec(x2d), const_spec(p["enc_w"]),
                 const_spec(p["enc_b"]), const_spec(pe2d)]
                + [layer_spec(w) for w in layer_ws]
                + [const_spec(p["dec_w_pad"]), const_spec(p["dec_b_pad"])])

    kernel = functools.partial(
        fused_transformer_kernel,
        scale=math.sqrt(float(p["num_actions"])),
        batch=batch, seq=seq)

    return pl.pallas_call(
        kernel,
        out_shape=jax.ShapeDtypeStruct((M, DEC_PAD), jnp.float32),
        grid=(NLAYERS,),
        in_specs=in_specs,
        out_specs=pl.BlockSpec((M, DEC_PAD), lambda l: (0, 0)),
        scratch_shapes=[pltpu.VMEM((M, D_MODEL), jnp.float32)],
        compiler_params=pltpu.CompilerParams(
            dimension_semantics=("arbitrary",)),
    )(x2d, p["enc_w"], p["enc_b"], pe2d, *layer_ws,
      p["dec_w_pad"], p["dec_b_pad"])


# ------------------------------ params & glue -------------------------------

def positional_encoding(seq_len, d_model):
    position = np.arange(seq_len, dtype=np.float32)[:, None]
    div_term = np.exp(np.arange(0, d_model, 2, dtype=np.float32)
                      * -(math.log(10000.0) / d_model))
    pe = np.zeros((seq_len, d_model), dtype=np.float32)
    pe[:, 0::2] = np.sin(position * div_term)
    pe[:, 1::2] = np.cos(position * div_term)
    return jnp.asarray(pe)


def init_params(key, input_size, num_actions, seq_len):
    def uni(k, shape, bound, dtype=jnp.float32):
        return jax.random.uniform(k, shape, jnp.float32, -bound, bound).astype(dtype)

    keys = iter(jax.random.split(key, 3 + 6 * NLAYERS))

    bd = 1.0 / math.sqrt(D_MODEL)
    bf = 1.0 / math.sqrt(DIM_FF)

    # decoder weight padded to 128 lanes (lane-dense output store); padded
    # columns get weight 0 and bias -1e30 so their softmax prob is exactly 0.
    dec_w = uni(next(keys), (D_MODEL, num_actions), 0.1)
    dec_w_pad = jnp.zeros((D_MODEL, DEC_PAD), jnp.float32)
    dec_w_pad = dec_w_pad.at[:, :num_actions].set(dec_w)
    dec_b_pad = jnp.full((1, DEC_PAD), -1e30, jnp.float32)
    dec_b_pad = dec_b_pad.at[:, :num_actions].set(0.0)   # decoder bias zero

    params = {
        "num_actions": num_actions,
        # encoder Linear: weight uniform(-0.1, 0.1) per init_weights
        "enc_w": uni(next(keys), (input_size, D_MODEL), 0.1, jnp.bfloat16),
        "enc_b": uni(next(keys), (1, D_MODEL), 1.0 / math.sqrt(input_size)),
        "dec_w_pad": dec_w_pad.astype(jnp.bfloat16),
        "dec_b_pad": dec_b_pad,
        "pe": positional_encoding(seq_len, D_MODEL),
    }

    in_w, out_w, l1_w, l1_b, l2_w, l2_b = [], [], [], [], [], []
    for _ in range(NLAYERS):
        in_w.append(uni(next(keys), (D_MODEL, 3 * D_MODEL), bd, jnp.bfloat16))
        out_w.append(uni(next(keys), (D_MODEL, D_MODEL), bd, jnp.bfloat16))
        l1_w.append(uni(next(keys), (D_MODEL, DIM_FF), bd, jnp.bfloat16))
        l1_b.append(uni(next(keys), (1, DIM_FF), bd))
        l2_w.append(uni(next(keys), (DIM_FF, D_MODEL), bf, jnp.bfloat16))
        l2_b.append(uni(next(keys), (1, D_MODEL), bf))

    params.update({
        "in_w": jnp.stack(in_w),
        "in_b": jnp.zeros((NLAYERS, 1, 3 * D_MODEL), jnp.float32),
        "out_w": jnp.stack(out_w),
        "out_b": jnp.zeros((NLAYERS, 1, D_MODEL), jnp.float32),
        "ln1_w": jnp.ones((NLAYERS, 1, D_MODEL), jnp.float32),
        "ln1_b": jnp.zeros((NLAYERS, 1, D_MODEL), jnp.float32),
        "l1_w": jnp.stack(l1_w),
        "l1_b": jnp.stack(l1_b),
        "l2_w": jnp.stack(l2_w),
        "l2_b": jnp.stack(l2_b),
        "ln2_w": jnp.ones((NLAYERS, 1, D_MODEL), jnp.float32),
        "ln2_b": jnp.zeros((NLAYERS, 1, D_MODEL), jnp.float32),
    })
    return params


def transformer16l_forward(src_sbi, params):
    """src_sbi: (S, B, input_size) seq-first, like the PyTorch module."""
    S, B, Fin = src_sbi.shape
    x2d = jnp.transpose(src_sbi, (1, 0, 2)).reshape(B * S, Fin)   # batch folded into M
    pe2d = jnp.tile(params["pe"][:S], (B, 1))                     # (B*S, D)
    out_pad = _pallas_forward(x2d, pe2d, params, batch=B, seq=S)  # (B*S, 128)
    A = params["num_actions"]
    out = out_pad[:, :A].reshape(B, S, A)
    return jnp.transpose(out, (1, 0, 2))                          # (S, B, A)


# ----------------------------------- main -----------------------------------

if __name__ == "__main__":
    S, B = 8, 2                 # seq length, batch
    INPUT_SIZE = 16             # flattened 4x4 board
    NUM_ACTIONS = 4

    root = jax.random.PRNGKey(0)
    k_params, k_input = jax.random.split(root)

    params = init_params(k_params, INPUT_SIZE, NUM_ACTIONS, S)
    src = jax.random.normal(k_input, (S, B, INPUT_SIZE), jnp.float32)

    out = transformer16l_forward(src, params)
    out = jax.block_until_ready(out)

    assert out.shape == (S, B, NUM_ACTIONS), out.shape
    assert bool(jnp.all(jnp.isfinite(out)))
    # softmax rows should sum to ~1
    assert bool(jnp.allclose(jnp.sum(out, axis=-1), 1.0, atol=1e-3))
    print("KERNEL_OK")
</pallas_src>

<mosaic_0001>
module attributes {stable_mosaic.version = 11 : i64} {
  func.func @fused_transformer_kernel(%arg0: i32, %arg1: memref<16x16xf32, #tpu.memory_space<vmem>>, %arg2: memref<16x128xbf16, #tpu.memory_space<vmem>>, %arg3: memref<1x128xf32, #tpu.memory_space<vmem>>, %arg4: memref<16x128xf32, #tpu.memory_space<vmem>>, %arg5: memref<1x128x384xbf16, #tpu.memory_space<vmem>>, %arg6: memref<1x1x384xf32, #tpu.memory_space<vmem>>, %arg7: memref<1x128x128xbf16, #tpu.memory_space<vmem>>, %arg8: memref<1x1x128xf32, #tpu.memory_space<vmem>>, %arg9: memref<1x1x128xf32, #tpu.memory_space<vmem>>, %arg10: memref<1x1x128xf32, #tpu.memory_space<vmem>>, %arg11: memref<1x128x2048xbf16, #tpu.memory_space<vmem>>, %arg12: memref<1x1x2048xf32, #tpu.memory_space<vmem>>, %arg13: memref<1x2048x128xbf16, #tpu.memory_space<vmem>>, %arg14: memref<1x1x128xf32, #tpu.memory_space<vmem>>, %arg15: memref<1x1x128xf32, #tpu.memory_space<vmem>>, %arg16: memref<1x1x128xf32, #tpu.memory_space<vmem>>, %arg17: memref<128x128xbf16, #tpu.memory_space<vmem>>, %arg18: memref<1x128xf32, #tpu.memory_space<vmem>>, %arg19: memref<16x128xf32, #tpu.memory_space<vmem>>, %arg20: memref<16x128xf32, #tpu.memory_space<vmem>>) attributes {dimension_semantics = [#tpu.dimension_semantics<arbitrary>], iteration_bounds = array<i64: 16>, scalar_prefetch = 0 : i64, scratch_operands = 1 : i64, tpu.core_type = #tpu.core_type<tc>, window_params = [{pipeline_mode = #tpu.pipeline_mode<synchronous>, transform_indices = @transform_0, window_bounds = array<i64: 16, 16>}, {pipeline_mode = #tpu.pipeline_mode<synchronous>, transform_indices = @transform_1, window_bounds = array<i64: 16, 128>}, {pipeline_mode = #tpu.pipeline_mode<synchronous>, transform_indices = @transform_2, window_bounds = array<i64: 1, 128>}, {pipeline_mode = #tpu.pipeline_mode<synchronous>, transform_indices = @transform_3, window_bounds = array<i64: 16, 128>}, {transform_indices = @transform_4, window_bounds = array<i64: 1, 128, 384>}, {transform_indices = @transform_5, window_bounds = array<i64: 1, 1, 384>}, {transform_indices = @transform_6, window_bounds = array<i64: 1, 128, 128>}, {transform_indices = @transform_7, window_bounds = array<i64: 1, 1, 128>}, {transform_indices = @transform_8, window_bounds = array<i64: 1, 1, 128>}, {transform_indices = @transform_9, window_bounds = array<i64: 1, 1, 128>}, {transform_indices = @transform_10, window_bounds = array<i64: 1, 128, 2048>}, {transform_indices = @transform_11, window_bounds = array<i64: 1, 1, 2048>}, {transform_indices = @transform_12, window_bounds = array<i64: 1, 2048, 128>}, {transform_indices = @transform_13, window_bounds = array<i64: 1, 1, 128>}, {transform_indices = @transform_14, window_bounds = array<i64: 1, 1, 128>}, {transform_indices = @transform_15, window_bounds = array<i64: 1, 1, 128>}, {pipeline_mode = #tpu.pipeline_mode<synchronous>, transform_indices = @transform_16, window_bounds = array<i64: 128, 128>}, {pipeline_mode = #tpu.pipeline_mode<synchronous>, transform_indices = @transform_17, window_bounds = array<i64: 1, 128>}, {pipeline_mode = #tpu.pipeline_mode<synchronous>, transform_indices = @transform_18, window_bounds = array<i64: 16, 128>}]} {
    %c0_i32 = arith.constant 0 : i32
    %0 = arith.cmpi eq, %arg0, %c0_i32 : i32
    %1 = arith.extui %0 : i1 to i32
    %c0_i32_0 = arith.constant 0 : i32
    %2 = arith.cmpi ne, %1, %c0_i32_0 : i32
    scf.if %2 {
      %c0_95 = arith.constant 0 : index
      %c0_96 = arith.constant 0 : index
      %232 = vector.load %arg1[%c0_95, %c0_96] : memref<16x16xf32, #tpu.memory_space<vmem>>, vector<16x16xf32>
      %233 = arith.truncf %232 : vector<16x16xf32> to vector<16x16xbf16>
      %c0_97 = arith.constant 0 : index
      %c0_98 = arith.constant 0 : index
      %234 = vector.load %arg2[%c0_97, %c0_98] : memref<16x128xbf16, #tpu.memory_space<vmem>>, vector<16x128xbf16>
      %cst_99 = arith.constant dense<0.000000e+00> : vector<16x128xf32>
      %235 = tpu.matmul %233, %234, %cst_99 {dimension_numbers = #tpu.dot_dimension_numbers<[1], [0], [0], [1], [0, 0, 1, 1], [], []>} : vector<16x16xbf16>, vector<16x128xbf16>, vector<16x128xf32> -> vector<16x128xf32>
      %c0_100 = arith.constant 0 : index
      %c0_101 = arith.constant 0 : index
      %236 = vector.load %arg3[%c0_100, %c0_101] : memref<1x128xf32, #tpu.memory_space<vmem>>, vector<1x128xf32>
      %237 = vector.broadcast %236 : vector<1x128xf32> to vector<16x128xf32>
      %238 = arith.addf %235, %237 : vector<16x128xf32>
      %cst_102 = arith.constant 2.000000e+00 : f32
      %239 = vector.broadcast %cst_102 : f32 to vector<16x128xf32>
      %240 = arith.mulf %238, %239 : vector<16x128xf32>
      %c0_103 = arith.constant 0 : index
      %c0_104 = arith.constant 0 : index
      %241 = vector.load %arg4[%c0_103, %c0_104] : memref<16x128xf32, #tpu.memory_space<vmem>>, vector<16x128xf32>
      %242 = arith.addf %240, %241 : vector<16x128xf32>
      %c0_105 = arith.constant 0 : index
      %c0_106 = arith.constant 0 : index
      %243 = vector.load %arg20[%c0_105, %c0_106] : memref<16x128xf32, #tpu.memory_space<vmem>>, vector<16x128xf32>
      tpu.vector_store %arg20[%c0_105, %c0_106], %242 {strides = array<i32>} : memref<16x128xf32, #tpu.memory_space<vmem>>, vector<16x128xf32>,
    } else {
    }
    %c0 = arith.constant 0 : index
    %c0_1 = arith.constant 0 : index
    %3 = vector.load %arg20[%c0, %c0_1] : memref<16x128xf32, #tpu.memory_space<vmem>>, vector<16x128xf32>
    %4 = arith.truncf %3 : vector<16x128xf32> to vector<16x128xbf16>
    %c0_2 = arith.constant 0 : index
    %c0_3 = arith.constant 0 : index
    %c0_4 = arith.constant 0 : index
    %5 = vector.load %arg5[%c0_2, %c0_3, %c0_4] : memref<1x128x384xbf16, #tpu.memory_space<vmem>>, vector<1x128x384xbf16>
    %6 = vector.shape_cast %5 : vector<1x128x384xbf16> to vector<128x384xbf16>
    %cst = arith.constant dense<0.000000e+00> : vector<16x384xf32>
    %7 = tpu.matmul %4, %6, %cst {dimension_numbers = #tpu.dot_dimension_numbers<[1], [0], [0], [1], [0, 0, 1, 1], [], []>} : vector<16x128xbf16>, vector<128x384xbf16>, vector<16x384xf32> -> vector<16x384xf32>
    %c0_5 = arith.constant 0 : index
    %c0_6 = arith.constant 0 : index
    %c0_7 = arith.constant 0 : index
    %8 = vector.load %arg6[%c0_5, %c0_6, %c0_7] : memref<1x1x384xf32, #tpu.memory_space<vmem>>, vector<1x1x384xf32>
    %9 = vector.shape_cast %8 : vector<1x1x384xf32> to vector<1x384xf32>
    %10 = vector.broadcast %9 : vector<1x384xf32> to vector<16x384xf32>
    %11 = arith.addf %7, %10 : vector<16x384xf32>
    %12 = vector.extract_strided_slice %11 {offsets = [0, 0], sizes = [16, 128], strides = [1, 1]} : vector<16x384xf32> to vector<16x128xf32>
    %13 = vector.shape_cast %12 : vector<16x128xf32> to vector<2x8x128xf32>
    %14 = vector.extract_strided_slice %11 {offsets = [0, 128], sizes = [16, 128], strides = [1, 1]} : vector<16x384xf32> to vector<16x128xf32>
    %15 = vector.shape_cast %14 : vector<16x128xf32> to vector<2x8x128xf32>
    %16 = vector.extract_strided_slice %11 {offsets = [0, 256], sizes = [16, 128], strides = [1, 1]} : vector<16x384xf32> to vector<16x128xf32>
    %17 = vector.shape_cast %16 : vector<16x128xf32> to vector<2x8x128xf32>
    %18 = vector.extract_strided_slice %13 {offsets = [0, 0, 0], sizes = [2, 8, 16], strides = [1, 1, 1]} : vector<2x8x128xf32> to vector<2x8x16xf32>
    %19 = vector.extract_strided_slice %15 {offsets = [0, 0, 0], sizes = [2, 8, 16], strides = [1, 1, 1]} : vector<2x8x128xf32> to vector<2x8x16xf32>
    %20 = vector.extract_strided_slice %17 {offsets = [0, 0, 0], sizes = [2, 8, 16], strides = [1, 1, 1]} : vector<2x8x128xf32> to vector<2x8x16xf32>
    "tpu.trace_start"() <{level = 10 : i32, message = "bqd,bkd->bqk"}> : () -> ()
    %cst_8 = arith.constant dense<0.000000e+00> : vector<2x8x8xf32>
    %21 = tpu.matmul %18, %19, %cst_8 {dimension_numbers = #tpu.dot_dimension_numbers<[2], [2], [1], [1], [0, 0, 0, 1, 1, 1], [0], [0]>} : vector<2x8x16xf32>, vector<2x8x16xf32>, vector<2x8x8xf32> -> vector<2x8x8xf32>
    "tpu.trace_stop"() : () -> ()
    %cst_9 = arith.constant 2.500000e-01 : f32
    %22 = vector.broadcast %cst_9 : f32 to vector<2x8x8xf32>
    %23 = arith.mulf %21, %22 : vector<2x8x8xf32>
    %cst_10 = arith.constant dense<0xFF800000> : vector<2x8xf32>
    %24 = vector.multi_reduction <maximumf>, %23, %cst_10 [2] : vector<2x8x8xf32> to vector<2x8xf32>
    %25 = vector.shape_cast %24 : vector<2x8xf32> to vector<2x8x1xf32>
    %26 = vector.broadcast %25 : vector<2x8x1xf32> to vector<2x8x8xf32>
    %27 = arith.subf %23, %26 : vector<2x8x8xf32>
    %28 = math.exp %27 : vector<2x8x8xf32>
    %cst_11 = arith.constant dense<0.000000e+00> : vector<2x8xf32>
    %29 = vector.multi_reduction <add>, %28, %cst_11 [2] : vector<2x8x8xf32> to vector<2x8xf32>
    %30 = vector.shape_cast %29 : vector<2x8xf32> to vector<2x8x1xf32>
    %31 = vector.broadcast %30 : vector<2x8x1xf32> to vector<2x8x8xf32>
    %32 = arith.divf %28, %31 : vector<2x8x8xf32>
    "tpu.trace_start"() <{level = 10 : i32, message = "bqk,bkd->bqd"}> : () -> ()
    %cst_12 = arith.constant dense<0.000000e+00> : vector<2x8x16xf32>
    %33 = tpu.matmul %32, %20, %cst_12 {dimension_numbers = #tpu.dot_dimension_numbers<[2], [1], [1], [2], [0, 0, 0, 1, 1, 2], [0], [0]>} : vector<2x8x8xf32>, vector<2x8x16xf32>, vector<2x8x16xf32> -> vector<2x8x16xf32>
    "tpu.trace_stop"() : () -> ()
    %34 = vector.extract_strided_slice %13 {offsets = [0, 0, 16], sizes = [2, 8, 16], strides = [1, 1, 1]} : vector<2x8x128xf32> to vector<2x8x16xf32>
    %35 = vector.extract_strided_slice %15 {offsets = [0, 0, 16], sizes = [2, 8, 16], strides = [1, 1, 1]} : vector<2x8x128xf32> to vector<2x8x16xf32>
    %36 = vector.extract_strided_slice %17 {offsets = [0, 0, 16], sizes = [2, 8, 16], strides = [1, 1, 1]} : vector<2x8x128xf32> to vector<2x8x16xf32>
    "tpu.trace_start"() <{level = 10 : i32, message = "bqd,bkd->bqk"}> : () -> ()
    %cst_13 = arith.constant dense<0.000000e+00> : vector<2x8x8xf32>
    %37 = tpu.matmul %34, %35, %cst_13 {dimension_numbers = #tpu.dot_dimension_numbers<[2], [2], [1], [1], [0, 0, 0, 1, 1, 1], [0], [0]>} : vector<2x8x16xf32>, vector<2x8x16xf32>, vector<2x8x8xf32> -> vector<2x8x8xf32>
    "tpu.trace_stop"() : () -> ()
    %cst_14 = arith.constant 2.500000e-01 : f32
    %38 = vector.broadcast %cst_14 : f32 to vector<2x8x8xf32>
    %39 = arith.mulf %37, %38 : vector<2x8x8xf32>
    %cst_15 = arith.constant dense<0xFF800000> : vector<2x8xf32>
    %40 = vector.multi_reduction <maximumf>, %39, %cst_15 [2] : vector<2x8x8xf32> to vector<2x8xf32>
    %41 = vector.shape_cast %40 : vector<2x8xf32> to vector<2x8x1xf32>
    %42 = vector.broadcast %41 : vector<2x8x1xf32> to vector<2x8x8xf32>
    %43 = arith.subf %39, %42 : vector<2x8x8xf32>
    %44 = math.exp %43 : vector<2x8x8xf32>
    %cst_16 = arith.constant dense<0.000000e+00> : vector<2x8xf32>
    %45 = vector.multi_reduction <add>, %44, %cst_16 [2] : vector<2x8x8xf32> to vector<2x8xf32>
    %46 = vector.shape_cast %45 : vector<2x8xf32> to vector<2x8x1xf32>
    %47 = vector.broadcast %46 : vector<2x8x1xf32> to vector<2x8x8xf32>
    %48 = arith.divf %44, %47 : vector<2x8x8xf32>
    "tpu.trace_start"() <{level = 10 : i32, message = "bqk,bkd->bqd"}> : () -> ()
    %cst_17 = arith.constant dense<0.000000e+00> : vector<2x8x16xf32>
    %49 = tpu.matmul %48, %36, %cst_17 {dimension_numbers = #tpu.dot_dimension_numbers<[2], [1], [1], [2], [0, 0, 0, 1, 1, 2], [0], [0]>} : vector<2x8x8xf32>, vector<2x8x16xf32>, vector<2x8x16xf32> -> vector<2x8x16xf32>
    "tpu.trace_stop"() : () -> ()
    %50 = vector.extract_strided_slice %13 {offsets = [0, 0, 32], sizes = [2, 8, 16], strides = [1, 1, 1]} : vector<2x8x128xf32> to vector<2x8x16xf32>
    %51 = vector.extract_strided_slice %15 {offsets = [0, 0, 32], sizes = [2, 8, 16], strides = [1, 1, 1]} : vector<2x8x128xf32> to vector<2x8x16xf32>
    %52 = vector.extract_strided_slice %17 {offsets = [0, 0, 32], sizes = [2, 8, 16], strides = [1, 1, 1]} : vector<2x8x128xf32> to vector<2x8x16xf32>
    "tpu.trace_start"() <{level = 10 : i32, message = "bqd,bkd->bqk"}> : () -> ()
    %cst_18 = arith.constant dense<0.000000e+00> : vector<2x8x8xf32>
    %53 = tpu.matmul %50, %51, %cst_18 {dimension_numbers = #tpu.dot_dimension_numbers<[2], [2], [1], [1], [0, 0, 0, 1, 1, 1], [0], [0]>} : vector<2x8x16xf32>, vector<2x8x16xf32>, vector<2x8x8xf32> -> vector<2x8x8xf32>
    "tpu.trace_stop"() : () -> ()
    %cst_19 = arith.constant 2.500000e-01 : f32
    %54 = vector.broadcast %cst_19 : f32 to vector<2x8x8xf32>
    %55 = arith.mulf %53, %54 : vector<2x8x8xf32>
    %cst_20 = arith.constant dense<0xFF800000> : vector<2x8xf32>
    %56 = vector.multi_reduction <maximumf>, %55, %cst_20 [2] : vector<2x8x8xf32> to vector<2x8xf32>
    %57 = vector.shape_cast %56 : vector<2x8xf32> to vector<2x8x1xf32>
    %58 = vector.broadcast %57 : vector<2x8x1xf32> to vector<2x8x8xf32>
    %59 = arith.subf %55, %58 : vector<2x8x8xf32>
    %60 = math.exp %59 : vector<2x8x8xf32>
    %cst_21 = arith.constant dense<0.000000e+00> : vector<2x8xf32>
    %61 = vector.multi_reduction <add>, %60, %cst_21 [2] : vector<2x8x8xf32> to vector<2x8xf32>
    %62 = vector.shape_cast %61 : vector<2x8xf32> to vector<2x8x1xf32>
    %63 = vector.broadcast %62 : vector<2x8x1xf32> to vector<2x8x8xf32>
    %64 = arith.divf %60, %63 : vector<2x8x8xf32>
    "tpu.trace_start"() <{level = 10 : i32, message = "bqk,bkd->bqd"}> : () -> ()
    %cst_22 = arith.constant dense<0.000000e+00> : vector<2x8x16xf32>
    %65 = tpu.matmul %64, %52, %cst_22 {dimension_numbers = #tpu.dot_dimension_numbers<[2], [1], [1], [2], [0, 0, 0, 1, 1, 2], [0], [0]>} : vector<2x8x8xf32>, vector<2x8x16xf32>, vector<2x8x16xf32> -> vector<2x8x16xf32>
    "tpu.trace_stop"() : () -> ()
    %66 = vector.extract_strided_slice %13 {offsets = [0, 0, 48], sizes = [2, 8, 16], strides = [1, 1, 1]} : vector<2x8x128xf32> to vector<2x8x16xf32>
    %67 = vector.extract_strided_slice %15 {offsets = [0, 0, 48], sizes = [2, 8, 16], strides = [1, 1, 1]} : vector<2x8x128xf32> to vector<2x8x16xf32>
    %68 = vector.extract_strided_slice %17 {offsets = [0, 0, 48], sizes = [2, 8, 16], strides = [1, 1, 1]} : vector<2x8x128xf32> to vector<2x8x16xf32>
    "tpu.trace_start"() <{level = 10 : i32, message = "bqd,bkd->bqk"}> : () -> ()
    %cst_23 = arith.constant dense<0.000000e+00> : vector<2x8x8xf32>
    %69 = tpu.matmul %66, %67, %cst_23 {dimension_numbers = #tpu.dot_dimension_numbers<[2], [2], [1], [1], [0, 0, 0, 1, 1, 1], [0], [0]>} : vector<2x8x16xf32>, vector<2x8x16xf32>, vector<2x8x8xf32> -> vector<2x8x8xf32>
    "tpu.trace_stop"() : () -> ()
    %cst_24 = arith.constant 2.500000e-01 : f32
    %70 = vector.broadcast %cst_24 : f32 to vector<2x8x8xf32>
    %71 = arith.mulf %69, %70 : vector<2x8x8xf32>
    %cst_25 = arith.constant dense<0xFF800000> : vector<2x8xf32>
    %72 = vector.multi_reduction <maximumf>, %71, %cst_25 [2] : vector<2x8x8xf32> to vector<2x8xf32>
    %73 = vector.shape_cast %72 : vector<2x8xf32> to vector<2x8x1xf32>
    %74 = vector.broadcast %73 : vector<2x8x1xf32> to vector<2x8x8xf32>
    %75 = arith.subf %71, %74 : vector<2x8x8xf32>
    %76 = math.exp %75 : vector<2x8x8xf32>
    %cst_26 = arith.constant dense<0.000000e+00> : vector<2x8xf32>
    %77 = vector.multi_reduction <add>, %76, %cst_26 [2] : vector<2x8x8xf32> to vector<2x8xf32>
    %78 = vector.shape_cast %77 : vector<2x8xf32> to vector<2x8x1xf32>
    %79 = vector.broadcast %78 : vector<2x8x1xf32> to vector<2x8x8xf32>
    %80 = arith.divf %76, %79 : vector<2x8x8xf32>
    "tpu.trace_start"() <{level = 10 : i32, message = "bqk,bkd->bqd"}> : () -> ()
    %cst_27 = arith.constant dense<0.000000e+00> : vector<2x8x16xf32>
    %81 = tpu.matmul %80, %68, %cst_27 {dimension_numbers = #tpu.dot_dimension_numbers<[2], [1], [1], [2], [0, 0, 0, 1, 1, 2], [0], [0]>} : vector<2x8x8xf32>, vector<2x8x16xf32>, vector<2x8x16xf32> -> vector<2x8x16xf32>
    "tpu.trace_stop"() : () -> ()
    %82 = vector.extract_strided_slice %13 {offsets = [0, 0, 64], sizes = [2, 8, 16], strides = [1, 1, 1]} : vector<2x8x128xf32> to vector<2x8x16xf32>
    %83 = vector.extract_strided_slice %15 {offsets = [0, 0, 64], sizes = [2, 8, 16], strides = [1, 1, 1]} : vector<2x8x128xf32> to vector<2x8x16xf32>
    %84 = vector.extract_strided_slice %17 {offsets = [0, 0, 64], sizes = [2, 8, 16], strides = [1, 1, 1]} : vector<2x8x128xf32> to vector<2x8x16xf32>
    "tpu.trace_start"() <{level = 10 : i32, message = "bqd,bkd->bqk"}> : () -> ()
    %cst_28 = arith.constant dense<0.000000e+00> : vector<2x8x8xf32>
    %85 = tpu.matmul %82, %83, %cst_28 {dimension_numbers = #tpu.dot_dimension_numbers<[2], [2], [1], [1], [0, 0, 0, 1, 1, 1], [0], [0]>} : vector<2x8x16xf32>, vector<2x8x16xf32>, vector<2x8x8xf32> -> vector<2x8x8xf32>
    "tpu.trace_stop"() : () -> ()
    %cst_29 = arith.constant 2.500000e-01 : f32
    %86 = vector.broadcast %cst_29 : f32 to vector<2x8x8xf32>
    %87 = arith.mulf %85, %86 : vector<2x8x8xf32>
    %cst_30 = arith.constant dense<0xFF800000> : vector<2x8xf32>
    %88 = vector.multi_reduction <maximumf>, %87, %cst_30 [2] : vector<2x8x8xf32> to vector<2x8xf32>
    %89 = vector.shape_cast %88 : vector<2x8xf32> to vector<2x8x1xf32>
    %90 = vector.broadcast %89 : vector<2x8x1xf32> to vector<2x8x8xf32>
    %91 = arith.subf %87, %90 : vector<2x8x8xf32>
    %92 = math.exp %91 : vector<2x8x8xf32>
    %cst_31 = arith.constant dense<0.000000e+00> : vector<2x8xf32>
    %93 = vector.multi_reduction <add>, %92, %cst_31 [2] : vector<2x8x8xf32> to vector<2x8xf32>
    %94 = vector.shape_cast %93 : vector<2x8xf32> to vector<2x8x1xf32>
    %95 = vector.broadcast %94 : vector<2x8x1xf32> to vector<2x8x8xf32>
    %96 = arith.divf %92, %95 : vector<2x8x8xf32>
    "tpu.trace_start"() <{level = 10 : i32, message = "bqk,bkd->bqd"}> : () -> ()
    %cst_32 = arith.constant dense<0.000000e+00> : vector<2x8x16xf32>
    %97 = tpu.matmul %96, %84, %cst_32 {dimension_numbers = #tpu.dot_dimension_numbers<[2], [1], [1], [2], [0, 0, 0, 1, 1, 2], [0], [0]>} : vector<2x8x8xf32>, vector<2x8x16xf32>, vector<2x8x16xf32> -> vector<2x8x16xf32>
    "tpu.trace_stop"() : () -> ()
    %98 = vector.extract_strided_slice %13 {offsets = [0, 0, 80], sizes = [2, 8, 16], strides = [1, 1, 1]} : vector<2x8x128xf32> to vector<2x8x16xf32>
    %99 = vector.extract_strided_slice %15 {offsets = [0, 0, 80], sizes = [2, 8, 16], strides = [1, 1, 1]} : vector<2x8x128xf32> to vector<2x8x16xf32>
    %100 = vector.extract_strided_slice %17 {offsets = [0, 0, 80], sizes = [2, 8, 16], strides = [1, 1, 1]} : vector<2x8x128xf32> to vector<2x8x16xf32>
    "tpu.trace_start"() <{level = 10 : i32, message = "bqd,bkd->bqk"}> : () -> ()
    %cst_33 = arith.constant dense<0.000000e+00> : vector<2x8x8xf32>
    %101 = tpu.matmul %98, %99, %cst_33 {dimension_numbers = #tpu.dot_dimension_numbers<[2], [2], [1], [1], [0, 0, 0, 1, 1, 1], [0], [0]>} : vector<2x8x16xf32>, vector<2x8x16xf32>, vector<2x8x8xf32> -> vector<2x8x8xf32>
    "tpu.trace_stop"() : () -> ()
    %cst_34 = arith.constant 2.500000e-01 : f32
    %102 = vector.broadcast %cst_34 : f32 to vector<2x8x8xf32>
    %103 = arith.mulf %101, %102 : vector<2x8x8xf32>
    %cst_35 = arith.constant dense<0xFF800000> : vector<2x8xf32>
    %104 = vector.multi_reduction <maximumf>, %103, %cst_35 [2] : vector<2x8x8xf32> to vector<2x8xf32>
    %105 = vector.shape_cast %104 : vector<2x8xf32> to vector<2x8x1xf32>
    %106 = vector.broadcast %105 : vector<2x8x1xf32> to vector<2x8x8xf32>
    %107 = arith.subf %103, %106 : vector<2x8x8xf32>
    %108 = math.exp %107 : vector<2x8x8xf32>
    %cst_36 = arith.constant dense<0.000000e+00> : vector<2x8xf32>
    %109 = vector.multi_reduction <add>, %108, %cst_36 [2] : vector<2x8x8xf32> to vector<2x8xf32>
    %110 = vector.shape_cast %109 : vector<2x8xf32> to vector<2x8x1xf32>
    %111 = vector.broadcast %110 : vector<2x8x1xf32> to vector<2x8x8xf32>
    %112 = arith.divf %108, %111 : vector<2x8x8xf32>
    "tpu.trace_start"() <{level = 10 : i32, message = "bqk,bkd->bqd"}> : () -> ()
    %cst_37 = arith.constant dense<0.000000e+00> : vector<2x8x16xf32>
    %113 = tpu.matmul %112, %100, %cst_37 {dimension_numbers = #tpu.dot_dimension_numbers<[2], [1], [1], [2], [0, 0, 0, 1, 1, 2], [0], [0]>} : vector<2x8x8xf32>, vector<2x8x16xf32>, vector<2x8x16xf32> -> vector<2x8x16xf32>
    "tpu.trace_stop"() : () -> ()
    %114 = vector.extract_strided_slice %13 {offsets = [0, 0, 96], sizes = [2, 8, 16], strides = [1, 1, 1]} : vector<2x8x128xf32> to vector<2x8x16xf32>
    %115 = vector.extract_strided_slice %15 {offsets = [0, 0, 96], sizes = [2, 8, 16], strides = [1, 1, 1]} : vector<2x8x128xf32> to vector<2x8x16xf32>
    %116 = vector.extract_strided_slice %17 {offsets = [0, 0, 96], sizes = [2, 8, 16], strides = [1, 1, 1]} : vector<2x8x128xf32> to vector<2x8x16xf32>
    "tpu.trace_start"() <{level = 10 : i32, message = "bqd,bkd->bqk"}> : () -> ()
    %cst_38 = arith.constant dense<0.000000e+00> : vector<2x8x8xf32>
    %117 = tpu.matmul %114, %115, %cst_38 {dimension_numbers = #tpu.dot_dimension_numbers<[2], [2], [1], [1], [0, 0, 0, 1, 1, 1], [0], [0]>} : vector<2x8x16xf32>, vector<2x8x16xf32>, vector<2x8x8xf32> -> vector<2x8x8xf32>
    "tpu.trace_stop"() : () -> ()
    %cst_39 = arith.constant 2.500000e-01 : f32
    %118 = vector.broadcast %cst_39 : f32 to vector<2x8x8xf32>
    %119 = arith.mulf %117, %118 : vector<2x8x8xf32>
    %cst_40 = arith.constant dense<0xFF800000> : vector<2x8xf32>
    %120 = vector.multi_reduction <maximumf>, %119, %cst_40 [2] : vector<2x8x8xf32> to vector<2x8xf32>
    %121 = vector.shape_cast %120 : vector<2x8xf32> to vector<2x8x1xf32>
    %122 = vector.broadcast %121 : vector<2x8x1xf32> to vector<2x8x8xf32>
    %123 = arith.subf %119, %122 : vector<2x8x8xf32>
    %124 = math.exp %123 : vector<2x8x8xf32>
    %cst_41 = arith.constant dense<0.000000e+00> : vector<2x8xf32>
    %125 = vector.multi_reduction <add>, %124, %cst_41 [2] : vector<2x8x8xf32> to vector<2x8xf32>
    %126 = vector.shape_cast %125 : vector<2x8xf32> to vector<2x8x1xf32>
    %127 = vector.broadcast %126 : vector<2x8x1xf32> to vector<2x8x8xf32>
    %128 = arith.divf %124, %127 : vector<2x8x8xf32>
    "tpu.trace_start"() <{level = 10 : i32, message = "bqk,bkd->bqd"}> : () -> ()
    %cst_42 = arith.constant dense<0.000000e+00> : vector<2x8x16xf32>
    %129 = tpu.matmul %128, %116, %cst_42 {dimension_numbers = #tpu.dot_dimension_numbers<[2], [1], [1], [2], [0, 0, 0, 1, 1, 2], [0], [0]>} : vector<2x8x8xf32>, vector<2x8x16xf32>, vector<2x8x16xf32> -> vector<2x8x16xf32>
    "tpu.trace_stop"() : () -> ()
    %130 = vector.extract_strided_slice %13 {offsets = [0, 0, 112], sizes = [2, 8, 16], strides = [1, 1, 1]} : vector<2x8x128xf32> to vector<2x8x16xf32>
    %131 = vector.extract_strided_slice %15 {offsets = [0, 0, 112], sizes = [2, 8, 16], strides = [1, 1, 1]} : vector<2x8x128xf32> to vector<2x8x16xf32>
    %132 = vector.extract_strided_slice %17 {offsets = [0, 0, 112], sizes = [2, 8, 16], strides = [1, 1, 1]} : vector<2x8x128xf32> to vector<2x8x16xf32>
    "tpu.trace_start"() <{level = 10 : i32, message = "bqd,bkd->bqk"}> : () -> ()
    %cst_43 = arith.constant dense<0.000000e+00> : vector<2x8x8xf32>
    %133 = tpu.matmul %130, %131, %cst_43 {dimension_numbers = #tpu.dot_dimension_numbers<[2], [2], [1], [1], [0, 0, 0, 1, 1, 1], [0], [0]>} : vector<2x8x16xf32>, vector<2x8x16xf32>, vector<2x8x8xf32> -> vector<2x8x8xf32>
    "tpu.trace_stop"() : () -> ()
    %cst_44 = arith.constant 2.500000e-01 : f32
    %134 = vector.broadcast %cst_44 : f32 to vector<2x8x8xf32>
    %135 = arith.mulf %133, %134 : vector<2x8x8xf32>
    %cst_45 = arith.constant dense<0xFF800000> : vector<2x8xf32>
    %136 = vector.multi_reduction <maximumf>, %135, %cst_45 [2] : vector<2x8x8xf32> to vector<2x8xf32>
    %137 = vector.shape_cast %136 : vector<2x8xf32> to vector<2x8x1xf32>
    %138 = vector.broadcast %137 : vector<2x8x1xf32> to vector<2x8x8xf32>
    %139 = arith.subf %135, %138 : vector<2x8x8xf32>
    %140 = math.exp %139 : vector<2x8x8xf32>
    %cst_46 = arith.constant dense<0.000000e+00> : vector<2x8xf32>
    %141 = vector.multi_reduction <add>, %140, %cst_46 [2] : vector<2x8x8xf32> to vector<2x8xf32>
    %142 = vector.shape_cast %141 : vector<2x8xf32> to vector<2x8x1xf32>
    %143 = vector.broadcast %142 : vector<2x8x1xf32> to vector<2x8x8xf32>
    %144 = arith.divf %140, %143 : vector<2x8x8xf32>
    "tpu.trace_start"() <{level = 10 : i32, message = "bqk,bkd->bqd"}> : () -> ()
    %cst_47 = arith.constant dense<0.000000e+00> : vector<2x8x16xf32>
    %145 = tpu.matmul %144, %132, %cst_47 {dimension_numbers = #tpu.dot_dimension_numbers<[2], [1], [1], [2], [0, 0, 0, 1, 1, 2], [0], [0]>} : vector<2x8x8xf32>, vector<2x8x16xf32>, vector<2x8x16xf32> -> vector<2x8x16xf32>
    "tpu.trace_stop"() : () -> ()
    %146 = tpu.concatenate %33, %49, %65, %81, %97, %113, %129, %145 in 2 : vector<2x8x16xf32>, vector<2x8x16xf32>, vector<2x8x16xf32>, vector<2x8x16xf32>, vector<2x8x16xf32>, vector<2x8x16xf32>, vector<2x8x16xf32>, vector<2x8x16xf32> -> vector<2x8x128xf32>
    %147 = vector.shape_cast %146 : vector<2x8x128xf32> to vector<16x128xf32>
    %148 = arith.truncf %147 : vector<16x128xf32> to vector<16x128xbf16>
    %c0_48 = arith.constant 0 : index
    %c0_49 = arith.constant 0 : index
    %c0_50 = arith.constant 0 : index
    %149 = vector.load %arg7[%c0_48, %c0_49, %c0_50] : memref<1x128x128xbf16, #tpu.memory_space<vmem>>, vector<1x128x128xbf16>
    %150 = vector.shape_cast %149 : vector<1x128x128xbf16> to vector<128x128xbf16>
    %cst_51 = arith.constant dense<0.000000e+00> : vector<16x128xf32>
    %151 = tpu.matmul %148, %150, %cst_51 {dimension_numbers = #tpu.dot_dimension_numbers<[1], [0], [0], [1], [0, 0, 1, 1], [], []>} : vector<16x128xbf16>, vector<128x128xbf16>, vector<16x128xf32> -> vector<16x128xf32>
    %c0_52 = arith.constant 0 : index
    %c0_53 = arith.constant 0 : index
    %c0_54 = arith.constant 0 : index
    %152 = vector.load %arg8[%c0_52, %c0_53, %c0_54] : memref<1x1x128xf32, #tpu.memory_space<vmem>>, vector<1x1x128xf32>
    %153 = vector.shape_cast %152 : vector<1x1x128xf32> to vector<1x128xf32>
    %154 = vector.broadcast %153 : vector<1x128xf32> to vector<16x128xf32>
    %155 = arith.addf %151, %154 : vector<16x128xf32>
    %156 = arith.addf %3, %155 : vector<16x128xf32>
    %c0_55 = arith.constant 0 : index
    %c0_56 = arith.constant 0 : index
    %c0_57 = arith.constant 0 : index
    %157 = vector.load %arg9[%c0_55, %c0_56, %c0_57] : memref<1x1x128xf32, #tpu.memory_space<vmem>>, vector<1x1x128xf32>
    %158 = vector.shape_cast %157 : vector<1x1x128xf32> to vector<1x128xf32>
    %c0_58 = arith.constant 0 : index
    %c0_59 = arith.constant 0 : index
    %c0_60 = arith.constant 0 : index
    %159 = vector.load %arg10[%c0_58, %c0_59, %c0_60] : memref<1x1x128xf32, #tpu.memory_space<vmem>>, vector<1x1x128xf32>
    %160 = vector.shape_cast %159 : vector<1x1x128xf32> to vector<1x128xf32>
    %cst_61 = arith.constant dense<0.000000e+00> : vector<16xf32>
    %161 = vector.multi_reduction <add>, %156, %cst_61 [1] : vector<16x128xf32> to vector<16xf32>
    %162 = vector.shape_cast %161 : vector<16xf32> to vector<16x1xf32>
    %cst_62 = arith.constant 1.280000e+02 : f32
    %163 = vector.broadcast %cst_62 : f32 to vector<16x1xf32>
    %164 = arith.divf %162, %163 : vector<16x1xf32>
    %165 = vector.broadcast %164 : vector<16x1xf32> to vector<16x128xf32>
    %166 = arith.subf %156, %165 : vector<16x128xf32>
    %167 = arith.mulf %166, %166 : vector<16x128xf32>
    %cst_63 = arith.constant dense<0.000000e+00> : vector<16xf32>
    %168 = vector.multi_reduction <add>, %167, %cst_63 [1] : vector<16x128xf32> to vector<16xf32>
    %169 = vector.shape_cast %168 : vector<16xf32> to vector<16x1xf32>
    %cst_64 = arith.constant 1.280000e+02 : f32
    %170 = vector.broadcast %cst_64 : f32 to vector<16x1xf32>
    %171 = arith.divf %169, %170 : vector<16x1xf32>
    %172 = vector.broadcast %164 : vector<16x1xf32> to vector<16x128xf32>
    %173 = arith.subf %156, %172 : vector<16x128xf32>
    %cst_65 = arith.constant 9.99999974E-6 : f32
    %174 = vector.broadcast %cst_65 : f32 to vector<16x1xf32>
    %175 = arith.addf %171, %174 : vector<16x1xf32>
    %176 = math.rsqrt %175 : vector<16x1xf32>
    %177 = vector.broadcast %176 : vector<16x1xf32> to vector<16x128xf32>
    %178 = arith.mulf %173, %177 : vector<16x128xf32>
    %179 = vector.broadcast %158 : vector<1x128xf32> to vector<16x128xf32>
    %180 = arith.mulf %178, %179 : vector<16x128xf32>
    %181 = vector.broadcast %160 : vector<1x128xf32> to vector<16x128xf32>
    %182 = arith.addf %180, %181 : vector<16x128xf32>
    %183 = arith.truncf %182 : vector<16x128xf32> to vector<16x128xbf16>
    %c0_66 = arith.constant 0 : index
    %c0_67 = arith.constant 0 : index
    %c0_68 = arith.constant 0 : index
    %184 = vector.load %arg11[%c0_66, %c0_67, %c0_68] : memref<1x128x2048xbf16, #tpu.memory_space<vmem>>, vector<1x128x2048xbf16>
    %185 = vector.shape_cast %184 : vector<1x128x2048xbf16> to vector<128x2048xbf16>
    %cst_69 = arith.constant dense<0.000000e+00> : vector<16x2048xf32>
    %186 = tpu.matmul %183, %185, %cst_69 {dimension_numbers = #tpu.dot_dimension_numbers<[1], [0], [0], [1], [0, 0, 1, 1], [], []>} : vector<16x128xbf16>, vector<128x2048xbf16>, vector<16x2048xf32> -> vector<16x2048xf32>
    %c0_70 = arith.constant 0 : index
    %c0_71 = arith.constant 0 : index
    %c0_72 = arith.constant 0 : index
    %187 = vector.load %arg12[%c0_70, %c0_71, %c0_72] : memref<1x1x2048xf32, #tpu.memory_space<vmem>>, vector<1x1x2048xf32>
    %188 = vector.shape_cast %187 : vector<1x1x2048xf32> to vector<1x2048xf32>
    %189 = vector.broadcast %188 : vector<1x2048xf32> to vector<16x2048xf32>
    %190 = arith.addf %186, %189 : vector<16x2048xf32>
    %cst_73 = arith.constant 0.000000e+00 : f32
    %191 = vector.broadcast %cst_73 : f32 to vector<16x2048xf32>
    %192 = arith.maximumf %190, %191 : vector<16x2048xf32>
    %193 = arith.truncf %192 : vector<16x2048xf32> to vector<16x2048xbf16>
    %c0_74 = arith.constant 0 : index
    %c0_75 = arith.constant 0 : index
    %c0_76 = arith.constant 0 : index
    %194 = vector.load %arg13[%c0_74, %c0_75, %c0_76] : memref<1x2048x128xbf16, #tpu.memory_space<vmem>>, vector<1x2048x128xbf16>
    %195 = vector.shape_cast %194 : vector<1x2048x128xbf16> to vector<2048x128xbf16>
    %cst_77 = arith.constant dense<0.000000e+00> : vector<16x128xf32>
    %196 = tpu.matmul %193, %195, %cst_77 {dimension_numbers = #tpu.dot_dimension_numbers<[1], [0], [0], [1], [0, 0, 1, 1], [], []>} : vector<16x2048xbf16>, vector<2048x128xbf16>, vector<16x128xf32> -> vector<16x128xf32>
    %c0_78 = arith.constant 0 : index
    %c0_79 = arith.constant 0 : index
    %c0_80 = arith.constant 0 : index
    %197 = vector.load %arg14[%c0_78, %c0_79, %c0_80] : memref<1x1x128xf32, #tpu.memory_space<vmem>>, vector<1x1x128xf32>
    %198 = vector.shape_cast %197 : vector<1x1x128xf32> to vector<1x128xf32>
    %199 = vector.broadcast %198 : vector<1x128xf32> to vector<16x128xf32>
    %200 = arith.addf %196, %199 : vector<16x128xf32>
    %201 = arith.addf %182, %200 : vector<16x128xf32>
    %c0_81 = arith.constant 0 : index
    %c0_82 = arith.constant 0 : index
    %c0_83 = arith.constant 0 : index
    %202 = vector.load %arg15[%c0_81, %c0_82, %c0_83] : memref<1x1x128xf32, #tpu.memory_space<vmem>>, vector<1x1x128xf32>
    %203 = vector.shape_cast %202 : vector<1x1x128xf32> to vector<1x128xf32>
    %c0_84 = arith.constant 0 : index
    %c0_85 = arith.constant 0 : index
    %c0_86 = arith.constant 0 : index
    %204 = vector.load %arg16[%c0_84, %c0_85, %c0_86] : memref<1x1x128xf32, #tpu.memory_space<vmem>>, vector<1x1x128xf32>
    %205 = vector.shape_cast %204 : vector<1x1x128xf32> to vector<1x128xf32>
    %cst_87 = arith.constant dense<0.000000e+00> : vector<16xf32>
    %206 = vector.multi_reduction <add>, %201, %cst_87 [1] : vector<16x128xf32> to vector<16xf32>
    %207 = vector.shape_cast %206 : vector<16xf32> to vector<16x1xf32>
    %cst_88 = arith.constant 1.280000e+02 : f32
    %208 = vector.broadcast %cst_88 : f32 to vector<16x1xf32>
    %209 = arith.divf %207, %208 : vector<16x1xf32>
    %210 = vector.broadcast %209 : vector<16x1xf32> to vector<16x128xf32>
    %211 = arith.subf %201, %210 : vector<16x128xf32>
    %212 = arith.mulf %211, %211 : vector<16x128xf32>
    %cst_89 = arith.constant dense<0.000000e+00> : vector<16xf32>
    %213 = vector.multi_reduction <add>, %212, %cst_89 [1] : vector<16x128xf32> to vector<16xf32>
    %214 = vector.shape_cast %213 : vector<16xf32> to vector<16x1xf32>
    %cst_90 = arith.constant 1.280000e+02 : f32
    %215 = vector.broadcast %cst_90 : f32 to vector<16x1xf32>
    %216 = arith.divf %214, %215 : vector<16x1xf32>
    %217 = vector.broadcast %209 : vector<16x1xf32> to vector<16x128xf32>
    %218 = arith.subf %201, %217 : vector<16x128xf32>
    %cst_91 = arith.constant 9.99999974E-6 : f32
    %219 = vector.broadcast %cst_91 : f32 to vector<16x1xf32>
    %220 = arith.addf %216, %219 : vector<16x1xf32>
    %221 = math.rsqrt %220 : vector<16x1xf32>
    %222 = vector.broadcast %221 : vector<16x1xf32> to vector<16x128xf32>
    %223 = arith.mulf %218, %222 : vector<16x128xf32>
    %224 = vector.broadcast %203 : vector<1x128xf32> to vector<16x128xf32>
    %225 = arith.mulf %223, %224 : vector<16x128xf32>
    %226 = vector.broadcast %205 : vector<1x128xf32> to vector<16x128xf32>
    %227 = arith.addf %225, %226 : vector<16x128xf32>
    %c0_92 = arith.constant 0 : index
    %c0_93 = arith.constant 0 : index
    %228 = vector.load %arg20[%c0_92, %c0_93] : memref<16x128xf32, #tpu.memory_space<vmem>>, vector<16x128xf32>
    tpu.vector_store %arg20[%c0_92, %c0_93], %227 {strides = array<i32>} : memref<16x128xf32, #tpu.memory_space<vmem>>, vector<16x128xf32>,
    %c15_i32 = arith.constant 15 : i32
    %229 = arith.cmpi eq, %arg0, %c15_i32 : i32
    %230 = arith.extui %229 : i1 to i32
    %c0_i32_94 = arith.constant 0 : i32
    %231 = arith.cmpi ne, %230, %c0_i32_94 : i32
    scf.if %231 {
      %232 = arith.truncf %227 : vector<16x128xf32> to vector<16x128xbf16>
      %c0_95 = arith.constant 0 : index
      %c0_96 = arith.constant 0 : index
      %233 = vector.load %arg17[%c0_95, %c0_96] : memref<128x128xbf16, #tpu.memory_space<vmem>>, vector<128x128xbf16>
      %cst_97 = arith.constant dense<0.000000e+00> : vector<16x128xf32>
      %234 = tpu.matmul %232, %233, %cst_97 {dimension_numbers = #tpu.dot_dimension_numbers<[1], [0], [0], [1], [0, 0, 1, 1], [], []>} : vector<16x128xbf16>, vector<128x128xbf16>, vector<16x128xf32> -> vector<16x128xf32>
      %c0_98 = arith.constant 0 : index
      %c0_99 = arith.constant 0 : index
      %235 = vector.load %arg18[%c0_98, %c0_99] : memref<1x128xf32, #tpu.memory_space<vmem>>, vector<1x128xf32>
      %236 = vector.broadcast %235 : vector<1x128xf32> to vector<16x128xf32>
      %237 = arith.addf %234, %236 : vector<16x128xf32>
      %cst_100 = arith.constant dense<0xFF800000> : vector<16xf32>
      %238 = vector.multi_reduction <maximumf>, %237, %cst_100 [1] : vector<16x128xf32> to vector<16xf32>
      %239 = vector.shape_cast %238 : vector<16xf32> to vector<16x1xf32>
      %240 = vector.broadcast %239 : vector<16x1xf32> to vector<16x128xf32>
      %241 = arith.subf %237, %240 : vector<16x128xf32>
      %242 = math.exp %241 : vector<16x128xf32>
      %cst_101 = arith.constant dense<0.000000e+00> : vector<16xf32>
      %243 = vector.multi_reduction <add>, %242, %cst_101 [1] : vector<16x128xf32> to vector<16xf32>
      %244 = vector.shape_cast %243 : vector<16xf32> to vector<16x1xf32>
      %245 = vector.broadcast %244 : vector<16x1xf32> to vector<16x128xf32>
      %246 = arith.divf %242, %245 : vector<16x128xf32>
      %c0_102 = arith.constant 0 : index
      %c0_103 = arith.constant 0 : index
      %247 = vector.load %arg19[%c0_102, %c0_103] : memref<16x128xf32, #tpu.memory_space<vmem>>, vector<16x128xf32>
      tpu.vector_store %arg19[%c0_102, %c0_103], %246 {strides = array<i32>} : memref<16x128xf32, #tpu.memory_space<vmem>>, vector<16x128xf32>,
    } else {
    }
    return
  }
  func.func @transform_0(%arg0: i32) -> (i32, i32) {
    %c0_i32 = arith.constant 0 : i32
    %c0_i32_0 = arith.constant 0 : i32
    %c0_i32_1 = arith.constant 0 : i32
    return %c0_i32, %c0_i32_0 : i32, i32
  }
  func.func @transform_1(%arg0: i32) -> (i32, i32) {
    %c0_i32 = arith.constant 0 : i32
    %c0_i32_0 = arith.constant 0 : i32
    %c0_i32_1 = arith.constant 0 : i32
    return %c0_i32, %c0_i32_0 : i32, i32
  }
  func.func @transform_2(%arg0: i32) -> (i32, i32) {
    %c0_i32 = arith.constant 0 : i32
    %c0_i32_0 = arith.constant 0 : i32
    %c0_i32_1 = arith.constant 0 : i32
    return %c0_i32, %c0_i32_0 : i32, i32
  }
  func.func @transform_3(%arg0: i32) -> (i32, i32) {
    %c0_i32 = arith.constant 0 : i32
    %c0_i32_0 = arith.constant 0 : i32
    %c0_i32_1 = arith.constant 0 : i32
    return %c0_i32, %c0_i32_0 : i32, i32
  }
  func.func @transform_4(%arg0: i32) -> (i32, i32, i32) {
    %c0_i32 = arith.constant 0 : i32
    %c0_i32_0 = arith.constant 0 : i32
    %c0_i32_1 = arith.constant 0 : i32
    return %arg0, %c0_i32, %c0_i32_0 : i32, i32, i32
  }
  func.func @transform_5(%arg0: i32) -> (i32, i32, i32) {
    %c0_i32 = arith.constant 0 : i32
    %c0_i32_0 = arith.constant 0 : i32
    %c0_i32_1 = arith.constant 0 : i32
    return %arg0, %c0_i32, %c0_i32_0 : i32, i32, i32
  }
  func.func @transform_6(%arg0: i32) -> (i32, i32, i32) {
    %c0_i32 = arith.constant 0 : i32
    %c0_i32_0 = arith.constant 0 : i32
    %c0_i32_1 = arith.constant 0 : i32
    return %arg0, %c0_i32, %c0_i32_0 : i32, i32, i32
  }
  func.func @transform_7(%arg0: i32) -> (i32, i32, i32) {
    %c0_i32 = arith.constant 0 : i32
    %c0_i32_0 = arith.constant 0 : i32
    %c0_i32_1 = arith.constant 0 : i32
    return %arg0, %c0_i32, %c0_i32_0 : i32, i32, i32
  }
  func.func @transform_8(%arg0: i32) -> (i32, i32, i32) {
    %c0_i32 = arith.constant 0 : i32
    %c0_i32_0 = arith.constant 0 : i32
    %c0_i32_1 = arith.constant 0 : i32
    return %arg0, %c0_i32, %c0_i32_0 : i32, i32, i32
  }
  func.func @transform_9(%arg0: i32) -> (i32, i32, i32) {
    %c0_i32 = arith.constant 0 : i32
    %c0_i32_0 = arith.constant 0 : i32
    %c0_i32_1 = arith.constant 0 : i32
    return %arg0, %c0_i32, %c0_i32_0 : i32, i32, i32
  }
  func.func @transform_10(%arg0: i32) -> (i32, i32, i32) {
    %c0_i32 = arith.constant 0 : i32
    %c0_i32_0 = arith.constant 0 : i32
    %c0_i32_1 = arith.constant 0 : i32
    return %arg0, %c0_i32, %c0_i32_0 : i32, i32, i32
  }
  func.func @transform_11(%arg0: i32) -> (i32, i32, i32) {
    %c0_i32 = arith.constant 0 : i32
    %c0_i32_0 = arith.constant 0 : i32
    %c0_i32_1 = arith.constant 0 : i32
    return %arg0, %c0_i32, %c0_i32_0 : i32, i32, i32
  }
  func.func @transform_12(%arg0: i32) -> (i32, i32, i32) {
    %c0_i32 = arith.constant 0 : i32
    %c0_i32_0 = arith.constant 0 : i32
    %c0_i32_1 = arith.constant 0 : i32
    return %arg0, %c0_i32, %c0_i32_0 : i32, i32, i32
  }
  func.func @transform_13(%arg0: i32) -> (i32, i32, i32) {
    %c0_i32 = arith.constant 0 : i32
    %c0_i32_0 = arith.constant 0 : i32
    %c0_i32_1 = arith.constant 0 : i32
    return %arg0, %c0_i32, %c0_i32_0 : i32, i32, i32
  }
  func.func @transform_14(%arg0: i32) -> (i32, i32, i32) {
    %c0_i32 = arith.constant 0 : i32
    %c0_i32_0 = arith.constant 0 : i32
    %c0_i32_1 = arith.constant 0 : i32
    return %arg0, %c0_i32, %c0_i32_0 : i32, i32, i32
  }
  func.func @transform_15(%arg0: i32) -> (i32, i32, i32) {
    %c0_i32 = arith.constant 0 : i32
    %c0_i32_0 = arith.constant 0 : i32
    %c0_i32_1 = arith.constant 0 : i32
    return %arg0, %c0_i32, %c0_i32_0 : i32, i32, i32
  }
  func.func @transform_16(%arg0: i32) -> (i32, i32) {
    %c0_i32 = arith.constant 0 : i32
    %c0_i32_0 = arith.constant 0 : i32
    %c0_i32_1 = arith.constant 0 : i32
    return %c0_i32, %c0_i32_0 : i32, i32
  }
  func.func @transform_17(%arg0: i32) -> (i32, i32) {
    %c0_i32 = arith.constant 0 : i32
    %c0_i32_0 = arith.constant 0 : i32
    %c0_i32_1 = arith.constant 0 : i32
    return %c0_i32, %c0_i32_0 : i32, i32
  }
  func.func @transform_18(%arg0: i32) -> (i32, i32) {
    %c0_i32 = arith.constant 0 : i32
    %c0_i32_0 = arith.constant 0 : i32
    %c0_i32_1 = arith.constant 0 : i32
    return %c0_i32, %c0_i32_0 : i32, i32
  }
}

</mosaic_0001>

<bundles_post_ra>
// kernel: tpu_custom_call.1
= control target key start
LH: loop header
LB: loop body
LE: loop exit
PB: predicated region body
PF: predicated region fallthrough
CT: control target
= control target key end

     0   :  { %s10886_s0 = inlined_call_operand.hbm [shape: f32[16,16], index: 0, kind: input, shape index: {}]   ;;  %s10887_s1 = inlined_call_operand.hbm [shape: bf16[16,128], index: 1, kind: input, shape index: {}]   ;;  %s10888_s2 = inlined_call_operand.hbm [shape: f32[1,128], index: 2, kind: input, shape index: {}]   ;;  %s10889_s3 = inlined_call_operand.hbm [shape: f32[16,128], index: 3, kind: input, shape index: {}]   ;;  %s10890_s4 = inlined_call_operand.hbm [shape: bf16[16,128,384], index: 4, kind: input, shape index: {}]   ;;  %s10891_s5 = inlined_call_operand.hbm [shape: f32[16,1,384], index: 5, kind: input, shape index: {}]   ;;  %s10892_s6 = inlined_call_operand.hbm [shape: bf16[16,128,128], index: 6, kind: input, shape index: {}]   ;;  %s10893_s7 = inlined_call_operand.hbm [shape: f32[16,1,128], index: 7, kind: input, shape index: {}]   ;;  %s10894_s8 = inlined_call_operand.hbm [shape: f32[16,1,128], index: 8, kind: input, shape index: {}]   ;;  %s10895_s9 = inlined_call_operand.hbm [shape: f32[16,1,128], index: 9, kind: input, shape index: {}]   ;;  %s10896_s10 = inlined_call_operand.hbm [shape: bf16[16,128,2048], index: 10, kind: input, shape index: {}]   ;;  %s10897_s11 = inlined_call_operand.hbm [shape: f32[16,1,2048], index: 11, kind: input, shape index: {}]   ;;  %s10898_s12 = inlined_call_operand.hbm [shape: bf16[16,2048,128], index: 12, kind: input, shape index: {}]   ;;  %s10899_s13 = inlined_call_operand.hbm [shape: f32[16,1,128], index: 13, kind: input, shape index: {}]   ;;  %s10900_s14 = inlined_call_operand.hbm [shape: f32[16,1,128], index: 14, kind: input, shape index: {}]   ;;  %s10901_s15 = inlined_call_operand.hbm [shape: f32[16,1,128], index: 15, kind: input, shape index: {}]   ;;  %s10902_s16 = inlined_call_operand.hbm [shape: bf16[128,128], index: 16, kind: input, shape index: {}]   ;;  %s10903_s17 = inlined_call_operand.hbm [shape: f32[1,128], index: 17, kind: input, shape index: {}]   ;;  %s10904_s18 = inlined_call_operand.hbm [shape: f32[16,128], index: 18, kind: output, shape index: {}]  }
   0x1   :  { %10950 = sst [smem:[#allocation40_spill]] %s10886_s0 }
   0x2   :  { %10951 = sst [smem:[#allocation41_spill]] %s10887_s1 }
   0x3   :  { %10952 = sst [smem:[#allocation42_spill]] %s10888_s2 }
   0x4   :  { %10953 = sst [smem:[#allocation43_spill]] %s10889_s3 }
   0x5   :  { %10954 = sst [smem:[#allocation44_spill]] %s10890_s4 }
   0x6   :  { %10955 = sst [smem:[#allocation45_spill]] %s10891_s5 }
   0x7   :  { %10956 = sst [smem:[#allocation46_spill]] %s10892_s6 }
   0x8   :  { %10957 = sst [smem:[#allocation47_spill]] %s10893_s7 }
   0x9   :  { %10958 = sst [smem:[#allocation48_spill]] %s10894_s8 }
   0xa   :  { %10959 = sst [smem:[#allocation49_spill]] %s10899_s13 }
   0xb   :  { %10960 = sst [smem:[#allocation50_spill]] %s10900_s14 }
   0xc   :  { %10961 = sst [smem:[#allocation51_spill]] %s10901_s15 }
   0xd   :  { %10962 = sst [smem:[#allocation52_spill]] %s10902_s16 }
   0xe   :  { %10963 = sst [smem:[#allocation53_spill]] %s10903_s17 }
   0xf   :  { %10964 = sst [smem:[#allocation54_spill]] %s10904_s18 }
  0x10   :  { %23 = vsyncpa [#allocation4], 0 }
  0x11   :  { %24 = vsyncpa [#allocation7], 0 }
  0x12   :  { %25 = vsyncpa [#allocation10], 0 }
  0x13   :  { %26 = vsyncpa [#allocation5], 0  ;;  %s9488_s27 = smov 0   ;;  %s9490_s28 = smov 0  }
  0x14   :  { %s9492_s29 = smov 0   ;;  %s9494_s30 = smov 0  }
  0x15 LB: > { %10965 = sst [smem:[#allocation33_spill]] %s9341_s28  ;;  %s9507_s0 = sadd.s32 4294967295, %s9349_s30   ;;  %s9349_s30 = sphi %s9494_s30, %s11036_s30   ;;  %s9345_s29 = sphi %s9492_s29, %s11039_s29   ;;  %s9341_s28 = sphi %s9490_s28, %s11038_s28   ;;  %s9337_s27 = sphi %s9488_s27, %s11037_s27  }
  0x16   : > { %10966 = sst [smem:[#allocation34_spill]] %s9345_s29  ;;  %s9510_s19 = sadd.s32 1, %s9349_s30  }
  0x17   : > { %10967 = sst [smem:[#allocation35_spill]] %s9507_s0  ;;  %s120_s1 = ssub.s32 %s9349_s30, %s9510_s19 }
  0x18   : > { %10968 = sst [smem:[#allocation36_spill]] %s9510_s19  ;;  %s123_s20 = sadd.s32 1, %s9345_s29 }
  0x19   : > { %p121_p0 = scmp.eq.s32.totalorder %s120_s1, 0  ;;  %p130_p1 = scmp.ne.s32.totalorder %s9345_s29, %s9341_s28 }
  0x1a   : > { %p131_p2 = scmp.eq.s32.totalorder %s9349_s30, 0  ;;  %p136_p3 = scmp.ne.s32.totalorder %s9341_s28, %s9337_s27 }
  0x1b   : > { %s9520_s21 = scalar_select %p121_p0, %s9345_s29, %s123_s20  }
  0x1c   : > { %p9522_p4 = por %p131_p2, %p130_p1  ;;  %p10918_p5 = scmp.eq.s32.totalorder %s9507_s0, 0 }
  0x1d   : > { %10969 = sst [smem:[#allocation37_spill]] %s9520_s21  ;;  %p7354_p6 = scmp.ge.s32.totalorder %s9349_s30, 1 }
  0x1e   : > { %p496_p7 = scmp.lt.s32.totalorder %s9349_s30, 17  ;;  %p9531_p8 = por %p10918_p5, %p136_p3 }
  0x1f   : > { %s9351_s24 = smov [#allocation3]   ;;  %p8372_p13 = scmp.lt.s32.totalorder %s9349_s30, 16 }
  0x20   : > { %s10971_s2 = scalar_select %p9531_p8, 1, 0 }
  0x21   : > { %p9536_p10 = pnand %p7354_p6, %p496_p7  ;;  %s508_s25 = sshll.u32 %s9351_s24, 4  ;;  %s509_s25 = int_to_ptr.vmem [resolvable:$true] %s508_s25 }
  0x22   : > { %10972 = sst [smem:[#allocation38_spill]] %s10971_s2  ;;  %s9550_s27 = sand.u32 1, %s9345_s29  }
  0x23   : > { %s10973_s23 = scalar_select %p9536_p10, 1, 0 }
  0x24   : > { %p8310_p11 = pneg %p9536_p10  ;;  %s583_s1 = sand.u32 1, %s9349_s30  }
  0x25   : > { %10974 = sst [smem:[#allocation39_spill]] %s10973_s23  ;;  %p9555_p0 = pnand %p8372_p13, %p9522_p4 }
  0x26   : > { %p9544_p12 = pnand %p8310_p11, %p10918_p5  ;;  %s10977_s19 = sld [smem:[#allocation40_spill]] }
  0x27   : > { %s10976_s20 = scalar_select %p9555_p0, 1, 0 }
  0x28   : > { %s10975_s26 = scalar_select %p9544_p12, 1, 0 }
  0x29   : > { %p9567_p2 = pneg %p9544_p12 }
  0x2b   : > { %s10978_s0 = scalar_select %p9567_p2, 1, 0 }
  0x2c   : > { %s8737_s18 = scalar_lea.hbm %s10977_s19, 256 }
  0x2d   : > { %p8738_p1 = scmp.ne.s32.totalorder %s10977_s19, %s8737_s18  ;;  %p8744_p6 = scmp.lt.u32.totalorder %s8737_s18, %s10977_s19 }
  0x2f   : > { %p8740_p3 = pnand %p9567_p2, %p8738_p1 }
  0x31   : > { %p8741_p4 = pneg %p8740_p3 }
  0x33   : > { %p8746_p7 = pnand %p8744_p6, %p8741_p4 }
  0x35   : > { %8749 = shalt.err (!%p8746_p7)
}
  0x36   : > { %s8750_s21 = scalar_lea.vmem %s509_s25, 256  ;;  %p8758_p5 = scmp.lt.s32.totalorder %s509_s25, %s509_s25 }
  0x37   : > { %p8751_p11 = scmp.ne.s32.totalorder %s509_s25, %s8750_s21  ;;  %p8759_p8 = scmp.lt.s32.totalorder %s8750_s21, %s8750_s21 }
  0x39   : > { %p8753_p13 = pnand %p8751_p11, %p9567_p2  ;;  %p8760_p10 = por %p8759_p8, %p8758_p5 }
  0x3b   : > { %p8754_p9 = pneg %p8753_p13 }
  0x3d   : > { %p8761_p0 = pnand %p8760_p10, %p8754_p9 }
  0x3f   : > { %8764 = shalt.err (!%p8761_p0)
}
  0x40   : > { %s10932_s28 = smov 128   ;;  %s10933_s18 = smov 8  }
  0x41   : > { %8313 = dma.hbm_to_vmem [thread:$0]  (!%p9544_p12), %s10977_s19, 256, %s509_s25, [#allocation4], %s10932_s28, %s10932_s28, %s10933_s18  }
  0x42   : > { %s8252_s24 = smul.u32 192, %s9550_s27  ;;  %s10979_s4 = sld [smem:[#allocation44_spill]] }
  0x43   : > { %s8253_s22 = smul.u32 3072, %s9349_s30  ;;  %s9596_s3 = scalar_lea.sflag [#allocation4], %s583_s1 }
  0x44   : > { %s8254_s21 = smul.u32 3, %s9550_s27  ;;  %s587_s16 = scalar_lea.vmem [#allocation11], %s8252_s24 }
  0x45   : > { %s594_s14 = sshll.u32 %s587_s16, 4  ;;  %p10980_p8 = scmp.ne.s32.totalorder %s10976_s20, 0  ;;  %s9594_s14 = int_to_ptr.vmem [resolvable:$true] %s594_s14 }
  0x47   : > { %p9602_p9 = pneg %p10980_p8 }
  0x48   : > { %s9592_s17 = scalar_lea.hbm %s10979_s4, %s8253_s22  ;;  %s8770_s2 = scalar_lea.hbm %s10979_s4, 49152 }
  0x49   : > { %s8765_s29 = scalar_lea.hbm %s9592_s17, 3072  ;;  %p8771_p1 = scmp.lt.u32.totalorder %s9592_s17, %s10979_s4 }
  0x4a   : > { %p8766_p5 = scmp.ne.s32.totalorder %s9592_s17, %s8765_s29  ;;  %p8772_p3 = scmp.lt.u32.totalorder %s8770_s2, %s8765_s29 }
  0x4b   : > { %s10981_s25 = scalar_select %p9602_p9, 1, 0 }
  0x4c   : > { %p8768_p10 = pnand %p9602_p9, %p8766_p5  ;;  %p8773_p4 = por %p8772_p3, %p8771_p1 }
  0x4d   : > { %p8774_p6 = scmp.lt.u32.totalorder %s8765_s29, %s9592_s17 }
  0x4e   : > { %p8769_p0 = pneg %p8768_p10 }
  0x4f   : > { %p8775_p7 = por %p8774_p6, %p8773_p4 }
  0x51   : > { %p8776_p11 = pnand %p8775_p7, %p8769_p0 }
  0x53   : > { %8779 = shalt.err (!%p8776_p11)
}
  0x54   : > { %s8780_s1 = scalar_lea.vmem %s9594_s14, 3072  ;;  %s9354_s22 = smov [#allocation11]  }
  0x55   : > { %p8781_p13 = scmp.ne.s32.totalorder %s9594_s14, %s8780_s1  ;;  %s8785_s15 = sshll.u32 %s9354_s22, 4  ;;  %s8786_s15 = int_to_ptr.vmem [resolvable:$false] %s8785_s15 }
  0x56   : > { %s8787_s23 = scalar_lea.vmem %s8786_s15, 6144  ;;  %p8788_p12 = scmp.lt.s32.totalorder %s9594_s14, %s8786_s15 }
  0x57   : > { %p8783_p5 = pnand %p8781_p13, %p9602_p9  ;;  %p8789_p2 = scmp.lt.s32.totalorder %s8787_s23, %s8780_s1 }
  0x59   : > { %p8784_p10 = pneg %p8783_p5  ;;  %p8790_p1 = por %p8789_p2, %p8788_p12 }
  0x5b   : > { %p8791_p3 = pnand %p8790_p1, %p8784_p10 }
  0x5d   : > { %8794 = shalt.err (!%p8791_p3)
}
  0x5e   : > { %s9355_s29 = smov 192   ;;  %s9356_s2 = smov 12  }
  0x5f   : > { %8332 = dma.hbm_to_vmem [thread:$0]  (!%p10980_p8), %s9592_s17, 3072, %s9594_s14, %s9596_s3, %s9355_s29, %s9355_s29, %s9356_s2  }
  0x60   : > { %s8255_s16 = smul.u32 48, %s9349_s30  ;;  %s608_s24 = scalar_lea.vmem [#allocation12], %s8254_s21 }
  0x61   : > { %s616_s22 = sshll.u32 %s608_s24, 4  ;;  %s10982_s5 = sld [smem:[#allocation45_spill]]  ;;  %s617_s22 = int_to_ptr.vmem [resolvable:$true] %s616_s22 }
  0x67   : > { %s614_s23 = scalar_lea.hbm %s10982_s5, %s8255_s16  ;;  %s8800_s19 = scalar_lea.hbm %s10982_s5, 768 }
  0x68   : > { %s8795_s28 = scalar_lea.hbm %s614_s23, 48  ;;  %p8801_p4 = scmp.lt.u32.totalorder %s614_s23, %s10982_s5 }
  0x69   : > { %p8796_p12 = scmp.ne.s32.totalorder %s614_s23, %s8795_s28  ;;  %p8802_p6 = scmp.lt.u32.totalorder %s8800_s19, %s8795_s28 }
  0x6a   : > { %p8804_p11 = scmp.lt.u32.totalorder %s8795_s28, %s614_s23 }
  0x6b   : > { %p8798_p2 = pnand %p8796_p12, %p9602_p9  ;;  %p8803_p7 = por %p8802_p6, %p8801_p4 }
  0x6d   : > { %p8799_p0 = pneg %p8798_p2  ;;  %p8805_p13 = por %p8804_p11, %p8803_p7 }
  0x6f   : > { %p8806_p5 = pnand %p8805_p13, %p8799_p0 }
  0x71   : > { %8809 = shalt.err (!%p8806_p5)
}
  0x72   : > { %s8810_s17 = scalar_lea.vmem %s617_s22, 48  ;;  %s9357_s21 = smov [#allocation12]  }
  0x73   : > { %p8811_p10 = scmp.ne.s32.totalorder %s617_s22, %s8810_s17  ;;  %s8815_s29 = sshll.u32 %s9357_s21, 4  ;;  %s8816_s29 = int_to_ptr.vmem [resolvable:$false] %s8815_s29 }
  0x74   : > { %s8817_s4 = scalar_lea.vmem %s8816_s29, 96  ;;  %p8818_p12 = scmp.lt.s32.totalorder %s617_s22, %s8816_s29 }
  0x75   : > { %p8813_p1 = pnand %p8811_p10, %p9602_p9  ;;  %p8819_p2 = scmp.lt.s32.totalorder %s8817_s4, %s8810_s17 }
  0x77   : > { %p8814_p3 = pneg %p8813_p1  ;;  %p8820_p8 = por %p8819_p2, %p8818_p12 }
  0x79   : > { %p8821_p4 = pnand %p8820_p8, %p8814_p3 }
  0x7b   : > { %8824 = shalt.err (!%p8821_p4)
}
  0x7c   : > { %p10983_p6 = scmp.ne.s32.totalorder %s10976_s20, 0  ;;  %s7364_s13 = sshll.u32 %s9550_s27, 6 }
  0x7d   : > { %s7753_s19 = sshll.u32 %s9349_s30, 10  ;;  %s10984_s6 = sld [smem:[#allocation46_spill]] }
  0x7e   : > { %8335 = dma.hbm_to_vmem [thread:$0]  (!%p10983_p6), %s614_s23, 48, %s617_s22, %s9596_s3  }
  0x7f   : > { %s627_s16 = scalar_lea.vmem [#allocation13], %s7364_s13  ;;  %s9655_s1 = sshll.u32 %s9349_s30, 4 }
  0x80   : > { %s634_s24 = sshll.u32 %s627_s16, 4  ;;  %s9652_s24 = int_to_ptr.vmem [resolvable:$true] %s634_s24 }
  0x83   : > { %s9650_s2 = scalar_lea.hbm %s10984_s6, %s7753_s19  ;;  %s8830_s14 = scalar_lea.hbm %s10984_s6, 16384 }
  0x84   : > { %s8825_s15 = scalar_lea.hbm %s9650_s2, 1024  ;;  %p8831_p11 = scmp.lt.u32.totalorder %s9650_s2, %s10984_s6 }
  0x85   : > { %p8826_p8 = scmp.ne.s32.totalorder %s9650_s2, %s8825_s15  ;;  %p8832_p13 = scmp.lt.u32.totalorder %s8830_s14, %s8825_s15 }
  0x86   : > { %p8834_p10 = scmp.lt.u32.totalorder %s8825_s15, %s9650_s2 }
  0x87   : > { %p8828_p0 = pnand %p8826_p8, %p9602_p9  ;;  %p8833_p5 = por %p8832_p13, %p8831_p11 }
  0x89   : > { %p8829_p7 = pneg %p8828_p0  ;;  %p8835_p1 = por %p8834_p10, %p8833_p5 }
  0x8b   : > { %p8836_p3 = pnand %p8835_p1, %p8829_p7 }
  0x8d   : > { %8839 = shalt.err (!%p8836_p3)
}
  0x8e   : > { %s8840_s29 = scalar_lea.vmem %s9652_s24, 1024  ;;  %s9358_s4 = smov [#allocation13]  }
  0x8f   : > { %p8841_p12 = scmp.ne.s32.totalorder %s9652_s24, %s8840_s29  ;;  %s8845_s13 = sshll.u32 %s9358_s4, 4  ;;  %s8846_s13 = int_to_ptr.vmem [resolvable:$false] %s8845_s13 }
  0x90   : > { %s8847_s19 = scalar_lea.vmem %s8846_s13, 2048  ;;  %p8848_p8 = scmp.lt.s32.totalorder %s9652_s24, %s8846_s13 }
  0x91   : > { %p8843_p2 = pnand %p8841_p12, %p9602_p9  ;;  %p8849_p0 = scmp.lt.s32.totalorder %s8847_s19, %s8840_s29 }
  0x93   : > { %p8844_p4 = pneg %p8843_p2  ;;  %p8850_p11 = por %p8849_p0, %p8848_p8 }
  0x95   : > { %p8851_p13 = pnand %p8850_p11, %p8844_p4 }
  0x97   : > { %8854 = shalt.err (!%p8851_p13)
}
  0x98   : > { %s10944_s28 = smov 64   ;;  %s10938_s18 = smov 4  }
  0x99   : > { %8338 = dma.hbm_to_vmem [thread:$0]  (!%p10983_p6), %s9650_s2, 1024, %s9652_s24, %s9596_s3, %s10944_s28, %s10944_s28, %s10938_s18  }
  0x9a   : > { %s10985_s7 = sld [smem:[#allocation47_spill]]  ;;  %s647_s23 = scalar_lea.vmem [#allocation14], %s9550_s27 }
  0x9b   : > { %s654_s14 = sshll.u32 %s647_s23, 4  ;;  %s655_s14 = int_to_ptr.vmem [resolvable:$true] %s654_s14 }
  0xa0   : > { %s9686_s22 = scalar_lea.hbm %s10985_s7, %s9655_s1  ;;  %s8860_s2 = scalar_lea.hbm %s10985_s7, 256 }
  0xa1   : > { %s8855_s17 = scalar_lea.hbm %s9686_s22, 16  ;;  %p8861_p1 = scmp.lt.u32.totalorder %s9686_s22, %s10985_s7 }
  0xa2   : > { %p8856_p7 = scmp.ne.s32.totalorder %s9686_s22, %s8855_s17  ;;  %p8862_p3 = scmp.lt.u32.totalorder %s8860_s2, %s8855_s17 }
  0xa3   : > { %p8864_p2 = scmp.lt.u32.totalorder %s8855_s17, %s9686_s22 }
  0xa4   : > { %p8858_p5 = pnand %p8856_p7, %p9602_p9  ;;  %p8863_p12 = por %p8862_p3, %p8861_p1 }
  0xa6   : > { %p8859_p10 = pneg %p8858_p5  ;;  %p8865_p4 = por %p8864_p2, %p8863_p12 }
  0xa8   : > { %p8866_p8 = pnand %p8865_p4, %p8859_p10 }
  0xaa   : > { %8869 = shalt.err (!%p8866_p8)
}
  0xab   : > { %s8870_s13 = scalar_lea.vmem %s655_s14, 16  ;;  %s9361_s19 = smov [#allocation14]  }
  0xac   : > { %p8871_p0 = scmp.ne.s32.totalorder %s655_s14, %s8870_s13  ;;  %s8875_s16 = sshll.u32 %s9361_s19, 4  ;;  %s8876_s16 = int_to_ptr.vmem [resolvable:$false] %s8875_s16 }
  0xad   : > { %s8877_s15 = scalar_lea.vmem %s8876_s16, 32  ;;  %p8878_p7 = scmp.lt.s32.totalorder %s655_s14, %s8876_s16 }
  0xae   : > { %p8873_p11 = pnand %p8871_p0, %p9602_p9  ;;  %p8879_p5 = scmp.lt.s32.totalorder %s8877_s15, %s8870_s13 }
  0xb0   : > { %p8874_p13 = pneg %p8873_p11  ;;  %p8880_p6 = por %p8879_p5, %p8878_p7 }
  0xb2   : > { %p8881_p1 = pnand %p8880_p6, %p8874_p13 }
  0xb4   : > { %8884 = shalt.err (!%p8881_p1)
}
  0xb5   : > { %p10986_p3 = scmp.ne.s32.totalorder %s10976_s20, 0  ;;  %s10987_s8 = sld [smem:[#allocation48_spill]] }
  0xb6   : > { %s664_s29 = scalar_lea.vmem [#allocation15], %s9550_s27 }
  0xb7   : > { %8341 = dma.hbm_to_vmem [thread:$0]  (!%p10986_p3), %s9686_s22, 16, %s655_s14, %s9596_s3  }
  0xb8   : > { %s671_s2 = sshll.u32 %s664_s29, 4  ;;  %s672_s2 = int_to_ptr.vmem [resolvable:$true] %s671_s2 }
  0xbb   : > { %s9711_s21 = scalar_lea.hbm %s10987_s8, %s9655_s1  ;;  %s8890_s22 = scalar_lea.hbm %s10987_s8, 256 }
  0xbc   : > { %s8885_s24 = scalar_lea.hbm %s9711_s21, 16  ;;  %p8891_p2 = scmp.lt.u32.totalorder %s9711_s21, %s10987_s8 }
  0xbd   : > { %p8886_p6 = scmp.ne.s32.totalorder %s9711_s21, %s8885_s24  ;;  %p8892_p4 = scmp.lt.u32.totalorder %s8890_s22, %s8885_s24 }
  0xbe   : > { %p8894_p0 = scmp.lt.u32.totalorder %s8885_s24, %s9711_s21 }
  0xbf   : > { %p8888_p10 = pnand %p8886_p6, %p9602_p9  ;;  %p8893_p8 = por %p8892_p4, %p8891_p2 }
  0xc1   : > { %p8889_p12 = pneg %p8888_p10  ;;  %p8895_p11 = por %p8894_p0, %p8893_p8 }
  0xc3   : > { %p8896_p13 = pnand %p8895_p11, %p8889_p12 }
  0xc5   : > { %8899 = shalt.err (!%p8896_p13)
}
  0xc6   : > { %s8900_s16 = scalar_lea.vmem %s672_s2, 16  ;;  %s9362_s15 = smov [#allocation15]  }
  0xc7   : > { %p8901_p7 = scmp.ne.s32.totalorder %s672_s2, %s8900_s16  ;;  %s8905_s23 = sshll.u32 %s9362_s15, 4  ;;  %s8906_s23 = int_to_ptr.vmem [resolvable:$false] %s8905_s23 }
  0xc8   : > { %s8907_s17 = scalar_lea.vmem %s8906_s23, 32  ;;  %p8908_p6 = scmp.lt.s32.totalorder %s672_s2, %s8906_s23 }
  0xc9   : > { %p8903_p5 = pnand %p8901_p7, %p9602_p9  ;;  %p8909_p10 = scmp.lt.s32.totalorder %s8907_s17, %s8900_s16 }
  0xcb   : > { %p8904_p1 = pneg %p8903_p5  ;;  %p8910_p3 = por %p8909_p10, %p8908_p6 }
  0xcd   : > { %p8911_p2 = pnand %p8910_p3, %p8904_p1 }
  0xcf   : > { %8914 = shalt.err (!%p8911_p2)
}
  0xd0   : > { %p10988_p4 = scmp.ne.s32.totalorder %s10976_s20, 0  ;;  %s9736_s4 = scalar_lea.hbm %s10895_s9, %s9655_s1 }
  0xd1   : > { %s681_s13 = scalar_lea.vmem [#allocation16], %s9550_s27  ;;  %s10940_s14 = sshll.u32 %s9550_s27, 10 }
  0xd2   : > { %8344 = dma.hbm_to_vmem [thread:$0]  (!%p10988_p4), %s9711_s21, 16, %s672_s2, %s9596_s3  }
  0xd3   : > { %s688_s22 = sshll.u32 %s681_s13, 4  ;;  %s8915_s19 = scalar_lea.hbm %s9736_s4, 16  ;;  %s689_s22 = int_to_ptr.vmem [resolvable:$true] %s688_s22 }
  0xd4   : > { %p8916_p3 = scmp.ne.s32.totalorder %s9736_s4, %s8915_s19  ;;  %s8920_s2 = scalar_lea.hbm %s10895_s9, 256 }
  0xd5   : > { %p8921_p0 = scmp.lt.u32.totalorder %s9736_s4, %s10895_s9  ;;  %p8922_p11 = scmp.lt.u32.totalorder %s8920_s2, %s8915_s19 }
  0xd6   : > { %p8918_p12 = pnand %p8916_p3, %p9602_p9  ;;  %p8924_p7 = scmp.lt.u32.totalorder %s8915_s19, %s9736_s4 }
  0xd7   : > { %p8923_p13 = por %p8922_p11, %p8921_p0 }
  0xd8   : > { %p8919_p8 = pneg %p8918_p12 }
  0xd9   : > { %p8925_p5 = por %p8924_p7, %p8923_p13 }
  0xdb   : > { %p8926_p1 = pnand %p8925_p5, %p8919_p8 }
  0xdd   : > { %8929 = shalt.err (!%p8926_p1)
}
  0xde   : > { %s8930_s17 = scalar_lea.vmem %s689_s22, 16  ;;  %s9363_s29 = smov [#allocation16]  }
  0xdf   : > { %p8931_p6 = scmp.ne.s32.totalorder %s689_s22, %s8930_s17  ;;  %s8935_s24 = sshll.u32 %s9363_s29, 4  ;;  %s8936_s24 = int_to_ptr.vmem [resolvable:$false] %s8935_s24 }
  0xe0   : > { %s8937_s13 = scalar_lea.vmem %s8936_s24, 32  ;;  %p8938_p3 = scmp.lt.s32.totalorder %s689_s22, %s8936_s24 }
  0xe1   : > { %p8933_p10 = pnand %p8931_p6, %p9602_p9  ;;  %p8939_p12 = scmp.lt.s32.totalorder %s8937_s13, %s8930_s17 }
  0xe3   : > { %p8934_p2 = pneg %p8933_p10  ;;  %p8940_p4 = por %p8939_p12, %p8938_p3 }
  0xe5   : > { %p8941_p0 = pnand %p8940_p4, %p8934_p2 }
  0xe7   : > { %8944 = shalt.err (!%p8941_p0)
}
  0xe8   : > { %p10989_p11 = scmp.ne.s32.totalorder %s10976_s20, 0  ;;  %s7754_s19 = sshll.u32 %s9349_s30, 14 }
  0xe9   : > { %s9764_s2 = scalar_lea.hbm %s10896_s10, %s7754_s19  ;;  %s699_s15 = scalar_lea.vmem [#allocation17], %s10940_s14 }
  0xea   : > { %8347 = dma.hbm_to_vmem [thread:$0]  (!%p10989_p11), %s9736_s4, 16, %s689_s22, %s9596_s3  }
  0xeb   : > { %s706_s23 = sshll.u32 %s699_s15, 4  ;;  %s8945_s17 = scalar_lea.hbm %s9764_s2, 16384  ;;  %s9768_s23 = int_to_ptr.vmem [resolvable:$true] %s706_s23 }
  0xec   : > { %p8946_p4 = scmp.ne.s32.totalorder %s9764_s2, %s8945_s17  ;;  %s8950_s29 = scalar_lea.hbm %s10896_s10, 262144 }
  0xed   : > { %p8951_p7 = scmp.lt.u32.totalorder %s9764_s2, %s10896_s10  ;;  %p8952_p5 = scmp.lt.u32.totalorder %s8950_s29, %s8945_s17 }
  0xee   : > { %p8948_p8 = pnand %p8946_p4, %p9602_p9  ;;  %p8954_p6 = scmp.lt.u32.totalorder %s8945_s17, %s9764_s2 }
  0xef   : > { %p8953_p1 = por %p8952_p5, %p8951_p7 }
  0xf0   : > { %p8949_p13 = pneg %p8948_p8 }
  0xf1   : > { %p8955_p10 = por %p8954_p6, %p8953_p1 }
  0xf3   : > { %p8956_p2 = pnand %p8955_p10, %p8949_p13 }
  0xf5   : > { %8959 = shalt.err (!%p8956_p2)
}
  0xf6   : > { %s8960_s16 = scalar_lea.vmem %s9768_s23, 16384  ;;  %s9364_s21 = smov [#allocation17]  }
  0xf7   : > { %p8961_p3 = scmp.ne.s32.totalorder %s9768_s23, %s8960_s16  ;;  %s8965_s15 = sshll.u32 %s9364_s21, 4  ;;  %s8966_s15 = int_to_ptr.vmem [resolvable:$false] %s8965_s15 }
  0xf8   : > { %s8967_s4 = scalar_lea.vmem %s8966_s15, 32768  ;;  %p8968_p4 = scmp.lt.s32.totalorder %s9768_s23, %s8966_s15 }
  0xf9   : > { %p8963_p12 = pnand %p8961_p3, %p9602_p9  ;;  %p8969_p8 = scmp.lt.s32.totalorder %s8967_s4, %s8960_s16 }
  0xfb   : > { %p8964_p0 = pneg %p8963_p12  ;;  %p8970_p7 = por %p8969_p8, %p8968_p4 }
  0xfd   : > { %p8971_p5 = pnand %p8970_p7, %p8964_p0 }
  0xff   : > { %8974 = shalt.err (!%p8971_p5)
}
 0x100   : > { %s9365_s17 = smov 1024   ;;  %s7373_s22 = sshll.u32 %s9550_s27, 4 }
 0x101   : > { %8350 = dma.hbm_to_vmem [thread:$0]  (!%p10989_p11), %s9764_s2, 16384, %s9768_s23, %s9596_s3, %s9365_s17, %s9365_s17, %s10944_s28  }
 0x102   : > { %s7755_s29 = sshll.u32 %s9349_s30, 8  ;;  %s720_s21 = scalar_lea.vmem [#allocation18], %s7373_s22 }
 0x103   : > { %s9798_s16 = scalar_lea.hbm %s10897_s11, %s7755_s29  ;;  %s728_s15 = sshll.u32 %s720_s21, 4  ;;  %s729_s15 = int_to_ptr.vmem [resolvable:$true] %s728_s15 }
 0x104   : > { %s9805_s14 = scalar_lea.hbm %s10898_s12, %s7754_s19  ;;  %s8975_s2 = scalar_lea.hbm %s9798_s16, 256 }
 0x105   : > { %p8976_p13 = scmp.ne.s32.totalorder %s9798_s16, %s8975_s2  ;;  %s8980_s29 = scalar_lea.hbm %s10897_s11, 4096 }
 0x106   : > { %p8981_p10 = scmp.lt.u32.totalorder %s9798_s16, %s10897_s11  ;;  %p8982_p2 = scmp.lt.u32.totalorder %s8980_s29, %s8975_s2 }
 0x107   : > { %p8978_p1 = pnand %p8976_p13, %p9602_p9  ;;  %p8984_p12 = scmp.lt.u32.totalorder %s8975_s2, %s9798_s16 }
 0x108   : > { %p8983_p3 = por %p8982_p2, %p8981_p10 }
 0x109   : > { %p8979_p6 = pneg %p8978_p1 }
 0x10a   : > { %p8985_p0 = por %p8984_p12, %p8983_p3 }
 0x10c   : > { %p8986_p4 = pnand %p8985_p0, %p8979_p6 }
 0x10e   : > { %8989 = shalt.err (!%p8986_p4)
}
 0x10f   : > { %s8990_s30 = scalar_lea.vmem %s729_s15, 256  ;;  %s9366_s18 = smov [#allocation18]  }
 0x110   : > { %p8991_p8 = scmp.ne.s32.totalorder %s729_s15, %s8990_s30  ;;  %s8995_s19 = sshll.u32 %s9366_s18, 4  ;;  %s8996_s19 = int_to_ptr.vmem [resolvable:$false] %s8995_s19 }
 0x111   : > { %s8997_s22 = scalar_lea.vmem %s8996_s19, 512  ;;  %p8998_p13 = scmp.lt.s32.totalorder %s729_s15, %s8996_s19 }
 0x112   : > { %p8993_p7 = pnand %p8991_p8, %p9602_p9  ;;  %p8999_p1 = scmp.lt.s32.totalorder %s8997_s22, %s8990_s30 }
 0x114   : > { %p8994_p5 = pneg %p8993_p7  ;;  %p9000_p11 = por %p8999_p1, %p8998_p13 }
 0x116   : > { %p9001_p2 = pnand %p9000_p11, %p8994_p5 }
 0x118   : > { %9004 = shalt.err (!%p9001_p2)
}
 0x119   : > { %p10990_p10 = scmp.ne.s32.totalorder %s10976_s20, 0  ;;  %s10991_s21 = sshll.u32 %s9550_s27, 10 }
 0x11a   : > { %s739_s4 = scalar_lea.vmem [#allocation19], %s10991_s21  ;;  %s9367_s23 = smov [#allocation6]  }
 0x11b   : > { %8353 = dma.hbm_to_vmem [thread:$0]  (!%p10990_p10), %s9798_s16, 256, %s729_s15, %s9596_s3  }
 0x11c   : > { %s746_s2 = sshll.u32 %s739_s4, 4  ;;  %s9829_s17 = sshll.u32 %s9367_s23, 4  ;;  %s9827_s2 = int_to_ptr.vmem [resolvable:$true] %s746_s2  ;;  %s522_s17 = int_to_ptr.vmem [resolvable:$true] %s9829_s17 }
 0x11d   : > { %s9005_s29 = scalar_lea.hbm %s9805_s14, 16384  ;;  %s9010_s30 = scalar_lea.hbm %s10898_s12, 262144 }
 0x11e   : > { %p9006_p11 = scmp.ne.s32.totalorder %s9805_s14, %s9005_s29  ;;  %p9011_p12 = scmp.lt.u32.totalorder %s9805_s14, %s10898_s12 }
 0x11f   : > { %p9012_p0 = scmp.lt.u32.totalorder %s9010_s30, %s9005_s29  ;;  %p9014_p8 = scmp.lt.u32.totalorder %s9005_s29, %s9805_s14 }
 0x120   : > { %p9008_p6 = pnand %p9006_p11, %p9602_p9 }
 0x121   : > { %p9013_p4 = por %p9012_p0, %p9011_p12 }
 0x122   : > { %p9009_p3 = pneg %p9008_p6 }
 0x123   : > { %p9015_p7 = por %p9014_p8, %p9013_p4 }
 0x125   : > { %p9016_p5 = pnand %p9015_p7, %p9009_p3 }
 0x127   : > { %9019 = shalt.err (!%p9016_p5)
}
 0x128   : > { %s9020_s16 = scalar_lea.vmem %s9827_s2, 16384  ;;  %s9368_s15 = smov [#allocation19]  }
 0x129   : > { %p9021_p13 = scmp.ne.s32.totalorder %s9827_s2, %s9020_s16  ;;  %s9025_s22 = sshll.u32 %s9368_s15, 4  ;;  %s9026_s22 = int_to_ptr.vmem [resolvable:$false] %s9025_s22 }
 0x12a   : > { %s9027_s21 = scalar_lea.vmem %s9026_s22, 32768  ;;  %p9028_p11 = scmp.lt.s32.totalorder %s9827_s2, %s9026_s22 }
 0x12b   : > { %p9023_p1 = pnand %p9021_p13, %p9602_p9  ;;  %p9029_p6 = scmp.lt.s32.totalorder %s9027_s21, %s9020_s16 }
 0x12d   : > { %p9024_p2 = pneg %p9023_p1  ;;  %p9030_p12 = por %p9029_p6, %p9028_p11 }
 0x12f   : > { %p9031_p0 = pnand %p9030_p12, %p9024_p2 }
 0x131   : > { %9034 = shalt.err (!%p9031_p0)
}
 0x132   : > { %s10992_s4 = smov 4   ;;  %s10993_s24 = sld [smem:[#allocation41_spill]] }
 0x133   : > { %8356 = dma.hbm_to_vmem [thread:$0]  (!%p10990_p10), %s9805_s14, 16384, %s9827_s2, %s9596_s3, %s10944_s28, %s10944_s28, %s10992_s4  }
 0x134   : > { %p10994_p4 = scmp.ne.s32.totalorder %s10978_s0, 0 }
 0x138   : > { %s9035_s13 = scalar_lea.hbm %s10993_s24, 128 }
 0x139   : > { %p9036_p3 = scmp.ne.s32.totalorder %s10993_s24, %s9035_s13  ;;  %p9042_p5 = scmp.lt.u32.totalorder %s9035_s13, %s10993_s24 }
 0x13b   : > { %p9038_p8 = pnand %p9036_p3, %p10994_p4 }
 0x13d   : > { %p9039_p7 = pneg %p9038_p8 }
 0x13f   : > { %p9044_p13 = pnand %p9042_p5, %p9039_p7 }
 0x141   : > { %9047 = shalt.err (!%p9044_p13)
}
 0x142   : > { %s9048_s15 = scalar_lea.vmem %s522_s17, 128  ;;  %p9056_p6 = scmp.lt.s32.totalorder %s522_s17, %s522_s17 }
 0x143   : > { %p9049_p1 = scmp.ne.s32.totalorder %s522_s17, %s9048_s15  ;;  %p9057_p12 = scmp.lt.s32.totalorder %s9048_s15, %s9048_s15 }
 0x145   : > { %p9051_p2 = pnand %p9049_p1, %p10994_p4  ;;  %p9058_p0 = por %p9057_p12, %p9056_p6 }
 0x147   : > { %p9052_p11 = pneg %p9051_p2 }
 0x149   : > { %p9059_p10 = pnand %p9058_p0, %p9052_p11 }
 0x14b   : > { %9062 = shalt.err (!%p9059_p10)
}
 0x14c   : > { %p10995_p3 = scmp.ne.s32.totalorder %s10975_s26, 0  ;;  %s10996_s23 = sld [smem:[#allocation49_spill]] }
 0x14d   : > { %s759_s13 = scalar_lea.vmem [#allocation20], %s9550_s27 }
 0x14e   : > { %8316 = dma.hbm_to_vmem [thread:$0]  (!%p10995_p3), %s10993_s24, 128, %s522_s17, [#allocation7], %s10944_s28, %s10944_s28, %s10992_s4  }
 0x14f   : > { %s766_s30 = sshll.u32 %s759_s13, 4  ;;  %s767_s30 = int_to_ptr.vmem [resolvable:$true] %s766_s30 }
 0x152   : > { %s9882_s29 = scalar_lea.hbm %s10996_s23, %s9655_s1  ;;  %s9068_s17 = scalar_lea.hbm %s10996_s23, 256 }
 0x153   : > { %s9063_s18 = scalar_lea.hbm %s9882_s29, 16  ;;  %p9069_p5 = scmp.lt.u32.totalorder %s9882_s29, %s10996_s23 }
 0x154   : > { %p9064_p10 = scmp.ne.s32.totalorder %s9882_s29, %s9063_s18  ;;  %p9070_p13 = scmp.lt.u32.totalorder %s9068_s17, %s9063_s18 }
 0x155   : > { %p9072_p2 = scmp.lt.u32.totalorder %s9063_s18, %s9882_s29 }
 0x156   : > { %p9066_p8 = pnand %p9064_p10, %p9602_p9  ;;  %p9071_p1 = por %p9070_p13, %p9069_p5 }
 0x158   : > { %p9067_p7 = pneg %p9066_p8  ;;  %p9073_p11 = por %p9072_p2, %p9071_p1 }
 0x15a   : > { %p9074_p6 = pnand %p9073_p11, %p9067_p7 }
 0x15c   : > { %9077 = shalt.err (!%p9074_p6)
}
 0x15d   : > { %s9078_s2 = scalar_lea.vmem %s767_s30, 16  ;;  %s9369_s22 = smov [#allocation20]  }
 0x15e   : > { %p9079_p12 = scmp.ne.s32.totalorder %s767_s30, %s9078_s2  ;;  %s9083_s21 = sshll.u32 %s9369_s22, 4  ;;  %s9084_s21 = int_to_ptr.vmem [resolvable:$false] %s9083_s21 }
 0x15f   : > { %s9085_s13 = scalar_lea.vmem %s9084_s21, 32  ;;  %p9086_p8 = scmp.lt.s32.totalorder %s767_s30, %s9084_s21 }
 0x160   : > { %p9081_p0 = pnand %p9079_p12, %p9602_p9  ;;  %p9087_p3 = scmp.lt.s32.totalorder %s9085_s13, %s9078_s2 }
 0x162   : > { %p9082_p10 = pneg %p9081_p0  ;;  %p9088_p4 = por %p9087_p3, %p9086_p8 }
 0x164   : > { %p9089_p5 = pnand %p9088_p4, %p9082_p10 }
 0x166   : > { %9092 = shalt.err (!%p9089_p5)
}
 0x167   : > { %p10997_p13 = scmp.ne.s32.totalorder %s10976_s20, 0  ;;  %s9370_s18 = smov [#allocation8]  }
 0x168   : > { %s535_s19 = sshll.u32 %s9370_s18, 4  ;;  %s9371_s16 = smov [#allocation9]   ;;  %s536_s19 = int_to_ptr.vmem [resolvable:$true] %s535_s19 }
 0x169   : > { %8359 = dma.hbm_to_vmem [thread:$0]  (!%p10997_p13), %s9882_s29, 16, %s767_s30, %s9596_s3  }
 0x16a   : > { %s545_s17 = sshll.u32 %s9371_s16, 4  ;;  %s10998_s22 = sld [smem:[#allocation42_spill]]  ;;  %s546_s17 = int_to_ptr.vmem [resolvable:$true] %s545_s17 }
 0x16b   : > { %p10999_p3 = scmp.ne.s32.totalorder %s10978_s0, 0 }
 0x170   : > { %s9093_s28 = scalar_lea.hbm %s10998_s22, 16 }
 0x171   : > { %p9094_p4 = scmp.ne.s32.totalorder %s10998_s22, %s9093_s28  ;;  %p9100_p2 = scmp.lt.u32.totalorder %s9093_s28, %s10998_s22 }
 0x173   : > { %p9096_p7 = pnand %p9094_p4, %p10999_p3 }
 0x175   : > { %p9097_p1 = pneg %p9096_p7 }
 0x177   : > { %p9102_p11 = pnand %p9100_p2, %p9097_p1 }
 0x179   : > { %9105 = shalt.err (!%p9102_p11)
}
 0x17a   : > { %s9106_s29 = scalar_lea.vmem %s536_s19, 16  ;;  %s9113_s30 = scalar_lea.vmem %s536_s19, 32 }
 0x17b   : > { %p9107_p6 = scmp.ne.s32.totalorder %s536_s19, %s9106_s29  ;;  %p9114_p10 = scmp.lt.s32.totalorder %s536_s19, %s536_s19 }
 0x17c   : > { %p9115_p8 = scmp.lt.s32.totalorder %s9113_s30, %s9106_s29 }
 0x17d   : > { %p9109_p12 = pnand %p9107_p6, %p10999_p3 }
 0x17e   : > { %p9116_p5 = por %p9115_p8, %p9114_p10 }
 0x17f   : > { %p9110_p0 = pneg %p9109_p12 }
 0x181   : > { %p9117_p13 = pnand %p9116_p5, %p9110_p0 }
 0x183   : > { %9120 = shalt.err (!%p9117_p13)
}
 0x184   : > { %p11000_p4 = scmp.ne.s32.totalorder %s10975_s26, 0  ;;  %s11001_s15 = sld [smem:[#allocation43_spill]] }
 0x186   : > { %8319 = dma.hbm_to_vmem [thread:$0]  (!%p11000_p4), %s10998_s22, 16, %s536_s19, [#allocation7]  }
 0x18a   : > { %s9121_s14 = scalar_lea.hbm %s11001_s15, 256 }
 0x18b   : > { %p9122_p7 = scmp.ne.s32.totalorder %s11001_s15, %s9121_s14  ;;  %p9128_p13 = scmp.lt.u32.totalorder %s9121_s14, %s11001_s15 }
 0x18d   : > { %p9124_p1 = pnand %p9122_p7, %p10999_p3 }
 0x18f   : > { %p9125_p2 = pneg %p9124_p1 }
 0x191   : > { %p9130_p11 = pnand %p9128_p13, %p9125_p2 }
 0x193   : > { %9133 = shalt.err (!%p9130_p11)
}
 0x194   : > { %s9134_s30 = scalar_lea.vmem %s546_s17, 256  ;;  %p9142_p10 = scmp.lt.s32.totalorder %s546_s17, %s546_s17 }
 0x195   : > { %p9135_p6 = scmp.ne.s32.totalorder %s546_s17, %s9134_s30  ;;  %p9143_p8 = scmp.lt.s32.totalorder %s9134_s30, %s9134_s30 }
 0x197   : > { %p9137_p12 = pnand %p9135_p6, %p10999_p3  ;;  %p9144_p5 = por %p9143_p8, %p9142_p10 }
 0x199   : > { %p9138_p0 = pneg %p9137_p12 }
 0x19b   : > { %p9145_p9 = pnand %p9144_p5, %p9138_p0 }
 0x19d   : > { %9148 = shalt.err (!%p9145_p9)
}
 0x19e   : > { %s11002_s19 = smov 8   ;;  %s11003_s18 = smov 128  }
 0x19f   : > { %8322 = dma.hbm_to_vmem [thread:$0]  (!%p11000_p4), %s11001_s15, 256, %s546_s17, [#allocation10], %s11003_s18, %s11003_s18, %s11002_s19  }
 0x1a0   : > { %s11004_s21 = sld [smem:[#allocation50_spill]]  ;;  %s776_s13 = scalar_lea.vmem [#allocation21], %s9550_s27 }
 0x1a1   : > { %s783_s29 = sshll.u32 %s776_s13, 4  ;;  %p11005_p7 = scmp.ne.s32.totalorder %s10981_s25, 0  ;;  %s784_s29 = int_to_ptr.vmem [resolvable:$true] %s783_s29 }
 0x1a6   : > { %s9946_s2 = scalar_lea.hbm %s11004_s21, %s9655_s1  ;;  %s9154_s17 = scalar_lea.hbm %s11004_s21, 256 }
 0x1a7   : > { %s9149_s30 = scalar_lea.hbm %s9946_s2, 16  ;;  %p9155_p13 = scmp.lt.u32.totalorder %s9946_s2, %s11004_s21 }
 0x1a8   : > { %p9150_p9 = scmp.ne.s32.totalorder %s9946_s2, %s9149_s30  ;;  %p9156_p11 = scmp.lt.u32.totalorder %s9154_s17, %s9149_s30 }
 0x1a9   : > { %p9158_p12 = scmp.lt.u32.totalorder %s9149_s30, %s9946_s2 }
 0x1aa   : > { %p9152_p1 = pnand %p9150_p9, %p11005_p7  ;;  %p9157_p6 = por %p9156_p11, %p9155_p13 }
 0x1ac   : > { %p9153_p2 = pneg %p9152_p1  ;;  %p9159_p0 = por %p9158_p12, %p9157_p6 }
 0x1ae   : > { %p9160_p10 = pnand %p9159_p0, %p9153_p2 }
 0x1b0   : > { %9163 = shalt.err (!%p9160_p10)
}
 0x1b1   : > { %s9164_s28 = scalar_lea.vmem %s784_s29, 16  ;;  %s9372_s14 = smov [#allocation21]  }
 0x1b2   : > { %p9165_p8 = scmp.ne.s32.totalorder %s784_s29, %s9164_s28  ;;  %s9169_s13 = sshll.u32 %s9372_s14, 4  ;;  %s9170_s13 = int_to_ptr.vmem [resolvable:$false] %s9169_s13 }
 0x1b3   : > { %s9171_s16 = scalar_lea.vmem %s9170_s13, 32  ;;  %p9172_p1 = scmp.lt.s32.totalorder %s784_s29, %s9170_s13 }
 0x1b4   : > { %p9167_p5 = pnand %p9165_p8, %p11005_p7  ;;  %p9173_p4 = scmp.lt.s32.totalorder %s9171_s16, %s9164_s28 }
 0x1b6   : > { %p9168_p9 = pneg %p9167_p5  ;;  %p9174_p3 = por %p9173_p4, %p9172_p1 }
 0x1b8   : > { %p9175_p11 = pnand %p9174_p3, %p9168_p9 }
 0x1ba   : > { %9178 = shalt.err (!%p9175_p11)
}
 0x1bb   : > { %p11006_p13 = scmp.ne.s32.totalorder %s10976_s20, 0  ;;  %s9373_s30 = smov [#allocation23]  }
 0x1bc   : > { %s558_s5 = sshll.u32 %s9373_s30, 4  ;;  %s9374_s17 = smov [#allocation24]   ;;  %s559_s5 = int_to_ptr.vmem [resolvable:$true] %s558_s5 }
 0x1bd   : > { %8362 = dma.hbm_to_vmem [thread:$0]  (!%p11006_p13), %s9946_s2, 16, %s784_s29, %s9596_s3  }
 0x1be   : > { %s572_s19 = sshll.u32 %s9374_s17, 4  ;;  %s11007_s6 = sld [smem:[#allocation52_spill]]  ;;  %s573_s19 = int_to_ptr.vmem [resolvable:$true] %s572_s19 }
 0x1bf   : > { %p11008_p4 = scmp.ne.s32.totalorder %s10978_s0, 0 }
 0x1c4   : > { %s9179_s7 = scalar_lea.hbm %s11007_s6, 1024 }
 0x1c5   : > { %p9180_p3 = scmp.ne.s32.totalorder %s11007_s6, %s9179_s7  ;;  %p9186_p12 = scmp.lt.u32.totalorder %s9179_s7, %s11007_s6 }
 0x1c7   : > { %p9182_p2 = pnand %p9180_p3, %p11008_p4 }
 0x1c9   : > { %p9183_p6 = pneg %p9182_p2 }
 0x1cb   : > { %p9188_p0 = pnand %p9186_p12, %p9183_p6 }
 0x1cd   : > { %9191 = shalt.err (!%p9188_p0)
}
 0x1ce   : > { %s9192_s2 = scalar_lea.vmem %s559_s5, 1024  ;;  %p9200_p9 = scmp.lt.s32.totalorder %s559_s5, %s559_s5 }
 0x1cf   : > { %p9193_p10 = scmp.ne.s32.totalorder %s559_s5, %s9192_s2  ;;  %p9201_p1 = scmp.lt.s32.totalorder %s9192_s2, %s9192_s2 }
 0x1d1   : > { %p9195_p8 = pnand %p9193_p10, %p11008_p4  ;;  %p9202_p11 = por %p9201_p1, %p9200_p9 }
 0x1d3   : > { %p9196_p5 = pneg %p9195_p8 }
 0x1d5   : > { %p9203_p13 = pnand %p9202_p11, %p9196_p5 }
 0x1d7   : > { %9206 = shalt.err (!%p9203_p13)
}
 0x1d8   : > { %p11009_p3 = scmp.ne.s32.totalorder %s10975_s26, 0  ;;  %s11010_s29 = smov 64  }
 0x1d9   : > { %s11011_s18 = sld [smem:[#allocation53_spill]] }
 0x1da   : > { %8325 = dma.hbm_to_vmem [thread:$0]  (!%p11009_p3), %s11007_s6, 1024, %s559_s5, [#allocation7], %s11010_s29, %s11010_s29, %s10992_s4  }
 0x1df   : > { %s9207_s14 = scalar_lea.hbm %s11011_s18, 16 }
 0x1e0   : > { %p9208_p2 = scmp.ne.s32.totalorder %s11011_s18, %s9207_s14  ;;  %p9214_p12 = scmp.lt.u32.totalorder %s9207_s14, %s11011_s18 }
 0x1e2   : > { %p9210_p13 = pnand %p9208_p2, %p11008_p4 }
 0x1e4   : > { %p9211_p6 = pneg %p9210_p13 }
 0x1e6   : > { %p9216_p0 = pnand %p9214_p12, %p9211_p6 }
 0x1e8   : > { %9219 = shalt.err (!%p9216_p0)
}
 0x1e9   : > { %s9220_s8 = scalar_lea.vmem %s573_s19, 16  ;;  %s9227_s4 = scalar_lea.vmem %s573_s19, 32 }
 0x1ea   : > { %p9221_p10 = scmp.ne.s32.totalorder %s573_s19, %s9220_s8  ;;  %p9228_p9 = scmp.lt.s32.totalorder %s573_s19, %s573_s19 }
 0x1eb   : > { %p9229_p1 = scmp.lt.s32.totalorder %s9227_s4, %s9220_s8 }
 0x1ec   : > { %p9223_p8 = pnand %p9221_p10, %p11008_p4 }
 0x1ed   : > { %p9230_p11 = por %p9229_p1, %p9228_p9 }
 0x1ee   : > { %p9224_p5 = pneg %p9223_p8 }
 0x1f0   : > { %p9231_p7 = pnand %p9230_p11, %p9224_p5 }
 0x1f2   : > { %9234 = shalt.err (!%p9231_p7)
}
 0x1f3   : > { %8328 = dma.hbm_to_vmem [thread:$0]  (!%p11009_p3), %s11011_s18, 16, %s573_s19, [#allocation10]  }
 0x1f4   : > { %s11012_s0 = sld [smem:[#allocation51_spill]]  ;;  %s793_s14 = scalar_lea.vmem [#allocation22], %s9550_s27 }
 0x1f5   : > { %s800_s13 = sshll.u32 %s793_s14, 4  ;;  %p11013_p4 = scmp.ne.s32.totalorder %s10981_s25, 0  ;;  %s801_s13 = int_to_ptr.vmem [resolvable:$true] %s800_s13 }
 0x1fa   : > { %s10010_s17 = scalar_lea.hbm %s11012_s0, %s9655_s1  ;;  %s9240_s19 = scalar_lea.hbm %s11012_s0, 256 }
 0x1fb   : > { %s9235_s26 = scalar_lea.hbm %s10010_s17, 16  ;;  %p9241_p3 = scmp.lt.u32.totalorder %s10010_s17, %s11012_s0 }
 0x1fc   : > { %p9236_p7 = scmp.ne.s32.totalorder %s10010_s17, %s9235_s26  ;;  %p9242_p6 = scmp.lt.u32.totalorder %s9240_s19, %s9235_s26 }
 0x1fd   : > { %p9244_p0 = scmp.lt.u32.totalorder %s9235_s26, %s10010_s17 }
 0x1fe   : > { %p9238_p2 = pnand %p9236_p7, %p11013_p4  ;;  %p9243_p12 = por %p9242_p6, %p9241_p3 }
 0x200   : > { %p9239_p13 = pneg %p9238_p2  ;;  %p9245_p10 = por %p9244_p0, %p9243_p12 }
 0x202   : > { %p9246_p8 = pnand %p9245_p10, %p9239_p13 }
 0x204   : > { %9249 = shalt.err (!%p9246_p8)
}
 0x205   : > { %s9250_s27 = scalar_lea.vmem %s801_s13, 16  ;;  %s9375_s1 = smov [#allocation22]  }
 0x206   : > { %p9251_p5 = scmp.ne.s32.totalorder %s801_s13, %s9250_s27  ;;  %s9255_s4 = sshll.u32 %s9375_s1, 4  ;;  %s9256_s4 = int_to_ptr.vmem [resolvable:$false] %s9255_s4 }
 0x207   : > { %s9257_s5 = scalar_lea.vmem %s9256_s4, 32  ;;  %p9258_p11 = scmp.lt.s32.totalorder %s801_s13, %s9256_s4 }
 0x208   : > { %p9253_p9 = pnand %p9251_p5, %p11013_p4  ;;  %p9259_p7 = scmp.lt.s32.totalorder %s9257_s5, %s9250_s27 }
 0x20a   : > { %p9254_p1 = pneg %p9253_p9  ;;  %p9260_p2 = por %p9259_p7, %p9258_p11 }
 0x20c   : > { %p9261_p3 = pnand %p9260_p2, %p9254_p1 }
 0x20e   : > { %9264 = shalt.err (!%p9261_p3)
}
 0x20f   : > { %p11014_p6 = scmp.ne.s32.totalorder %s10976_s20, 0  ;;  %s11015_s29 = sld [smem:[#allocation39_spill]] }
 0x211   : > { %8365 = dma.hbm_to_vmem [thread:$0]  (!%p11014_p6), %s10010_s17, 16, %s801_s13, %s9596_s3  }
 0x215   : > { %p11016_p13 = scmp.ne.s32.totalorder %s11015_s29, 0 }
 0x216   : > { %s11017_s25 = sld [smem:[#allocation35_spill]] (!%p11016_p13) }
 0x217   : > { %809 = sbr.rel (%p11016_p13) target bundleno = 7851 (0x1eab), region = 92 }
 0x21c   : > { %p11018_p4 = scmp.eq.s32.totalorder (!%p11016_p13), %s11017_s25, 0 }
 0x21e   : > { %9308 = dma.done.wait (%p11018_p4), [#allocation4], 256   ;;  %p11019_p12 = pmov %p11018_p4 }
 0x21f   : > { %p11020_p0 = pmov %p11018_p4 }
 0x220   : > { %9310 = vsyncadd (%p11019_p12), [#allocation4], 4294967040 }
 0x221   : > { %9312 = dma.done.wait (%p11020_p0), [#allocation7], 144   ;;  %p11021_p10 = pmov %p11020_p0 }
 0x222   : > { %p11022_p8 = pmov %p11020_p0 }
 0x223   : > { %9314 = vsyncadd (%p11021_p10), [#allocation7], 4294967152 }
 0x224   : > { %9316 = dma.done.wait (%p11022_p8), [#allocation10], 256   ;;  %p11023_p5 = pmov %p11020_p0 }
 0x225   : > { %s11024_s3 = sld [smem:[#allocation33_spill]]  ;;  %s11025_s20 = sld [smem:[#allocation38_spill]] }
 0x226   : > { %9318 = vsyncadd (%p11023_p5), [#allocation10], 4294967040  ;;  %s827_s7 = sand.u32 1, %s11017_s25  }
 0x227   : > { %s828_s14 = scalar_lea.sflag [#allocation4], %s827_s7 }
 0x22b   : > { %s10047_s30 = sand.u32 1, %s11024_s3   ;;  %p11026_p9 = scmp.ne.s32.totalorder %s11025_s20, 0 }
 0x22c   : > { %s8256_s17 = smul.u32 192, %s10047_s30 }
 0x22e   : > { %s10050_s13 = scalar_lea.vmem [#allocation11], %s8256_s17 }
 0x22f   : > { %9320 = dma.done.wait (%p11026_p9), %s828_s14, 37264  }
 0x230   : > { %9322 = vsyncadd (%p11026_p9), %s828_s14, 4294930032  ;;  %s8257_s26 = smul.u32 3, %s10047_s30  ;;  %s7387_s28 = sshll.u32 %s10047_s30, 6 }
 0x231   : > { %s7388_s16 = sshll.u32 %s10047_s30, 10  ;;  %s7389_s19 = sshll.u32 %s10047_s30, 4 }
 0x232   : > { %s10060_s2 = scalar_lea.vmem [#allocation12], %s8257_s26  ;;  %s10062_s8 = scalar_lea.vmem [#allocation13], %s7387_s28 }
 0x233   : > { %s857_s27 = scalar_lea.vmem [#allocation14], %s10047_s30  ;;  %s865_s1 = scalar_lea.vmem [#allocation15], %s10047_s30 }
 0x234   : > { %s873_s4 = scalar_lea.vmem [#allocation16], %s10047_s30  ;;  %s10067_s5 = scalar_lea.vmem [#allocation17], %s7388_s16 }
 0x235   : > { %s10069_s29 = scalar_lea.vmem [#allocation18], %s7389_s19  ;;  %s10071_s3 = scalar_lea.vmem [#allocation19], %s7388_s16 }
 0x236   : > { %s908_s20 = scalar_lea.vmem [#allocation20], %s10047_s30  ;;  %s916_s7 = scalar_lea.vmem [#allocation21], %s10047_s30 }
 0x237   : > { %s924_s17 = scalar_lea.vmem [#allocation22], %s10047_s30  ;;  %p11027_p1 = pmov %p11020_p0 }
 0x238   : > { %p11028_p11 = pmov %p11020_p0 }
 0x239   : > { %9324 = dma.done.wait (%p11027_p1), [#allocation7], 1024  }
 0x23a   : > { %9326 = vsyncadd (%p11028_p11), [#allocation7], 4294966272  ;;  %p11029_p7 = pmov %p11020_p0 }
 0x23b   : > { %p11030_p2 = pmov %p11020_p0 }
 0x23c   : > { %9328 = dma.done.wait (%p11029_p7), [#allocation10], 16  }
 0x23d   : > { %9330 = vsyncadd (%p11030_p2), [#allocation10], 4294967280  ;;  %p11031_p3 = scmp.ne.s32.totalorder %s11017_s25, 0 }
 0x23e   : > { %v8443_v0 = vld [vmem:[#allocation6] sm:$0xff] (!%p11031_p3)   ;;  %v9376_v1 = vmov (!%p11031_p3), 0.0   ;;  %v1034_v2 = vld [vmem:[#allocation3] sm:$0xff] (!%p11031_p3)  ;;  %v1035_v3 = vld [vmem:[#allocation3 + $0x8] sm:$0xff] (!%p11031_p3)  ;;  %vm9377_vm0 = vmmov (!%p11031_p3), 0   ;;  %vm1052_vm1 = vcmask (!%p11031_p3), 130048  }
 0x23f   : > { %1033 = sbr.rel (%p11031_p3) target bundleno = 800 (0x320), region = 168  ;;  %8026 = vmatprep.subr.bf16.mxu0 (!%p11031_p3), %v9376_v1  ;;  %8028 = vmatprep.mubr.msk.bf16.mxu0 (!%p11031_p3), %vm9377_vm0, %v9376_v1  ;;  %v1036_v4 = vpack.c.bf16 (!%p11031_p3), %v1035_v3, %v1034_v2  ;;  %v7394_v5 = vld [vmem:[#allocation8] ss:$0 sm:$0xff] (!%p11031_p3)  ;;  %v1099_v9 = vld [vmem:[#allocation9] sm:$0xff] (!%p11031_p3)  ;;  %v1100_v14 = vld [vmem:[#allocation9 + $0x8] sm:$0xff] (!%p11031_p3) }
 0x240   : > { %8027 = vmatpush3.bf16.msra.mxu0 (!%p11031_p3), %v8443_v0 }
 0x243   : > { %8029 = vmatmul.mubr.msk.bf16.vlgmr.msra.gmra.mrb[0].mxu0 (!%p11031_p3), %vm1052_vm1, %v1036_v4 }
 0x316   : > { %v1090_v6 = vpop.f32.mrb[0].mxu0 }
 0x317   : > { %v1091_v7 = vadd.f32 %v7394_v5, %v1090_v6  ;;  %v8030_v8 = vpop.f32.mrb[1].mxu0 }
 0x318   : > { %v1093_v10 = vpop.f32.mrb[2].mxu0 }
 0x319   : > { %v1097_v11 = vmul.f32 2.0, %v1091_v7  ;;  %v1094_v12 = vadd.f32 %v7394_v5, %v1093_v10  ;;  %v8031_v13 = vpop.f32.mrb[3].mxu0 }
 0x31b   : > { %v1101_v15 = vadd.f32 %v1099_v9, %v1097_v11  ;;  %v1098_v16 = vmul.f32 2.0, %v1094_v12 }
 0x31d   : > { %1103 = vst [vmem:[#allocation2] sm:$0xff] %v1101_v15  ;;  %v1102_v17 = vadd.f32 %v1100_v14, %v1098_v16 }
 0x31f   : > { %1104 = vst [vmem:[#allocation2 + $0x8] sm:$0xff] %v1102_v17 }
 0x320 PF: > { %v8479_v18 = vld [vmem:[%s10050_s13 + $0x4] ss:$12 sps:$4 sm:$0xff]   ;;  %v8481_v19 = vld [vmem:[%s10050_s13] ss:$12 sps:$4 sm:$0xff]   ;;  %v9378_v20 = vmov 0   ;;  %v9379_v21 = vmov 0.0   ;;  %v1142_v47 = vlaneseq }
 0x321   : > { %1317 = vmatprep.mubr.bf16.mxu0 %v9378_v20  ;;  %8032 = vmatprep.subr.bf16.mxu1 %v9379_v21  ;;  %v8482_v22 = vld [vmem:[%s10050_s13 + $0x1c] ss:$12 sps:$4 sm:$0xff]   ;;  %vm9380_vm2 = vmmov 0   ;;  %v8484_v23 = vld [vmem:[%s10050_s13 + $0x18] ss:$12 sps:$4 sm:$0xff]   ;;  %vm1369_vm3 = vcmask 130048  }
 0x322   : > { %1285 = vmatprep.subr.bf16.mxu0 %v8479_v18  ;;  %8048 = vmatprep.mubr.msk.bf16.mxu1 %vm9380_vm2, %v9379_v21  ;;  %v8485_v24 = vld [vmem:[%s10050_s13 + $0x34] ss:$12 sps:$4 sm:$0xff]   ;;  %v8487_v25 = vld [vmem:[%s10050_s13 + $0x30] ss:$12 sps:$4 sm:$0xff]   ;;  %v8488_v26 = vld [vmem:[%s10050_s13 + $0x4c] ss:$12 sps:$4 sm:$0xff]  }
 0x323   : > { %1286 = vmatpush1.bf16.msra.mxu0 %v8481_v19  ;;  %v8490_v27 = vld [vmem:[%s10050_s13 + $0x48] ss:$12 sps:$4 sm:$0xff]   ;;  %v8491_v28 = vld [vmem:[%s10050_s13 + $0x64] ss:$12 sps:$4 sm:$0xff]   ;;  %v8504_v30 = vld [vmem:[%s10050_s13 + $0x20] ss:$12 sps:$4 sm:$0xff]  }
 0x324   : > { %1287 = vmatprep.subr.bf16.mxu0 %v8482_v22  ;;  %v8503_v29 = vld [vmem:[%s10050_s13 + $0x8] ss:$12 sps:$4 sm:$0xff]   ;;  %v8493_v31 = vld [vmem:[%s10050_s13 + $0x60] ss:$12 sps:$4 sm:$0xff]   ;;  %v8505_v33 = vld [vmem:[%s10050_s13 + $0x38] ss:$12 sps:$4 sm:$0xff]  }
 0x325   : > { %8033 = vmatpush3.bf16.msra.mxu1 %v8503_v29  ;;  %v8494_v32 = vld [vmem:[%s10050_s13 + $0x7c] ss:$12 sps:$4 sm:$0xff]   ;;  %v8496_v34 = vld [vmem:[%s10050_s13 + $0x78] ss:$12 sps:$4 sm:$0xff]   ;;  %v8497_v35 = vld [vmem:[%s10050_s13 + $0x94] ss:$12 sps:$4 sm:$0xff]  }
 0x326   : > { %8034 = vmatprep.subr.bf16.mxu1 %v9379_v21  ;;  %v8506_v36 = vld [vmem:[%s10050_s13 + $0x50] ss:$12 sps:$4 sm:$0xff]   ;;  %v8500_v38 = vld [vmem:[%s10050_s13 + $0xac] ss:$12 sps:$4 sm:$0xff]   ;;  %v8507_v39 = vld [vmem:[%s10050_s13 + $0x68] ss:$12 sps:$4 sm:$0xff]  }
 0x327   : > { %1288 = vmatpush1.bf16.msra.mxu0 %v8484_v23  ;;  %v8499_v37 = vld [vmem:[%s10050_s13 + $0x90] ss:$12 sps:$4 sm:$0xff]   ;;  %v8502_v40 = vld [vmem:[%s10050_s13 + $0xa8] ss:$12 sps:$4 sm:$0xff]   ;;  %v8508_v43 = vld [vmem:[%s10050_s13 + $0x80] ss:$12 sps:$4 sm:$0xff]  }
 0x328   : > { %1289 = vmatprep.subr.bf16.mxu0 %v8485_v24  ;;  %v1105_v41 = vld [vmem:[#allocation2] sm:$0xff]  ;;  %v1106_v42 = vld [vmem:[#allocation2 + $0x8] sm:$0xff]  ;;  %v10127_v48 = vshrl.u32 %v1142_v47, 7  ;;  %v1140_v50 = vld [vmem:[%s10060_s2] sm:$0x7]  ;;  %s9381_s25 = smov 112  }
 0x329   : > { %8035 = vmatpush3.bf16.msra.mxu1 %v8504_v30  ;;  %v1107_v44 = vpack.c.bf16 %v1106_v42, %v1105_v41  ;;  %v8509_v45 = vld [vmem:[%s10050_s13 + $0x98] ss:$12 sps:$4 sm:$0xff]   ;;  %v8510_v46 = vld [vmem:[%s10050_s13 + $0xb0] ss:$12 sps:$4 sm:$0xff]   ;;  %vm1524_vm4 = vcmask 64512   ;;  %s9382_s14 = smov 96  }
 0x32a   : > { %8036 = vmatprep.subr.bf16.mxu1 %v9379_v21  ;;  %v10130_v49 = vsub.s32 0, %v10127_v48  ;;  %v10134_v51 = vsub.s32 1, %v10127_v48  ;;  %v10147_v60 = vsub.s32 2, %v10127_v48  ;;  %s9383_s13 = smov 80   ;;  %s9384_s26 = smov 64   ;;  %vm4077_vm5 = vcmask 261120  }
 0x32b   : > { %1290 = vmatpush1.bf16.msra.mxu0 %v8487_v25  ;;  %s9385_s28 = smov 48   ;;  %s9386_s16 = smov 32   ;;  %vm4080_vm6 = vcmask 392192   ;;  %vm4083_vm7 = vcmask 523264   ;;  %vm4086_vm8 = vcmask 654336   ;;  %vm4089_vm9 = vcmask 785408  }
 0x32c   : > { %1291 = vmatprep.subr.bf16.mxu0 %v8488_v26  ;;  %v1145_v52 = vrot.slane %v1140_v50, %v10130_v49  ;;  %v1149_v53 = vrot.slane %v1140_v50, %v10134_v51  ;;  %v1153_v62 = vrot.slane %v1140_v50, %v10147_v60  ;;  %s9387_s19 = smov 16   ;;  %vm4092_vm10 = vcmask 916480   ;;  %s11032_s2 = sld [smem:[#allocation35_spill]] }
 0x32d   : > { %8037 = vmatpush3.bf16.msra.mxu1 %v8505_v33 }
 0x32e   : > { %8038 = vmatprep.subr.bf16.mxu1 %v9379_v21 }
 0x32f   : > { %1292 = vmatpush1.bf16.msra.mxu0 %v8490_v27 }
 0x330   : > { %1293 = vmatprep.subr.bf16.mxu0 %v8491_v28 }
 0x331   : > { %8039 = vmatpush3.bf16.msra.mxu1 %v8506_v36 }
 0x332   : > { %8040 = vmatprep.subr.bf16.mxu1 %v9379_v21  ;;  %p7739_p6 = scmp.ne.s32.totalorder %s11032_s2, 15 }
 0x333   : > { %1294 = vmatpush1.bf16.msra.mxu0 %v8493_v31  ;;  %vm9389_vm11 = vmmov (!%p7739_p6), 0  }
 0x334   : > { %1295 = vmatprep.subr.bf16.mxu0 %v8494_v32 }
 0x335   : > { %8041 = vmatpush3.bf16.msra.mxu1 %v8507_v39 }
 0x336   : > { %8042 = vmatprep.subr.bf16.mxu1 %v9379_v21 }
 0x337   : > { %1296 = vmatpush1.bf16.msra.mxu0 %v8496_v34 }
 0x338   : > { %1297 = vmatprep.subr.bf16.mxu0 %v8497_v35 }
 0x339   : > { %8043 = vmatpush3.bf16.msra.mxu1 %v8508_v43 }
 0x33a   : > { %8044 = vmatprep.subr.bf16.mxu1 %v9379_v21 }
 0x33b   : > { %1298 = vmatpush1.bf16.msra.mxu0 %v8499_v37 }
 0x33c   : > { %1299 = vmatprep.subr.bf16.mxu0 %v8500_v38 }
 0x33d   : > { %8045 = vmatpush3.bf16.msra.mxu1 %v8509_v45 }
 0x33e   : > { %8046 = vmatprep.subr.bf16.mxu1 %v9379_v21 }
 0x33f   : > { %1300 = vmatpush1.bf16.msra.mxu0 %v8502_v40 }
 0x340   : > { %8092 = vmatprep.subr.mxu0 %v9379_v21 }
 0x341   : > { %8047 = vmatpush3.bf16.msra.mxu1 %v8510_v46 }
 0x342   : > { %1318 = vmatmul.mubr.bf16.vlgmr.msra.gmra.mrb[0].mxu0 %v1107_v44  ;;  %8052 = vmatprep.subr.mxu1 %v9379_v21 }
 0x343   : > { %8094 = vmatprep.mubr.msk.f32.mxu0 %vm9380_vm2, %v9379_v21 }
 0x344   : > { %8049 = vmatmul.mubr.bf16.vlgmr.msra.gmra.mrb[0].mxu1 %v1107_v44 }
 0x345   : > { %8054 = vmatprep.mubr.msk.f32.mxu1 %vm9380_vm2, %v9379_v21 }
 0x415   : > { %v1319_v54 = vpop.f32.mrb[0].mxu0 }
 0x416   : > { %v10138_v55 = vadd.f32 %v1319_v54, %v1145_v52  ;;  %v1321_v56 = vpop.f32.mrb[1].mxu0 }
 0x417   : > { %v10140_v57 = vadd.f32 %v1321_v56, %v1149_v53  ;;  %v1323_v58 = vpop.f32.mrb[2].mxu0  ;;  %v1362_v0 = vpop.f32.mrb[0].mxu1 }
 0x418   : > { %v1325_v59 = vpop.f32.mrb[3].mxu0  ;;  %1693 = vrot.lane.b32.xlu1 %v10138_v55, %s9381_s25  ;;  %v10159_v63 = vadd.f32 %v1323_v58, %v1145_v52  ;;  %v10164_v1 = vadd.f32 %v1362_v0, %v1153_v62  ;;  %v8050_v2 = vpop.f32.mrb[1].mxu1 }
 0x419   : > { %8053 = vmatpush3.xpose.msk.msra.mxu1 %vm1369_vm3, %v10140_v57  ;;  %v10150_v61 = vadd.f32 %v1325_v59, %v1149_v53  ;;  %v1365_v3 = vpop.f32.mrb[2].mxu1 }
 0x41a   : > { %8057 = vmatprep.subr.mxu1 %v9379_v21  ;;  %v10168_v4 = vadd.f32 %v1365_v3, %v1153_v62  ;;  %v8051_v5 = vpop.f32.mrb[3].mxu1 }
 0x41c   : > { %8055 = vmatmul.mubr.msk.f32.vlgmr.msra.gmra.mrb[4].mxu1 %vm1369_vm3, %v10138_v55 }
 0x41d   : > { %8058 = vmatpush3.xpose.msk.msra.mxu1 %vm1369_vm3, %v10150_v61  ;;  %8059 = vmatprep.mubr.msk.f32.mxu1 %vm9380_vm2, %v9379_v21 }
 0x41e   : > { %8062 = vmatprep.subr.mxu1 %v9379_v21 }
 0x420   : > { %8060 = vmatmul.mubr.msk.f32.vlgmr.msra.gmra.mrb[6].mxu1 %vm1369_vm3, %v10159_v63 }
 0x421   : > { %8064 = vmatprep.mubr.msk.f32.mxu1 %vm9380_vm2, %v9379_v21  ;;  %8063 = vmatpush3.msra.mxu1 %v10164_v1 }
 0x422   : > { %8067 = vmatprep.subr.mxu1 %v9379_v21 }
 0x48a   : > { %v1694_v26 = vpop.permute.xlu1 %1693 }
 0x4ef   : > { %v1442_v6 = vpop.f32.mrb[4].mxu1 }
 0x4f0   : > { %v1522_v7 = vmul.f32 0.25, %v1442_v6  ;;  %v8056_v8 = vpop.f32.mrb[5].mxu1 }
 0x4f2   : > { %v1525_v9 = vsel %vm1524_vm4, %v1522_v7, -inf }
 0x4f3   : > { %1526 = vmax.xlane.f32.xlu0 %v1525_v9  ;;  %v1518_v10 = vpop.f32.mrb[6].mxu1 }
 0x4f4   : > { %v1523_v11 = vmul.f32 0.25, %v1518_v10  ;;  %v8061_v12 = vpop.f32.mrb[7].mxu1 }
 0x4f6   : > { %v1528_v13 = vsel %vm1524_vm4, %v1523_v11, -inf }
 0x4f7   : > { %1529 = vmax.xlane.f32.xlu0 %v1528_v13 }
 0x50d   : > { %1695 = vrot.lane.b32.xlu0 %v10140_v57, %s9381_s25 }
 0x580   : > { %v1527_v14 = vpop.xlane.xlu0 %1526 }
 0x581   : > { %v1531_v15 = vsub.f32 %v1522_v7, %v1527_v14 }
 0x583   : > { %v1533_v16 = vmul.f32 1.442695, %v1531_v15 }
 0x584   : > { %v1530_v17 = vpop.xlane.xlu0 %1529 }
 0x585   : > { %8647 = vpow2.f32 %v1533_v16  ;;  %v1532_v18 = vsub.f32 %v1523_v11, %v1530_v17 }
 0x587   : > { %v1535_v19 = vmul.f32 1.442695, %v1532_v18 }
 0x588   : > { %v1696_v33 = vpop.permute.xlu0 %1695 }
 0x589   : > { %8649 = vpow2.f32 %v1535_v19 }
 0x58f   : > { %v8648_v22 = vpop.eup %8647 }
 0x590   : > { %v1537_v23 = vsel %vm1524_vm4, %v8648_v22, 0.0 }
 0x591   : > { %1538 = vadd.xlane.f32.xlu1 %v1537_v23 }
 0x593   : > { %v8650_v24 = vpop.eup %8649 }
 0x594   : > { %v1540_v25 = vsel %vm1524_vm4, %v8650_v24, 0.0 }
 0x595   : > { %1541 = vadd.xlane.f32.xlu1 %v1540_v25 }
 0x5a6   : > { %1773 = vrot.lane.b32.xlu1 %v10150_v61, %s9381_s25 }
 0x5aa   : > { %1771 = vrot.lane.b32.xlu1 %v10159_v63, %s9381_s25 }
 0x61e   : > { %v1539_v27 = vpop.xlane.xlu1 %1538 }
 0x61f   : > { %8651 = vrcp.f32 %v1539_v27 }
 0x622   : > { %v1542_v28 = vpop.xlane.xlu1 %1541 }
 0x623   : > { %8653 = vrcp.f32 %v1542_v28 }
 0x626   : > { %v1774_v34 = vpop.permute.xlu1 %1773 }
 0x629   : > { %v8652_v29 = vpop.eup %8651 }
 0x62a   : > { %v1544_v30 = vmul.f32 %v8652_v29, %v8648_v22  ;;  %v1772_v35 = vpop.permute.xlu1 %1771 }
 0x62c   : > { %8065 = vmatmul.mubr.msk.f32.vlgmr.msra.gmra.mrb[8].mxu1 %vm1524_vm4, %v1544_v30 }
 0x62d   : > { %v8654_v31 = vpop.eup %8653  ;;  %8068 = vmatpush3.msra.mxu1 %v10168_v4  ;;  %8069 = vmatprep.mubr.msk.f32.mxu1 %vm9380_vm2, %v9379_v21 }
 0x62e   : > { %v1546_v32 = vmul.f32 %v8654_v31, %v8650_v24  ;;  %8072 = vmatprep.subr.mxu1 %v9379_v21 }
 0x630   : > { %8070 = vmatmul.mubr.msk.f32.vlgmr.msra.gmra.mrb[10].mxu1 %vm1524_vm4, %v1546_v32 }
 0x631   : > { %8074 = vmatprep.mubr.msk.f32.mxu1 %vm9380_vm2, %v9379_v21 }
 0x634   : > { %8073 = vmatpush3.xpose.msk.msra.mxu1 %vm1369_vm3, %v1696_v33 }
 0x635   : > { %8077 = vmatprep.subr.mxu1 %v9379_v21 }
 0x637   : > { %8075 = vmatmul.mubr.msk.f32.vlgmr.msra.gmra.mrb[12].mxu1 %vm1369_vm3, %v1694_v26 }
 0x638   : > { %8078 = vmatpush3.xpose.msk.msra.mxu1 %vm1369_vm3, %v1774_v34  ;;  %8079 = vmatprep.mubr.msk.f32.mxu1 %vm9380_vm2, %v9379_v21 }
 0x639   : > { %8082 = vmatprep.subr.mxu1 %v9379_v21 }
 0x63b   : > { %8080 = vmatmul.mubr.msk.f32.vlgmr.msra.gmra.mrb[14].mxu1 %vm1369_vm3, %v1772_v35 }
 0x63c   : > { %8084 = vmatprep.mubr.msk.f32.mxu1 %vm9380_vm2, %v9379_v21 }
 0x6ff   : > { %v10200_v36 = vpop.f32.mrb[8].mxu1 }
 0x700   : > { %v8066_v37 = vpop.f32.mrb[9].mxu1 }
 0x703   : > { %v10202_v38 = vpop.f32.mrb[10].mxu1 }
 0x704   : > { %v8071_v39 = vpop.f32.mrb[11].mxu1 }
 0x70a   : > { %v1767_v40 = vpop.f32.mrb[12].mxu1 }
 0x70b   : > { %v1849_v41 = vmul.f32 0.25, %v1767_v40  ;;  %v8076_v42 = vpop.f32.mrb[13].mxu1 }
 0x70d   : > { %v1851_v43 = vsel %vm1524_vm4, %v1849_v41, -inf }
 0x70e   : > { %1852 = vmax.xlane.f32.xlu0 %v1851_v43  ;;  %v1845_v44 = vpop.f32.mrb[14].mxu1 }
 0x70f   : > { %v1850_v45 = vmul.f32 0.25, %v1845_v44  ;;  %v8081_v46 = vpop.f32.mrb[15].mxu1 }
 0x711   : > { %v1854_v47 = vsel %vm1524_vm4, %v1850_v45, -inf }
 0x712   : > { %1855 = vmax.xlane.f32.xlu1 %v1854_v47 }
 0x723   : > { %1951 = vrot.lane.b32.xlu1 %v10168_v4, %s9381_s25 }
 0x727   : > { %2029 = vrot.lane.b32.xlu1 %v10140_v57, %s9382_s14 }
 0x72b   : > { %2107 = vrot.lane.b32.xlu1 %v10150_v61, %s9382_s14 }
 0x72f   : > { %2105 = vrot.lane.b32.xlu1 %v10159_v63, %s9382_s14 }
 0x79b   : > { %v1853_v50 = vpop.xlane.xlu0 %1852 }
 0x79c   : > { %v1857_v52 = vsub.f32 %v1849_v41, %v1853_v50 }
 0x79e   : > { %v1859_v53 = vmul.f32 1.442695, %v1857_v52 }
 0x79f   : > { %v1856_v54 = vpop.xlane.xlu1 %1855 }
 0x7a0   : > { %8655 = vpow2.f32 %v1859_v53  ;;  %v1858_v0 = vsub.f32 %v1850_v45, %v1856_v54 }
 0x7a2   : > { %v1861_v2 = vmul.f32 1.442695, %v1858_v0 }
 0x7a3   : > { %v1952_v56 = vpop.permute.xlu1 %1951 }
 0x7a4   : > { %8657 = vpow2.f32 %v1861_v2 }
 0x7a7   : > { %v2030_v58 = vpop.permute.xlu1 %2029 }
 0x7a8   : > { %8093 = vmatpush3.xpose.msk.msra.mxu0 %vm1369_vm3, %v2030_v58 }
 0x7a9   : > { %8102 = vmatprep.subr.mxu0 %v9379_v21 }
 0x7aa   : > { %v8656_v59 = vpop.eup %8655 }
 0x7ab   : > { %v1863_v62 = vsel %vm1524_vm4, %v8656_v59, 0.0  ;;  %v2108_v13 = vpop.permute.xlu1 %2107 }
 0x7ac   : > { %1864 = vadd.xlane.f32.xlu0 %v1863_v62 }
 0x7ae   : > { %v8658_v3 = vpop.eup %8657 }
 0x7af   : > { %v1866_v5 = vsel %vm1524_vm4, %v8658_v3, 0.0  ;;  %v2106_v15 = vpop.permute.xlu1 %2105 }
 0x7c2   : > { %1874 = vrot.lane.b32.xlu0 %v10164_v1, %s9381_s25 }
 0x7e1   : > { %1867 = vadd.xlane.f32.xlu0 %v1866_v5 }
 0x7f7   : > { %2027 = vrot.lane.b32.xlu0 %v10138_v55, %s9382_s14 }
 0x839   : > { %v1865_v6 = vpop.xlane.xlu0 %1864 }
 0x83a   : > { %8659 = vrcp.f32 %v1865_v6 }
 0x83d   : > { %v1875_v7 = vpop.permute.xlu0 %1874 }
 0x83e   : > { %8083 = vmatpush3.msra.mxu1 %v1875_v7 }
 0x83f   : > { %8087 = vmatprep.subr.mxu1 %v9379_v21 }
 0x844   : > { %v8660_v8 = vpop.eup %8659 }
 0x845   : > { %v1870_v9 = vmul.f32 %v8660_v8, %v8656_v59 }
 0x847   : > { %8085 = vmatmul.mubr.msk.f32.vlgmr.msra.gmra.mrb[16].mxu1 %vm1524_vm4, %v1870_v9 }
 0x848   : > { %8088 = vmatpush3.msra.mxu1 %v1952_v56  ;;  %8089 = vmatprep.mubr.msk.f32.mxu1 %vm9380_vm2, %v9379_v21 }
 0x849   : > { %8097 = vmatprep.subr.mxu1 %v9379_v21 }
 0x86e   : > { %v1868_v10 = vpop.xlane.xlu0 %1867 }
 0x86f   : > { %8661 = vrcp.f32 %v1868_v10 }
 0x872   : > { %v2028_v11 = vpop.permute.xlu0 %2027 }
 0x873   : > { %8095 = vmatmul.mubr.msk.f32.vlgmr.msra.gmra.mrb[4].mxu0 %vm1369_vm3, %v2028_v11 }
 0x874   : > { %8104 = vmatprep.mubr.msk.f32.mxu0 %vm9380_vm2, %v9379_v21 }
 0x879   : > { %v8662_v12 = vpop.eup %8661 }
 0x87a   : > { %v1872_v14 = vmul.f32 %v8662_v12, %v8658_v3 }
 0x87c   : > { %8090 = vmatmul.mubr.msk.f32.vlgmr.msra.gmra.mrb[18].mxu1 %vm1524_vm4, %v1872_v14 }
 0x87d   : > { %8098 = vmatpush3.xpose.msk.msra.mxu1 %vm1369_vm3, %v2108_v13  ;;  %8099 = vmatprep.mubr.msk.f32.mxu1 %vm9380_vm2, %v9379_v21 }
 0x87e   : > { %8107 = vmatprep.subr.mxu1 %v9379_v21 }
 0x880   : > { %8100 = vmatmul.mubr.msk.f32.vlgmr.msra.gmra.mrb[20].mxu1 %vm1369_vm3, %v2106_v15 }
 0x881   : > { %8109 = vmatprep.mubr.msk.f32.mxu1 %vm9380_vm2, %v9379_v21 }
 0x91a   : > { %v10238_v16 = vpop.f32.mrb[16].mxu1 }
 0x91b   : > { %v8086_v17 = vpop.f32.mrb[17].mxu1 }
 0x946   : > { %v2101_v18 = vpop.f32.mrb[4].mxu0 }
 0x947   : > { %v2183_v19 = vmul.f32 0.25, %v2101_v18  ;;  %v8096_v22 = vpop.f32.mrb[5].mxu0 }
 0x949   : > { %v2185_v23 = vsel %vm1524_vm4, %v2183_v19, -inf }
 0x94a   : > { %2186 = vmax.xlane.f32.xlu0 %v2185_v23 }
 0x94f   : > { %v10241_v24 = vpop.f32.mrb[18].mxu1 }
 0x950   : > { %v8444_v25 = vpack.i.bf16 %v10241_v24, %v10238_v16  ;;  %v8091_v26 = vpop.f32.mrb[19].mxu1 }
 0x953   : > { %v2179_v27 = vpop.f32.mrb[20].mxu1 }
 0x954   : > { %v2184_v28 = vmul.f32 0.25, %v2179_v27  ;;  %v8101_v29 = vpop.f32.mrb[21].mxu1 }
 0x956   : > { %v2188_v30 = vsel %vm1524_vm4, %v2184_v28, -inf }
 0x957   : > { %2189 = vmax.xlane.f32.xlu1 %v2188_v30 }
 0x968   : > { %2283 = vrot.lane.b32.xlu1 %v10168_v4, %s9382_s14 }
 0x96c   : > { %2361 = vrot.lane.b32.xlu1 %v10140_v57, %s9383_s13 }
 0x970   : > { %2439 = vrot.lane.b32.xlu1 %v10150_v61, %s9383_s13 }
 0x974   : > { %2437 = vrot.lane.b32.xlu1 %v10159_v63, %s9383_s13 }
 0x9d7   : > { %v2187_v31 = vpop.xlane.xlu0 %2186 }
 0x9d8   : > { %v2191_v32 = vsub.f32 %v2183_v19, %v2187_v31 }
 0x9da   : > { %v2193_v33 = vmul.f32 1.442695, %v2191_v32 }
 0x9dc   : > { %8663 = vpow2.f32 %v2193_v33 }
 0x9e4   : > { %v2190_v34 = vpop.xlane.xlu1 %2189 }
 0x9e5   : > { %v2192_v40 = vsub.f32 %v2184_v28, %v2190_v34 }
 0x9e6   : > { %v8664_v35 = vpop.eup %8663 }
 0x9e7   : > { %v2197_v37 = vsel %vm1524_vm4, %v8664_v35, 0.0  ;;  %v2195_v41 = vmul.f32 1.442695, %v2192_v40 }
 0x9e8   : > { %2198 = vadd.xlane.f32.xlu0 %v2197_v37  ;;  %v2284_v39 = vpop.permute.xlu1 %2283 }
 0x9e9   : > { %8108 = vmatpush3.msra.mxu1 %v2284_v39  ;;  %8665 = vpow2.f32 %v2195_v41 }
 0x9ea   : > { %8117 = vmatprep.subr.mxu1 %v9379_v21 }
 0x9ec   : > { %v2362_v50 = vpop.permute.xlu1 %2361 }
 0x9f0   : > { %v2440_v56 = vpop.permute.xlu1 %2439 }
 0x9f3   : > { %v8666_v42 = vpop.eup %8665 }
 0x9f4   : > { %v2200_v43 = vsel %vm1524_vm4, %v8666_v42, 0.0  ;;  %v2438_v59 = vpop.permute.xlu1 %2437 }
 0x9fe   : > { %2207 = vrot.lane.b32.xlu0 %v10164_v1, %s9382_s14 }
 0xa1d   : > { %2201 = vadd.xlane.f32.xlu0 %v2200_v43 }
 0xa33   : > { %2359 = vrot.lane.b32.xlu0 %v10138_v55, %s9383_s13 }
 0xa75   : > { %v2199_v44 = vpop.xlane.xlu0 %2198 }
 0xa76   : > { %8667 = vrcp.f32 %v2199_v44 }
 0xa79   : > { %v2208_v45 = vpop.permute.xlu0 %2207 }
 0xa7a   : > { %8103 = vmatpush3.msra.mxu0 %v2208_v45 }
 0xa7b   : > { %8112 = vmatprep.subr.mxu0 %v9379_v21 }
 0xa80   : > { %v8668_v46 = vpop.eup %8667 }
 0xa81   : > { %v2204_v47 = vmul.f32 %v8668_v46, %v8664_v35 }
 0xa83   : > { %8105 = vmatmul.mubr.msk.f32.vlgmr.msra.gmra.mrb[6].mxu0 %vm1524_vm4, %v2204_v47 }
 0xa84   : > { %8113 = vmatpush3.xpose.msk.msra.mxu0 %vm1369_vm3, %v2362_v50  ;;  %8114 = vmatprep.mubr.msk.f32.mxu0 %vm9380_vm2, %v9379_v21 }
 0xa85   : > { %8122 = vmatprep.subr.mxu0 %v9379_v21 }
 0xaaa   : > { %v2202_v52 = vpop.xlane.xlu0 %2201 }
 0xaab   : > { %8669 = vrcp.f32 %v2202_v52 }
 0xaae   : > { %v2360_v53 = vpop.permute.xlu0 %2359 }
 0xaaf   : > { %8115 = vmatmul.mubr.msk.f32.vlgmr.msra.gmra.mrb[8].mxu0 %vm1369_vm3, %v2360_v53 }
 0xab0   : > { %8124 = vmatprep.mubr.msk.f32.mxu0 %vm9380_vm2, %v9379_v21 }
 0xab5   : > { %v8670_v54 = vpop.eup %8669 }
 0xab6   : > { %v2206_v58 = vmul.f32 %v8670_v54, %v8666_v42 }
 0xab8   : > { %8110 = vmatmul.mubr.msk.f32.vlgmr.msra.gmra.mrb[22].mxu1 %vm1524_vm4, %v2206_v58 }
 0xab9   : > { %8118 = vmatpush3.xpose.msk.msra.mxu1 %vm1369_vm3, %v2440_v56  ;;  %8119 = vmatprep.mubr.msk.f32.mxu1 %vm9380_vm2, %v9379_v21 }
 0xaba   : > { %8127 = vmatprep.subr.mxu1 %v9379_v21 }
 0xabc   : > { %8120 = vmatmul.mubr.msk.f32.vlgmr.msra.gmra.mrb[24].mxu1 %vm1369_vm3, %v2438_v59 }
 0xabd   : > { %8129 = vmatprep.mubr.msk.f32.mxu1 %vm9380_vm2, %v9379_v21 }
 0xb56   : > { %v10278_v62 = vpop.f32.mrb[6].mxu0 }
 0xb57   : > { %v8106_v0 = vpop.f32.mrb[7].mxu0 }
 0xb82   : > { %v2433_v2 = vpop.f32.mrb[8].mxu0 }
 0xb83   : > { %v2515_v3 = vmul.f32 0.25, %v2433_v2  ;;  %v8116_v5 = vpop.f32.mrb[9].mxu0 }
 0xb85   : > { %v2517_v6 = vsel %vm1524_vm4, %v2515_v3, -inf }
 0xb86   : > { %2518 = vmax.xlane.f32.xlu0 %v2517_v6 }
 0xb8b   : > { %v10281_v7 = vpop.f32.mrb[22].mxu1 }
 0xb8c   : > { %v8449_v8 = vpack.i.bf16 %v10281_v7, %v10278_v62  ;;  %v8111_v9 = vpop.f32.mrb[23].mxu1 }
 0xb8f   : > { %v2511_v10 = vpop.f32.mrb[24].mxu1 }
 0xb90   : > { %v2516_v11 = vmul.f32 0.25, %v2511_v10  ;;  %v8121_v12 = vpop.f32.mrb[25].mxu1 }
 0xb92   : > { %v2520_v13 = vsel %vm1524_vm4, %v2516_v11, -inf }
 0xb93   : > { %2521 = vmax.xlane.f32.xlu1 %v2520_v13 }
 0xba4   : > { %2615 = vrot.lane.b32.xlu1 %v10168_v4, %s9383_s13 }
 0xba8   : > { %2693 = vrot.lane.b32.xlu1 %v10140_v57, %s9384_s26 }
 0xbac   : > { %2771 = vrot.lane.b32.xlu1 %v10150_v61, %s9384_s26 }
 0xbb0   : > { %2769 = vrot.lane.b32.xlu1 %v10159_v63, %s9384_s26 }
 0xc13   : > { %v2519_v14 = vpop.xlane.xlu0 %2518 }
 0xc14   : > { %v2523_v15 = vsub.f32 %v2515_v3, %v2519_v14 }
 0xc16   : > { %v2525_v17 = vmul.f32 1.442695, %v2523_v15 }
 0xc18   : > { %8671 = vpow2.f32 %v2525_v17 }
 0xc20   : > { %v2522_v18 = vpop.xlane.xlu1 %2521 }
 0xc21   : > { %v2524_v26 = vsub.f32 %v2516_v11, %v2522_v18 }
 0xc22   : > { %v8672_v19 = vpop.eup %8671 }
 0xc23   : > { %v2529_v22 = vsel %vm1524_vm4, %v8672_v19, 0.0  ;;  %v2527_v27 = vmul.f32 1.442695, %v2524_v26 }
 0xc24   : > { %2530 = vadd.xlane.f32.xlu0 %v2529_v22  ;;  %v2616_v23 = vpop.permute.xlu1 %2615 }
 0xc25   : > { %8128 = vmatpush3.msra.mxu1 %v2616_v23  ;;  %8673 = vpow2.f32 %v2527_v27 }
 0xc26   : > { %8137 = vmatprep.subr.mxu1 %v9379_v21 }
 0xc28   : > { %v2694_v34 = vpop.permute.xlu1 %2693 }
 0xc2c   : > { %v2772_v40 = vpop.permute.xlu1 %2771 }
 0xc2f   : > { %v8674_v28 = vpop.eup %8673 }
 0xc30   : > { %v2532_v29 = vsel %vm1524_vm4, %v8674_v28, 0.0  ;;  %v2770_v42 = vpop.permute.xlu1 %2769 }
 0xc3a   : > { %2539 = vrot.lane.b32.xlu0 %v10164_v1, %s9383_s13 }
 0xc59   : > { %2533 = vadd.xlane.f32.xlu0 %v2532_v29 }
 0xc6f   : > { %2691 = vrot.lane.b32.xlu0 %v10138_v55, %s9384_s26 }
 0xcb1   : > { %v2531_v30 = vpop.xlane.xlu0 %2530 }
 0xcb2   : > { %8675 = vrcp.f32 %v2531_v30 }
 0xcb5   : > { %v2540_v31 = vpop.permute.xlu0 %2539 }
 0xcb6   : > { %8123 = vmatpush3.msra.mxu0 %v2540_v31 }
 0xcb7   : > { %8132 = vmatprep.subr.mxu0 %v9379_v21 }
 0xcbc   : > { %v8676_v32 = vpop.eup %8675 }
 0xcbd   : > { %v2536_v33 = vmul.f32 %v8676_v32, %v8672_v19 }
 0xcbf   : > { %8125 = vmatmul.mubr.msk.f32.vlgmr.msra.gmra.mrb[10].mxu0 %vm1524_vm4, %v2536_v33 }
 0xcc0   : > { %8133 = vmatpush3.xpose.msk.msra.mxu0 %vm1369_vm3, %v2694_v34  ;;  %8134 = vmatprep.mubr.msk.f32.mxu0 %vm9380_vm2, %v9379_v21 }
 0xcc1   : > { %8142 = vmatprep.subr.mxu0 %v9379_v21 }
 0xce6   : > { %v2534_v35 = vpop.xlane.xlu0 %2533 }
 0xce7   : > { %8677 = vrcp.f32 %v2534_v35 }
 0xcea   : > { %v2692_v37 = vpop.permute.xlu0 %2691 }
 0xceb   : > { %8135 = vmatmul.mubr.msk.f32.vlgmr.msra.gmra.mrb[12].mxu0 %vm1369_vm3, %v2692_v37 }
 0xcec   : > { %8144 = vmatprep.mubr.msk.f32.mxu0 %vm9380_vm2, %v9379_v21 }
 0xcf1   : > { %v8678_v39 = vpop.eup %8677 }
 0xcf2   : > { %v2538_v41 = vmul.f32 %v8678_v39, %v8674_v28 }
 0xcf4   : > { %8130 = vmatmul.mubr.msk.f32.vlgmr.msra.gmra.mrb[26].mxu1 %vm1524_vm4, %v2538_v41 }
 0xcf5   : > { %8138 = vmatpush3.xpose.msk.msra.mxu1 %vm1369_vm3, %v2772_v40  ;;  %8139 = vmatprep.mubr.msk.f32.mxu1 %vm9380_vm2, %v9379_v21 }
 0xcf6   : > { %8147 = vmatprep.subr.mxu1 %v9379_v21 }
 0xcf8   : > { %8140 = vmatmul.mubr.msk.f32.vlgmr.msra.gmra.mrb[28].mxu1 %vm1369_vm3, %v2770_v42 }
 0xcf9   : > { %8149 = vmatprep.mubr.msk.f32.mxu1 %vm9380_vm2, %v9379_v21 }
 0xd92   : > { %v10318_v43 = vpop.f32.mrb[10].mxu0 }
 0xd93   : > { %v8126_v44 = vpop.f32.mrb[11].mxu0 }
 0xdbe   : > { %v2765_v45 = vpop.f32.mrb[12].mxu0 }
 0xdbf   : > { %v2847_v46 = vmul.f32 0.25, %v2765_v45  ;;  %v8136_v47 = vpop.f32.mrb[13].mxu0 }
 0xdc1   : > { %v2849_v50 = vsel %vm1524_vm4, %v2847_v46, -inf }
 0xdc2   : > { %2850 = vmax.xlane.f32.xlu0 %v2849_v50 }
 0xdc7   : > { %v10321_v52 = vpop.f32.mrb[26].mxu1 }
 0xdc8   : > { %v8454_v53 = vpack.i.bf16 %v10321_v52, %v10318_v43  ;;  %v8131_v54 = vpop.f32.mrb[27].mxu1 }
 0xdcb   : > { %v2843_v56 = vpop.f32.mrb[28].mxu1 }
 0xdcc   : > { %v2848_v58 = vmul.f32 0.25, %v2843_v56  ;;  %v8141_v59 = vpop.f32.mrb[29].mxu1 }
 0xdce   : > { %v2852_v0 = vsel %vm1524_vm4, %v2848_v58, -inf }
 0xdcf   : > { %2853 = vmax.xlane.f32.xlu1 %v2852_v0 }
 0xde0   : > { %2947 = vrot.lane.b32.xlu1 %v10168_v4, %s9384_s26 }
 0xde4   : > { %3025 = vrot.lane.b32.xlu1 %v10140_v57, %s9385_s28 }
 0xde8   : > { %3103 = vrot.lane.b32.xlu1 %v10150_v61, %s9385_s28 }
 0xdec   : > { %3101 = vrot.lane.b32.xlu1 %v10159_v63, %s9385_s28 }
 0xe4f   : > { %v2851_v2 = vpop.xlane.xlu0 %2850 }
 0xe50   : > { %v2855_v3 = vsub.f32 %v2847_v46, %v2851_v2 }
 0xe52   : > { %v2857_v5 = vmul.f32 1.442695, %v2855_v3 }
 0xe54   : > { %8679 = vpow2.f32 %v2857_v5 }
 0xe5c   : > { %v2854_v6 = vpop.xlane.xlu1 %2853 }
 0xe5d   : > { %v2856_v12 = vsub.f32 %v2848_v58, %v2854_v6 }
 0xe5e   : > { %v8680_v9 = vpop.eup %8679 }
 0xe5f   : > { %v2861_v10 = vsel %vm1524_vm4, %v8680_v9, 0.0  ;;  %v2859_v13 = vmul.f32 1.442695, %v2856_v12 }
 0xe60   : > { %2862 = vadd.xlane.f32.xlu0 %v2861_v10  ;;  %v2948_v11 = vpop.permute.xlu1 %2947 }
 0xe61   : > { %8148 = vmatpush3.msra.mxu1 %v2948_v11  ;;  %8681 = vpow2.f32 %v2859_v13 }
 0xe62   : > { %8157 = vmatprep.subr.mxu1 %v9379_v21 }
 0xe64   : > { %v3026_v23 = vpop.permute.xlu1 %3025 }
 0xe68   : > { %v3104_v29 = vpop.permute.xlu1 %3103 }
 0xe6b   : > { %v8682_v14 = vpop.eup %8681 }
 0xe6c   : > { %v2864_v15 = vsel %vm1524_vm4, %v8682_v14, 0.0  ;;  %v3102_v31 = vpop.permute.xlu1 %3101 }
 0xe76   : > { %2871 = vrot.lane.b32.xlu0 %v10164_v1, %s9384_s26 }
 0xe95   : > { %2865 = vadd.xlane.f32.xlu0 %v2864_v15 }
 0xeab   : > { %3023 = vrot.lane.b32.xlu0 %v10138_v55, %s9385_s28 }
 0xeed   : > { %v2863_v17 = vpop.xlane.xlu0 %2862 }
 0xeee   : > { %8683 = vrcp.f32 %v2863_v17 }
 0xef1   : > { %v2872_v18 = vpop.permute.xlu0 %2871 }
 0xef2   : > { %8143 = vmatpush3.msra.mxu0 %v2872_v18 }
 0xef3   : > { %8152 = vmatprep.subr.mxu0 %v9379_v21 }
 0xef8   : > { %v8684_v19 = vpop.eup %8683 }
 0xef9   : > { %v2868_v22 = vmul.f32 %v8684_v19, %v8680_v9 }
 0xefb   : > { %8145 = vmatmul.mubr.msk.f32.vlgmr.msra.gmra.mrb[14].mxu0 %vm1524_vm4, %v2868_v22 }
 0xefc   : > { %8153 = vmatpush3.xpose.msk.msra.mxu0 %vm1369_vm3, %v3026_v23  ;;  %8154 = vmatprep.mubr.msk.f32.mxu0 %vm9380_vm2, %v9379_v21 }
 0xefd   : > { %8162 = vmatprep.subr.mxu0 %v9379_v21 }
 0xf22   : > { %v2866_v26 = vpop.xlane.xlu0 %2865 }
 0xf23   : > { %8685 = vrcp.f32 %v2866_v26 }
 0xf26   : > { %v3024_v27 = vpop.permute.xlu0 %3023 }
 0xf27   : > { %8155 = vmatmul.mubr.msk.f32.vlgmr.msra.gmra.mrb[16].mxu0 %vm1369_vm3, %v3024_v27 }
 0xf28   : > { %8164 = vmatprep.mubr.msk.f32.mxu0 %vm9380_vm2, %v9379_v21 }
 0xf2d   : > { %v8686_v28 = vpop.eup %8685 }
 0xf2e   : > { %v2870_v30 = vmul.f32 %v8686_v28, %v8682_v14 }
 0xf30   : > { %8150 = vmatmul.mubr.msk.f32.vlgmr.msra.gmra.mrb[30].mxu1 %vm1524_vm4, %v2870_v30 }
 0xf31   : > { %8158 = vmatpush3.xpose.msk.msra.mxu1 %vm1369_vm3, %v3104_v29  ;;  %8159 = vmatprep.mubr.msk.f32.mxu1 %vm9380_vm2, %v9379_v21 }
 0xf32   : > { %8167 = vmatprep.subr.mxu1 %v9379_v21 }
 0xf34   : > { %8160 = vmatmul.mubr.msk.f32.vlgmr.msra.gmra.mrb[32].mxu1 %vm1369_vm3, %v3102_v31 }
 0xf35   : > { %8169 = vmatprep.mubr.msk.f32.mxu1 %vm9380_vm2, %v9379_v21 }
 0xfce   : > { %v10358_v32 = vpop.f32.mrb[14].mxu0 }
 0xfcf   : > { %v8146_v33 = vpop.f32.mrb[15].mxu0 }
 0xffa   : > { %v3097_v34 = vpop.f32.mrb[16].mxu0 }
 0xffb   : > { %v3179_v35 = vmul.f32 0.25, %v3097_v34  ;;  %v8156_v37 = vpop.f32.mrb[17].mxu0 }
 0xffd   : > { %v3181_v39 = vsel %vm1524_vm4, %v3179_v35, -inf }
 0xffe   : > { %3182 = vmax.xlane.f32.xlu0 %v3181_v39 }
0x1003   : > { %v10361_v40 = vpop.f32.mrb[30].mxu1 }
0x1004   : > { %v8459_v41 = vpack.i.bf16 %v10361_v40, %v10358_v32  ;;  %v8151_v42 = vpop.f32.mrb[31].mxu1 }
0x1007   : > { %v3175_v44 = vpop.f32.mrb[32].mxu1 }
0x1008   : > { %v3180_v45 = vmul.f32 0.25, %v3175_v44  ;;  %v8161_v46 = vpop.f32.mrb[33].mxu1 }
0x100a   : > { %v3184_v47 = vsel %vm1524_vm4, %v3180_v45, -inf }
0x100b   : > { %3185 = vmax.xlane.f32.xlu1 %v3184_v47 }
0x101c   : > { %3279 = vrot.lane.b32.xlu1 %v10168_v4, %s9385_s28 }
0x1020   : > { %3357 = vrot.lane.b32.xlu1 %v10140_v57, %s9386_s16 }
0x1024   : > { %3435 = vrot.lane.b32.xlu1 %v10150_v61, %s9386_s16 }
0x1028   : > { %3433 = vrot.lane.b32.xlu1 %v10159_v63, %s9386_s16 }
0x108b   : > { %v3183_v50 = vpop.xlane.xlu0 %3182 }
0x108c   : > { %v3187_v54 = vsub.f32 %v3179_v35, %v3183_v50 }
0x108e   : > { %v3189_v56 = vmul.f32 1.442695, %v3187_v54 }
0x1090   : > { %8687 = vpow2.f32 %v3189_v56 }
0x1098   : > { %v3186_v58 = vpop.xlane.xlu1 %3185 }
0x1099   : > { %v3188_v3 = vsub.f32 %v3180_v45, %v3186_v58 }
0x109a   : > { %v8688_v59 = vpop.eup %8687 }
0x109b   : > { %v3193_v0 = vsel %vm1524_vm4, %v8688_v59, 0.0  ;;  %v3191_v5 = vmul.f32 1.442695, %v3188_v3 }
0x109c   : > { %3194 = vadd.xlane.f32.xlu0 %v3193_v0  ;;  %v3280_v2 = vpop.permute.xlu1 %3279 }
0x109d   : > { %8168 = vmatpush3.msra.mxu1 %v3280_v2  ;;  %8689 = vpow2.f32 %v3191_v5 }
0x109e   : > { %8177 = vmatprep.subr.mxu1 %v9379_v21 }
0x10a0   : > { %v3358_v14 = vpop.permute.xlu1 %3357 }
0x10a4   : > { %v3436_v19 = vpop.permute.xlu1 %3435 }
0x10a7   : > { %v8690_v6 = vpop.eup %8689 }
0x10a8   : > { %v3196_v9 = vsel %vm1524_vm4, %v8690_v6, 0.0  ;;  %v3434_v23 = vpop.permute.xlu1 %3433 }
0x10b2   : > { %3203 = vrot.lane.b32.xlu0 %v10164_v1, %s9385_s28 }
0x10d1   : > { %3197 = vadd.xlane.f32.xlu0 %v3196_v9 }
0x10e7   : > { %3355 = vrot.lane.b32.xlu0 %v10138_v55, %s9386_s16 }
0x1129   : > { %v3195_v10 = vpop.xlane.xlu0 %3194 }
0x112a   : > { %8691 = vrcp.f32 %v3195_v10 }
0x112d   : > { %v3204_v11 = vpop.permute.xlu0 %3203 }
0x112e   : > { %8163 = vmatpush3.msra.mxu0 %v3204_v11 }
0x112f   : > { %8172 = vmatprep.subr.mxu0 %v9379_v21 }
0x1134   : > { %v8692_v12 = vpop.eup %8691 }
0x1135   : > { %v3200_v13 = vmul.f32 %v8692_v12, %v8688_v59 }
0x1137   : > { %8165 = vmatmul.mubr.msk.f32.vlgmr.msra.gmra.mrb[18].mxu0 %vm1524_vm4, %v3200_v13 }
0x1138   : > { %8173 = vmatpush3.xpose.msk.msra.mxu0 %vm1369_vm3, %v3358_v14  ;;  %8174 = vmatprep.mubr.msk.f32.mxu0 %vm9380_vm2, %v9379_v21 }
0x1139   : > { %8182 = vmatprep.subr.mxu0 %v9379_v21 }
0x115e   : > { %v3198_v15 = vpop.xlane.xlu0 %3197 }
0x115f   : > { %8693 = vrcp.f32 %v3198_v15 }
0x1162   : > { %v3356_v17 = vpop.permute.xlu0 %3355 }
0x1163   : > { %8175 = vmatmul.mubr.msk.f32.vlgmr.msra.gmra.mrb[20].mxu0 %vm1369_vm3, %v3356_v17 }
0x1164   : > { %8184 = vmatprep.mubr.msk.f32.mxu0 %vm9380_vm2, %v9379_v21 }
0x1169   : > { %v8694_v18 = vpop.eup %8693 }
0x116a   : > { %v3202_v22 = vmul.f32 %v8694_v18, %v8690_v6 }
0x116c   : > { %8170 = vmatmul.mubr.msk.f32.vlgmr.msra.gmra.mrb[34].mxu1 %vm1524_vm4, %v3202_v22 }
0x116d   : > { %8178 = vmatpush3.xpose.msk.msra.mxu1 %vm1369_vm3, %v3436_v19  ;;  %8179 = vmatprep.mubr.msk.f32.mxu1 %vm9380_vm2, %v9379_v21 }
0x116e   : > { %8187 = vmatprep.subr.mxu1 %v9379_v21 }
0x1170   : > { %8180 = vmatmul.mubr.msk.f32.vlgmr.msra.gmra.mrb[36].mxu1 %vm1369_vm3, %v3434_v23 }
0x1171   : > { %8189 = vmatprep.mubr.msk.f32.mxu1 %vm9380_vm2, %v9379_v21 }
0x120a   : > { %v10398_v26 = vpop.f32.mrb[18].mxu0 }
0x120b   : > { %v8166_v27 = vpop.f32.mrb[19].mxu0 }
0x1236   : > { %v3429_v28 = vpop.f32.mrb[20].mxu0 }
0x1237   : > { %v3511_v29 = vmul.f32 0.25, %v3429_v28  ;;  %v8176_v30 = vpop.f32.mrb[21].mxu0 }
0x1239   : > { %v3513_v31 = vsel %vm1524_vm4, %v3511_v29, -inf }
0x123a   : > { %3514 = vmax.xlane.f32.xlu0 %v3513_v31 }
0x123f   : > { %v10401_v33 = vpop.f32.mrb[34].mxu1 }
0x1240   : > { %v8464_v34 = vpack.i.bf16 %v10401_v33, %v10398_v26  ;;  %v8171_v35 = vpop.f32.mrb[35].mxu1  ;;  %v8512_v26 = vld [vmem:[%s10062_s8 + $0x8] sm:$0xff]   ;;  %v8513_v33 = vld [vmem:[%s10062_s8 + $0x10] sm:$0xff]  }
0x1243   : > { %v3507_v37 = vpop.f32.mrb[36].mxu1 }
0x1244   : > { %v3512_v39 = vmul.f32 0.25, %v3507_v37  ;;  %v8181_v42 = vpop.f32.mrb[37].mxu1 }
0x1246   : > { %v3516_v44 = vsel %vm1524_vm4, %v3512_v39, -inf }
0x1247   : > { %3517 = vmax.xlane.f32.xlu1 %v3516_v44 }
0x1258   : > { %3611 = vrot.lane.b32.xlu1 %v10168_v4, %s9386_s16 }
0x125c   : > { %3689 = vrot.lane.b32.xlu1 %v10140_v57, %s9387_s19 }
0x1260   : > { %3767 = vrot.lane.b32.xlu1 %v10150_v61, %s9387_s19 }
0x1264   : > { %3765 = vrot.lane.b32.xlu1 %v10159_v63, %s9387_s19 }
0x12c7   : > { %v3515_v45 = vpop.xlane.xlu0 %3514 }
0x12c8   : > { %v3519_v46 = vsub.f32 %v3511_v29, %v3515_v45 }
0x12ca   : > { %v3521_v47 = vmul.f32 1.442695, %v3519_v46  ;;  %v8515_v46 = vld [vmem:[%s10062_s8 + $0x20] sm:$0xff]  }
0x12cc   : > { %8695 = vpow2.f32 %v3521_v47  ;;  %v8516_v47 = vld [vmem:[%s10062_s8 + $0x28] sm:$0xff]  }
0x12d4   : > { %v3518_v50 = vpop.xlane.xlu1 %3517 }
0x12d5   : > { %v3520_v57 = vsub.f32 %v3512_v39, %v3518_v50  ;;  %v8517_v50 = vld [vmem:[%s10062_s8 + $0x30] sm:$0xff]  }
0x12d6   : > { %v8696_v54 = vpop.eup %8695 }
0x12d7   : > { %v3525_v56 = vsel %vm1524_vm4, %v8696_v54, 0.0  ;;  %v3523_v61 = vmul.f32 1.442695, %v3520_v57 }
0x12d8   : > { %3526 = vadd.xlane.f32.xlu0 %v3525_v56  ;;  %v3612_v58 = vpop.permute.xlu1 %3611 }
0x12d9   : > { %8188 = vmatpush3.msra.mxu1 %v3612_v58  ;;  %8697 = vpow2.f32 %v3523_v61 }
0x12da   : > { %8197 = vmatprep.subr.mxu1 %v9379_v21 }
0x12dc   : > { %v3690_v6 = vpop.permute.xlu1 %3689 }
0x12e0   : > { %v3768_v11 = vpop.permute.xlu1 %3767 }
0x12e3   : > { %v8698_v63 = vpop.eup %8697 }
0x12e4   : > { %v3528_v59 = vsel %vm1524_vm4, %v8698_v63, 0.0  ;;  %v3766_v13 = vpop.permute.xlu1 %3765 }
0x12ee   : > { %3535 = vrot.lane.b32.xlu0 %v10164_v1, %s9386_s16 }
0x130d   : > { %3529 = vadd.xlane.f32.xlu0 %v3528_v59 }
0x1323   : > { %3687 = vrot.lane.b32.xlu0 %v10138_v55, %s9387_s19 }
0x1365   : > { %v3527_v0 = vpop.xlane.xlu0 %3526 }
0x1366   : > { %8699 = vrcp.f32 %v3527_v0 }
0x1369   : > { %v3536_v2 = vpop.permute.xlu0 %3535 }
0x136a   : > { %8183 = vmatpush3.msra.mxu0 %v3536_v2 }
0x136b   : > { %8192 = vmatprep.subr.mxu0 %v9379_v21 }
0x1370   : > { %v8700_v3 = vpop.eup %8699 }
0x1371   : > { %v3532_v5 = vmul.f32 %v8700_v3, %v8696_v54  ;;  %v8518_v54 = vld [vmem:[%s10062_s8 + $0x38] sm:$0xff]  }
0x1373   : > { %8185 = vmatmul.mubr.msk.f32.vlgmr.msra.gmra.mrb[22].mxu0 %vm1524_vm4, %v3532_v5 }
0x1374   : > { %8193 = vmatpush3.xpose.msk.msra.mxu0 %vm1369_vm3, %v3690_v6  ;;  %8194 = vmatprep.mubr.msk.f32.mxu0 %vm9380_vm2, %v9379_v21 }
0x1375   : > { %8202 = vmatprep.subr.mxu0 %v9379_v21 }
0x139a   : > { %v3530_v9 = vpop.xlane.xlu0 %3529 }
0x139b   : > { %8701 = vrcp.f32 %v3530_v9 }
0x139e   : > { %v3688_v55 = vpop.permute.xlu0 %3687 }
0x139f   : > { %8195 = vmatmul.mubr.msk.f32.vlgmr.msra.gmra.mrb[24].mxu0 %vm1369_vm3, %v3688_v55 }
0x13a0   : > { %8204 = vmatprep.mubr.msk.f32.mxu0 %vm9380_vm2, %v9379_v21 }
0x13a5   : > { %v8702_v10 = vpop.eup %8701 }
0x13a6   : > { %v3534_v12 = vmul.f32 %v8702_v10, %v8698_v63 }
0x13a8   : > { %8190 = vmatmul.mubr.msk.f32.vlgmr.msra.gmra.mrb[38].mxu1 %vm1524_vm4, %v3534_v12 }
0x13a9   : > { %8198 = vmatpush3.xpose.msk.msra.mxu1 %vm1369_vm3, %v3768_v11  ;;  %8199 = vmatprep.mubr.msk.f32.mxu1 %vm9380_vm2, %v9379_v21 }
0x13aa   : > { %8207 = vmatprep.subr.mxu1 %v9379_v21 }
0x13ac   : > { %8200 = vmatmul.mubr.msk.f32.vlgmr.msra.gmra.mrb[40].mxu1 %vm1369_vm3, %v3766_v13 }
0x13ad   : > { %8209 = vmatprep.mubr.msk.f32.mxu1 %vm9380_vm2, %v9379_v21 }
0x1446   : > { %v3607_v14 = vpop.f32.mrb[22].mxu0 }
0x1447   : > { %v8186_v15 = vpop.f32.mrb[23].mxu0 }
0x1472   : > { %v3761_v17 = vpop.f32.mrb[24].mxu0 }
0x1473   : > { %v3843_v18 = vmul.f32 0.25, %v3761_v17  ;;  %v8196_v19 = vpop.f32.mrb[25].mxu0 }
0x1475   : > { %v3845_v22 = vsel %vm1524_vm4, %v3843_v18, -inf }
0x1476   : > { %3846 = vmax.xlane.f32.xlu0 %v3845_v22 }
0x147b   : > { %v3683_v23 = vpop.f32.mrb[38].mxu1 }
0x147c   : > { %v8469_v27 = vpack.i.bf16 %v3683_v23, %v3607_v14  ;;  %v8191_v28 = vpop.f32.mrb[39].mxu1 }
0x147f   : > { %v3839_v29 = vpop.f32.mrb[40].mxu1 }
0x1480   : > { %v3844_v30 = vmul.f32 0.25, %v3839_v29  ;;  %v8201_v31 = vpop.f32.mrb[41].mxu1 }
0x1482   : > { %v3848_v35 = vsel %vm1524_vm4, %v3844_v30, -inf }
0x1483   : > { %3849 = vmax.xlane.f32.xlu1 %v3848_v35 }
0x1494   : > { %3943 = vrot.lane.b32.xlu1 %v10168_v4, %s9387_s19 }
0x1498   : > { %8445 = vrot.lane.b32.xlu1 %v8444_v25, %s9387_s19 }
0x149c   : > { %8450 = vrot.lane.b32.xlu1 %v8449_v8, %s9386_s16 }
0x14a0   : > { %8460 = vrot.lane.b32.xlu1 %v8459_v41, %s9384_s26 }
0x14a4   : > { %8470 = vrot.lane.b32.xlu1 %v8469_v27, %s9382_s14 }
0x1503   : > { %v3847_v37 = vpop.xlane.xlu0 %3846 }
0x1504   : > { %v3851_v39 = vsub.f32 %v3843_v18, %v3847_v37 }
0x1506   : > { %v3853_v4 = vmul.f32 1.442695, %v3851_v39 }
0x1508   : > { %8703 = vpow2.f32 %v3853_v4 }
0x1510   : > { %v3850_v42 = vpop.xlane.xlu1 %3849 }
0x1511   : > { %v3852_v44 = vsub.f32 %v3844_v30, %v3850_v42 }
0x1512   : > { %v8704_v16 = vpop.eup %8703 }
0x1513   : > { %v3855_v24 = vmul.f32 1.442695, %v3852_v44  ;;  %v3857_v25 = vsel %vm1524_vm4, %v8704_v16, 0.0 }
0x1514   : > { %3858 = vadd.xlane.f32.xlu0 %v3857_v25  ;;  %v3944_v62 = vpop.permute.xlu1 %3943 }
0x1515   : > { %8705 = vpow2.f32 %v3855_v24  ;;  %8208 = vmatpush3.msra.mxu1 %v3944_v62  ;;  %v7469_v62 = vld [vmem:[%s857_s27] ss:$0 sm:$0xff] }
0x1518   : > { %v8446_v59 = vpop.permute.xlu1 %8445 }
0x1519   : > { %v8448_v3 = vunpack.i.h.bf16 %v8446_v59  ;;  %v8447_v5 = vunpack.i.l.bf16 %v8446_v59  ;;  %v4277_v59 = vld [vmem:[%s10067_s5 + $0xc8] sm:$0xff] }
0x151b   : > { %v4076_v12 = vsel %vm1369_vm3, %v10202_v38, %v8448_v3  ;;  %v4075_v13 = vsel %vm1369_vm3, %v10200_v36, %v8447_v5 }
0x151c   : > { %v8451_v0 = vpop.permute.xlu1 %8450 }
0x151d   : > { %v8453_v6 = vunpack.i.h.bf16 %v8451_v0  ;;  %v8452_v9 = vunpack.i.l.bf16 %v8451_v0 }
0x151f   : > { %v8706_v7 = vpop.eup %8705  ;;  %v4078_v14 = vsel %vm4077_vm5, %v4075_v13, %v8452_v9  ;;  %v4079_v15 = vsel %vm4077_vm5, %v4076_v12, %v8453_v6  ;;  %v4284_v13 = vld [vmem:[%s10067_s5 + $0x100] sm:$0xff] }
0x1520   : > { %v3860_v8 = vsel %vm1524_vm4, %v8706_v7, 0.0  ;;  %v8461_v55 = vpop.permute.xlu1 %8460 }
0x1521   : > { %3861 = vadd.xlane.f32.xlu0 %v3860_v8  ;;  %v8463_v23 = vunpack.i.h.bf16 %v8461_v55  ;;  %v8462_v27 = vunpack.i.l.bf16 %v8461_v55 }
0x1524   : > { %v8471_v28 = vpop.permute.xlu1 %8470 }
0x1525   : > { %v8473_v38 = vunpack.i.h.bf16 %v8471_v28  ;;  %v8472_v37 = vunpack.i.l.bf16 %v8471_v28  ;;  %v4308_v28 = vld [vmem:[%s10067_s5 + $0x1c0] sm:$0xff] }
0x1537   : > { %3867 = vrot.lane.b32.xlu0 %v10164_v1, %s9387_s19 }
0x153b   : > { %8455 = vrot.lane.b32.xlu0 %v8454_v53, %s9385_s28  ;;  %v8511_v53 = vld [vmem:[%s10062_s8] sm:$0xff]  }
0x153f   : > { %8465 = vrot.lane.b32.xlu0 %v8464_v34, %s9383_s13  ;;  %v8514_v34 = vld [vmem:[%s10062_s8 + $0x18] sm:$0xff]  }
0x15a1   : > { %v3859_v32 = vpop.xlane.xlu0 %3858 }
0x15a2   : > { %8707 = vrcp.f32 %v3859_v32 }
0x15ac   : > { %v8708_v41 = vpop.eup %8707 }
0x15ad   : > { %v3864_v45 = vmul.f32 %v8708_v41, %v8704_v16 }
0x15ae   : > { %v3862_v40 = vpop.xlane.xlu0 %3861 }
0x15af   : > { %8709 = vrcp.f32 %v3862_v40 }
0x15b2   : > { %v3868_v1 = vpop.permute.xlu0 %3867 }
0x15b3   : > { %8203 = vmatpush3.msra.mxu0 %v3868_v1  ;;  %v8719_v1 = vld [vmem:[#allocation2] sm:$0xff] }
0x15b4   : > { %8205 = vmatmul.mubr.msk.f32.vlgmr.msra.gmra.mrb[26].mxu0 %vm1524_vm4, %v3864_v45  ;;  %8212 = vmatprep.subr.bf16.mxu0 %v9379_v21 }
0x15b5   : > { %8228 = vmatprep.mubr.msk.bf16.mxu0 %vm9380_vm2, %v9379_v21  ;;  %8213 = vmatpush3.bf16.msra.mxu0 %v8511_v53 }
0x15b6   : > { %8214 = vmatprep.subr.bf16.mxu0 %v9379_v21  ;;  %v8456_v2 = vpop.permute.xlu0 %8455 }
0x15b7   : > { %v8458_v10 = vunpack.i.h.bf16 %v8456_v2 }
0x15b9   : > { %v8710_v43 = vpop.eup %8709  ;;  %8215 = vmatpush3.bf16.msra.mxu0 %v8512_v26  ;;  %v4082_v18 = vsel %vm4080_vm6, %v4079_v15, %v8458_v10  ;;  %v4252_v26 = vld [vmem:[%s10067_s5] sm:$0xff]  ;;  %v4285_v15 = vld [vmem:[%s10067_s5 + $0x108] sm:$0xff] }
0x15ba   : > { %v3866_v52 = vmul.f32 %v8710_v43, %v8706_v7  ;;  %8216 = vmatprep.subr.bf16.mxu0 %v9379_v21  ;;  %v8466_v11 = vpop.permute.xlu0 %8465  ;;  %v4085_v30 = vsel %vm4083_vm7, %v4082_v18, %v8463_v23  ;;  %v4293_v18 = vld [vmem:[%s10067_s5 + $0x148] sm:$0xff] }
0x15bb   : > { %v8468_v19 = vunpack.i.h.bf16 %v8466_v11  ;;  %v8467_v22 = vunpack.i.l.bf16 %v8466_v11  ;;  %v7515_v23 = vcombine.high %v4285_v15, %v4293_v18 }
0x15bc   : > { %8210 = vmatmul.mubr.msk.f32.vlgmr.msra.gmra.mrb[42].mxu1 %vm1524_vm4, %v3866_v52  ;;  %v8720_v52 = vld [vmem:[#allocation2 + $0x8] sm:$0xff] }
0x15bd   : > { %5136 = vmatprep.mubr.bf16.mxu1 %v9378_v20  ;;  %8217 = vmatpush3.bf16.msra.mxu0 %v8513_v33  ;;  %v4088_v35 = vsel %vm4086_vm8, %v4085_v30, %v8468_v19  ;;  %v4260_v33 = vld [vmem:[%s10067_s5 + $0x40] sm:$0xff] }
0x15be   : > { %8218 = vmatprep.subr.bf16.mxu0 %v9379_v21  ;;  %v4091_v44 = vsel %vm4089_vm9, %v4088_v35, %v8473_v38 }
0x15c1   : > { %8219 = vmatpush3.bf16.msra.mxu0 %v8514_v34  ;;  %v4253_v34 = vld [vmem:[%s10067_s5 + $0x8] sm:$0xff] }
0x15c2   : > { %8220 = vmatprep.subr.bf16.mxu0 %v9379_v21 }
0x15c5   : > { %8221 = vmatpush3.bf16.msra.mxu0 %v8515_v46  ;;  %v7480_v46 = vcombine.low %v4252_v26, %v4260_v33 }
0x15c6   : > { %8222 = vmatprep.subr.bf16.mxu0 %v9379_v21 }
0x15c9   : > { %8223 = vmatpush3.bf16.msra.mxu0 %v8516_v47  ;;  %v7481_v47 = vcombine.high %v4252_v26, %v4260_v33  ;;  %v4357_v33 = vld [vmem:[%s10067_s5 + $0x348] sm:$0xff] }
0x15ca   : > { %8224 = vmatprep.subr.bf16.mxu0 %v9379_v21 }
0x15cb   : > { %5104 = vmatprep.subr.bf16.mxu1 %v7481_v47 }
0x15cc   : > { %5105 = vmatpush1.bf16.msra.mxu1 %v7480_v46 }
0x15cd   : > { %8225 = vmatpush3.bf16.msra.mxu0 %v8517_v50  ;;  %v4261_v50 = vld [vmem:[%s10067_s5 + $0x48] sm:$0xff] }
0x15ce   : > { %8226 = vmatprep.subr.bf16.mxu0 %v9379_v21  ;;  %v8457_v21 = vunpack.i.l.bf16 %v8456_v2 }
0x15d0   : > { %v4081_v17 = vsel %vm4080_vm6, %v4078_v14, %v8457_v21  ;;  %v4292_v14 = vld [vmem:[%s10067_s5 + $0x140] sm:$0xff] }
0x15d1   : > { %8227 = vmatpush3.bf16.msra.mxu0 %v8518_v54  ;;  %v4084_v29 = vsel %vm4083_vm7, %v4081_v17, %v8462_v27  ;;  %v4268_v54 = vld [vmem:[%s10067_s5 + $0x80] sm:$0xff]  ;;  %v7513_v17 = vcombine.high %v4284_v13, %v4292_v14  ;;  %v7512_v19 = vcombine.low %v4284_v13, %v4292_v14 }
0x15d2   : > { %v4087_v31 = vsel %vm4086_vm8, %v4084_v29, %v8467_v22  ;;  %v7514_v22 = vcombine.low %v4285_v15, %v4293_v18  ;;  %v4300_v27 = vld [vmem:[%s10067_s5 + $0x180] sm:$0xff]  ;;  %v4301_v29 = vld [vmem:[%s10067_s5 + $0x188] sm:$0xff] }
0x15d3   : > { %v4090_v42 = vsel %vm4089_vm9, %v4087_v31, %v8472_v37  ;;  %v7529_v30 = vcombine.high %v4300_v27, %v4308_v28  ;;  %v4309_v31 = vld [vmem:[%s10067_s5 + $0x1c8] sm:$0xff]  ;;  %v7528_v35 = vcombine.low %v4300_v27, %v4308_v28 }
0x15d4   : > { %v7530_v38 = vcombine.low %v4301_v29, %v4309_v31  ;;  %v7531_v37 = vcombine.high %v4301_v29, %v4309_v31 }
0x1687   : > { %v3939_v56 = vpop.f32.mrb[26].mxu0 }
0x1688   : > { %v8206_v58 = vpop.f32.mrb[27].mxu0 }
0x1689   : > { %v7482_v58 = vcombine.low %v4253_v34, %v4261_v50 }
0x168f   : > { %v4015_v57 = vpop.f32.mrb[42].mxu1 }
0x1690   : > { %v8474_v61 = vpack.i.bf16 %v4015_v57, %v3939_v56  ;;  %v8211_v63 = vpop.f32.mrb[43].mxu1  ;;  %v4276_v56 = vld [vmem:[%s10067_s5 + $0xc0] sm:$0xff]  ;;  %v7483_v57 = vcombine.high %v4253_v34, %v4261_v50 }
0x1691   : > { %v4269_v63 = vld [vmem:[%s10067_s5 + $0x88] sm:$0xff]  ;;  %v7496_v2 = vcombine.low %v4268_v54, %v4276_v56  ;;  %v4364_v50 = vld [vmem:[%s10067_s5 + $0x380] sm:$0xff] }
0x1692   : > { %8475 = vrot.lane.b32.xlu0 %v8474_v61, %s9381_s25  ;;  %v7497_v61 = vcombine.high %v4268_v54, %v4276_v56  ;;  %v7499_v0 = vcombine.high %v4269_v63, %v4277_v59  ;;  %5147 = vmatprep.subr.bf16.mxu0 %v7483_v57  ;;  %v7498_v3 = vcombine.low %v4269_v63, %v4277_v59  ;;  %v4372_v54 = vld [vmem:[%s10067_s5 + $0x3c0] sm:$0xff]  ;;  %v4365_v56 = vld [vmem:[%s10067_s5 + $0x388] sm:$0xff] }
0x1693   : > { %v4373_v57 = vld [vmem:[%s10067_s5 + $0x3c8] sm:$0xff] }
0x1694   : > { %5106 = vmatprep.subr.bf16.mxu1 %v7497_v61  ;;  %v7592_v61 = vcombine.low %v4364_v50, %v4372_v54  ;;  %v7594_v63 = vcombine.low %v4365_v56, %v4373_v57  ;;  %v7595_v59 = vcombine.high %v4365_v56, %v4373_v57  ;;  %v4334_v57 = vld [vmem:[%s10067_s5 + $0x290] sm:$0xff] }
0x1695   : > { %5107 = vmatpush1.bf16.msra.mxu1 %v7496_v2  ;;  %v4262_v2 = vld [vmem:[%s10067_s5 + $0x50] sm:$0xff] }
0x1696   : > { %5108 = vmatprep.subr.bf16.mxu1 %v7513_v17 }
0x1699   : > { %5109 = vmatpush1.bf16.msra.mxu1 %v7512_v19 }
0x169a   : > { %5110 = vmatprep.subr.bf16.mxu1 %v7529_v30  ;;  %v7479_v30 = vld [vmem:[%s873_s4] ss:$0 sm:$0xff] }
0x169d   : > { %5111 = vmatpush1.bf16.msra.mxu1 %v7528_v35  ;;  %v4270_v35 = vld [vmem:[%s10067_s5 + $0x90] sm:$0xff] }
0x1704   : > { %v8476_v36 = vpop.permute.xlu0 %8475 }
0x1705   : > { %v8478_v39 = vunpack.i.h.bf16 %v8476_v36  ;;  %v8477_v4 = vunpack.i.l.bf16 %v8476_v36  ;;  %v4316_v36 = vld [vmem:[%s10067_s5 + $0x200] sm:$0xff] }
0x1707   : > { %v4094_v16 = vsel %vm4092_vm10, %v4091_v44, %v8478_v39  ;;  %v4093_v24 = vsel %vm4092_vm10, %v4090_v42, %v8477_v4  ;;  %v4324_v39 = vld [vmem:[%s10067_s5 + $0x240] sm:$0xff]  ;;  %v4317_v4 = vld [vmem:[%s10067_s5 + $0x208] sm:$0xff] }
0x1708   : > { %v4095_v25 = vpack.c.bf16 %v4094_v16, %v4093_v24  ;;  %v7545_v42 = vcombine.high %v4316_v36, %v4324_v39  ;;  %v4325_v44 = vld [vmem:[%s10067_s5 + $0x248] sm:$0xff]  ;;  %v7544_v16 = vcombine.low %v4316_v36, %v4324_v39  ;;  %v4279_v36 = vld [vmem:[%s10067_s5 + $0xd8] sm:$0xff] }
0x1709   : > { %v7546_v24 = vcombine.low %v4317_v4, %v4325_v44 }
0x170a   : > { %8229 = vmatmul.mubr.bf16.vlgmr.msra.gmra.mrb[28].mxu0 %v4095_v25  ;;  %v7547_v25 = vcombine.high %v4317_v4, %v4325_v44  ;;  %5112 = vmatprep.subr.bf16.mxu1 %v7545_v42 }
0x170b   : > { %5179 = vmatprep.mubr.bf16.mxu0 %v9378_v20  ;;  %5148 = vmatpush1.bf16.msra.mxu0 %v7482_v58  ;;  %v7593_v58 = vcombine.high %v4364_v50, %v4372_v54 }
0x170c   : > { %5149 = vmatprep.subr.bf16.mxu0 %v7499_v0  ;;  %5113 = vmatpush1.bf16.msra.mxu1 %v7544_v16  ;;  %v4254_v0 = vld [vmem:[%s10067_s5 + $0x10] sm:$0xff] }
0x170d   : > { %v4294_v16 = vld [vmem:[%s10067_s5 + $0x150] sm:$0xff] }
0x170f   : > { %5150 = vmatpush1.bf16.msra.mxu0 %v7498_v3  ;;  %v4255_v3 = vld [vmem:[%s10067_s5 + $0x18] sm:$0xff] }
0x1710   : > { %5151 = vmatprep.subr.bf16.mxu0 %v7515_v23  ;;  %v7478_v23 = vld [vmem:[%s865_s1] ss:$0 sm:$0xff] }
0x1713   : > { %5152 = vmatpush1.bf16.msra.mxu0 %v7514_v22 }
0x1714   : > { %5153 = vmatprep.subr.bf16.mxu0 %v7531_v37  ;;  %v4271_v37 = vld [vmem:[%s10067_s5 + $0x98] sm:$0xff] }
0x1715   : > { %v7503_v44 = vcombine.high %v4271_v37, %v4279_v36 }
0x1717   : > { %5154 = vmatpush1.bf16.msra.mxu0 %v7530_v38  ;;  %v4278_v38 = vld [vmem:[%s10067_s5 + $0xd0] sm:$0xff] }
0x1718   : > { %5155 = vmatprep.subr.bf16.mxu0 %v7547_v25  ;;  %v7501_v42 = vcombine.high %v4270_v35, %v4278_v38  ;;  %v4295_v25 = vld [vmem:[%s10067_s5 + $0x158] sm:$0xff] }
0x171b   : > { %5156 = vmatpush1.bf16.msra.mxu0 %v7546_v24  ;;  %v4287_v24 = vld [vmem:[%s10067_s5 + $0x118] sm:$0xff] }
0x17dd   : > { %v4201_v7 = vpop.f32.mrb[28].mxu0 }
0x17de   : > { %v4202_v8 = vadd.f32 %v7469_v62, %v4201_v7  ;;  %v8230_v32 = vpop.f32.mrb[29].mxu0  ;;  %v4340_v7 = vld [vmem:[%s10067_s5 + $0x2c0] sm:$0xff] }
0x17df   : > { %v4204_v40 = vpop.f32.mrb[30].mxu0 }
0x17e0   : > { %v4205_v41 = vadd.f32 %v7469_v62, %v4204_v40  ;;  %v8231_v45 = vpop.f32.mrb[31].mxu0  ;;  %v4208_v43 = vadd.f32 %v8719_v1, %v4202_v8  ;;  %v4332_v62 = vld [vmem:[%s10067_s5 + $0x280] sm:$0xff]  ;;  %v4333_v8 = vld [vmem:[%s10067_s5 + $0x288] sm:$0xff] }
0x17e1   : > { %v7561_v32 = vcombine.high %v4332_v62, %v4340_v7  ;;  %v4341_v40 = vld [vmem:[%s10067_s5 + $0x2c8] sm:$0xff] }
0x17e2   : > { %4212 = vadd.xlane.f32.xlu1 %v4208_v43  ;;  %v4209_v53 = vadd.f32 %v8720_v52, %v4205_v41  ;;  %v7560_v41 = vcombine.low %v4332_v62, %v4340_v7  ;;  %v7562_v45 = vcombine.low %v4333_v8, %v4341_v40  ;;  %v7563_v1 = vcombine.high %v4333_v8, %v4341_v40  ;;  %v4356_v52 = vld [vmem:[%s10067_s5 + $0x340] sm:$0xff]  ;;  %v4302_v40 = vld [vmem:[%s10067_s5 + $0x190] sm:$0xff] }
0x17e3   : > { %5114 = vmatprep.subr.bf16.mxu1 %v7561_v32  ;;  %v7500_v62 = vcombine.low %v4270_v35, %v4278_v38  ;;  %v7502_v7 = vcombine.low %v4271_v37, %v4279_v36  ;;  %v7519_v32 = vcombine.high %v4287_v24, %v4295_v25  ;;  %v4257_v35 = vld [vmem:[%s10067_s5 + $0x28] sm:$0xff] }
0x17e4   : > { %4214 = vadd.xlane.f32.xlu0 %v4209_v53  ;;  %5157 = vmatprep.subr.bf16.mxu0 %v7563_v1  ;;  %v4311_v1 = vld [vmem:[%s10067_s5 + $0x1d8] sm:$0xff]  ;;  %v4265_v38 = vld [vmem:[%s10067_s5 + $0x68] sm:$0xff] }
0x17e5   : > { %5115 = vmatpush1.bf16.msra.mxu1 %v7560_v41  ;;  %5158 = vmatpush1.bf16.msra.mxu0 %v7562_v45  ;;  %v4310_v41 = vld [vmem:[%s10067_s5 + $0x1d0] sm:$0xff]  ;;  %v4303_v45 = vld [vmem:[%s10067_s5 + $0x198] sm:$0xff] }
0x17e6   : > { %v7532_v50 = vcombine.low %v4302_v40, %v4310_v41  ;;  %v7534_v54 = vcombine.low %v4303_v45, %v4311_v1 }
0x186f   : > { %v4213_v5 = vpop.xlane.xlu1 %4212 }
0x1870   : > { %v4217_v6 = vmul.f32 0.0078125, %v4213_v5  ;;  %v7484_v5 = vcombine.low %v4254_v0, %v4262_v2 }
0x1871   : > { %v4215_v9 = vpop.xlane.xlu0 %4214 }
0x1872   : > { %v10504_v55 = vsub.f32 %v4208_v43, %v4217_v6  ;;  %v4218_v10 = vmul.f32 0.0078125, %v4215_v9  ;;  %v4348_v43 = vld [vmem:[%s10067_s5 + $0x300] sm:$0xff]  ;;  %v7485_v6 = vcombine.high %v4254_v0, %v4262_v2  ;;  %v4263_v9 = vld [vmem:[%s10067_s5 + $0x58] sm:$0xff] }
0x1873   : > { %v7577_v26 = vcombine.high %v4348_v43, %v4356_v52  ;;  %v7576_v34 = vcombine.low %v4348_v43, %v4356_v52  ;;  %v7518_v52 = vcombine.low %v4287_v24, %v4295_v25  ;;  %v4273_v24 = vld [vmem:[%s10067_s5 + $0xa8] sm:$0xff] }
0x1874   : > { %v10506_v21 = vsub.f32 %v4209_v53, %v4218_v10  ;;  %v4221_v11 = vmul.f32 %v10504_v55, %v10504_v55  ;;  %v4349_v53 = vld [vmem:[%s10067_s5 + $0x308] sm:$0xff]  ;;  %v7486_v10 = vcombine.low %v4255_v3, %v4263_v9 }
0x1875   : > { %v7578_v46 = vcombine.low %v4349_v53, %v4357_v33  ;;  %v7579_v47 = vcombine.high %v4349_v53, %v4357_v33  ;;  %5116 = vmatprep.subr.bf16.mxu1 %v7577_v26  ;;  %v7533_v53 = vcombine.high %v4302_v40, %v4310_v41  ;;  %v7535_v26 = vcombine.high %v4303_v45, %v4311_v1  ;;  %v4318_v33 = vld [vmem:[%s10067_s5 + $0x210] sm:$0xff]  ;;  %v4281_v25 = vld [vmem:[%s10067_s5 + $0xe8] sm:$0xff]  ;;  %v4288_v40 = vld [vmem:[%s10067_s5 + $0x120] sm:$0xff] }
0x1876   : > { %4223 = vadd.xlane.f32.xlu0 %v4221_v11  ;;  %v4222_v12 = vmul.f32 %v10506_v21, %v10506_v21  ;;  %5117 = vmatpush1.bf16.msra.mxu1 %v7576_v34  ;;  %v7487_v11 = vcombine.high %v4255_v3, %v4263_v9  ;;  %v4326_v34 = vld [vmem:[%s10067_s5 + $0x250] sm:$0xff]  ;;  %v4296_v41 = vld [vmem:[%s10067_s5 + $0x160] sm:$0xff]  ;;  %v4289_v45 = vld [vmem:[%s10067_s5 + $0x128] sm:$0xff] }
0x1877   : > { %5159 = vmatprep.subr.bf16.mxu0 %v7579_v47  ;;  %5118 = vmatprep.subr.bf16.mxu1 %v7593_v58  ;;  %v4327_v47 = vld [vmem:[%s10067_s5 + $0x258] sm:$0xff]  ;;  %v7549_v56 = vcombine.high %v4318_v33, %v4326_v34  ;;  %v7548_v0 = vcombine.low %v4318_v33, %v4326_v34  ;;  %v4358_v9 = vld [vmem:[%s10067_s5 + $0x350] sm:$0xff]  ;;  %v4297_v1 = vld [vmem:[%s10067_s5 + $0x168] sm:$0xff] }
0x1878   : > { %5160 = vmatpush1.bf16.msra.mxu0 %v7578_v46  ;;  %v4319_v46 = vld [vmem:[%s10067_s5 + $0x218] sm:$0xff]  ;;  %v4304_v33 = vld [vmem:[%s10067_s5 + $0x1a0] sm:$0xff] }
0x1879   : > { %5161 = vmatprep.subr.bf16.mxu0 %v7595_v59  ;;  %v7551_v58 = vcombine.high %v4319_v46, %v4327_v47  ;;  %v4343_v59 = vld [vmem:[%s10067_s5 + $0x2d8] sm:$0xff]  ;;  %v7550_v2 = vcombine.low %v4319_v46, %v4327_v47  ;;  %v4312_v34 = vld [vmem:[%s10067_s5 + $0x1e0] sm:$0xff]  ;;  %v4305_v46 = vld [vmem:[%s10067_s5 + $0x1a8] sm:$0xff] }
0x187a   : > { %4225 = vadd.xlane.f32.xlu0 %v4222_v12  ;;  %5119 = vmatpush1.bf16.msra.mxu1 %v7592_v61  ;;  %v4342_v61 = vld [vmem:[%s10067_s5 + $0x2d0] sm:$0xff]  ;;  %v4313_v47 = vld [vmem:[%s10067_s5 + $0x1e8] sm:$0xff] }
0x187b   : > { %5190 = vmatprep.subr.bf16.mxu1 %v7485_v6  ;;  %v7565_v3 = vcombine.high %v4334_v57, %v4342_v61  ;;  %v4350_v6 = vld [vmem:[%s10067_s5 + $0x310] sm:$0xff] }
0x187c   : > { %5162 = vmatpush1.bf16.msra.mxu0 %v7594_v63  ;;  %v4335_v63 = vld [vmem:[%s10067_s5 + $0x298] sm:$0xff] }
0x187d   : > { %5233 = vmatprep.subr.bf16.mxu0 %v7487_v11  ;;  %v4359_v11 = vld [vmem:[%s10067_s5 + $0x358] sm:$0xff] }
0x1903   : > { %v4224_v12 = vpop.xlane.xlu0 %4223 }
0x1904   : > { %v4227_v13 = vmul.f32 0.0078125, %v4224_v12  ;;  %v7564_v12 = vcombine.low %v4334_v57, %v4342_v61  ;;  %v4320_v57 = vld [vmem:[%s10067_s5 + $0x220] sm:$0xff] }
0x1905   : > { %v4328_v61 = vld [vmem:[%s10067_s5 + $0x260] sm:$0xff] }
0x1906   : > { %v4229_v14 = vadd.f32 1e-05, %v4227_v13  ;;  %v7566_v13 = vcombine.low %v4335_v63, %v4343_v59 }
0x1907   : > { %v4226_v15 = vpop.xlane.xlu0 %4225 }
0x1908   : > { %8711 = vrsqrt.f32 %v4229_v14  ;;  %v4228_v17 = vmul.f32 0.0078125, %v4226_v15  ;;  %v7581_v14 = vcombine.high %v4350_v6, %v4358_v9 }
0x190a   : > { %v4230_v18 = vadd.f32 1e-05, %v4228_v17  ;;  %v4366_v17 = vld [vmem:[%s10067_s5 + $0x390] sm:$0xff] }
0x190c   : > { %8713 = vrsqrt.f32 %v4230_v18  ;;  %v4374_v18 = vld [vmem:[%s10067_s5 + $0x3d0] sm:$0xff] }
0x190d   : > { %v7596_v37 = vcombine.low %v4366_v17, %v4374_v18 }
0x1912   : > { %v8712_v19 = vpop.eup %8711 }
0x1913   : > { %v4233_v22 = vmul.f32 %v8712_v19, %v10504_v55  ;;  %v4367_v19 = vld [vmem:[%s10067_s5 + $0x398] sm:$0xff] }
0x1915   : > { %v4241_v28 = vmul.f32 %v7478_v23, %v4233_v22  ;;  %v4375_v22 = vld [vmem:[%s10067_s5 + $0x3d8] sm:$0xff] }
0x1916   : > { %v8714_v27 = vpop.eup %8713  ;;  %v7598_v36 = vcombine.low %v4367_v19, %v4375_v22 }
0x1917   : > { %v4234_v29 = vmul.f32 %v8714_v27, %v10506_v21  ;;  %v10550_v39 = vadd.f32 %v7479_v30, %v4241_v28  ;;  %v4286_v21 = vld [vmem:[%s10067_s5 + $0x110] sm:$0xff]  ;;  %v7597_v28 = vcombine.high %v4366_v17, %v4374_v18  ;;  %v4352_v17 = vld [vmem:[%s10067_s5 + $0x320] sm:$0xff] }
0x1918   : > { %v7517_v8 = vcombine.high %v4286_v21, %v4294_v16  ;;  %v7516_v43 = vcombine.low %v4286_v21, %v4294_v16  ;;  %v4272_v21 = vld [vmem:[%s10067_s5 + $0xa0] sm:$0xff] }
0x1919   : > { %v4242_v31 = vmul.f32 %v7478_v23, %v4234_v29  ;;  %v7580_v23 = vcombine.low %v4350_v6, %v4358_v9  ;;  %v7599_v29 = vcombine.high %v4367_v19, %v4375_v22  ;;  %v4280_v16 = vld [vmem:[%s10067_s5 + $0xe0] sm:$0xff]  ;;  %v4353_v19 = vld [vmem:[%s10067_s5 + $0x328] sm:$0xff] }
0x191a   : > { %v4336_v6 = vld [vmem:[%s10067_s5 + $0x2a0] sm:$0xff]  ;;  %v4361_v22 = vld [vmem:[%s10067_s5 + $0x368] sm:$0xff] }
0x191b   : > { %v10552_v55 = vadd.f32 %v7479_v30, %v4242_v31  ;;  %v4256_v30 = vld [vmem:[%s10067_s5 + $0x20] sm:$0xff] }
0x191c   : > { %v4264_v31 = vld [vmem:[%s10067_s5 + $0x60] sm:$0xff] }
0x191d   : > { %v10556_v4 = vpack.c.bf16 %v10552_v55, %v10550_v39  ;;  %v4344_v9 = vld [vmem:[%s10067_s5 + $0x2e0] sm:$0xff] }
0x191e   : > { %v4360_v18 = vld [vmem:[%s10067_s5 + $0x360] sm:$0xff] }
0x191f   : > { %5137 = vmatmul.mubr.bf16.vlgmr.msra.gmra.mrb[44].mxu1 %v10556_v4  ;;  %5180 = vmatmul.mubr.bf16.vlgmr.msra.gmra.mrb[32].mxu0 %v10556_v4 }
0x1920   : > { %5191 = vmatpush1.bf16.msra.mxu1 %v7484_v5  ;;  %5234 = vmatpush1.bf16.msra.mxu0 %v7486_v10  ;;  %v7567_v5 = vcombine.high %v4335_v63, %v4343_v59  ;;  %v4351_v10 = vld [vmem:[%s10067_s5 + $0x318] sm:$0xff]  ;;  %v4321_v63 = vld [vmem:[%s10067_s5 + $0x228] sm:$0xff] }
0x1921   : > { %5192 = vmatprep.subr.bf16.mxu1 %v7501_v42  ;;  %5235 = vmatprep.subr.bf16.mxu0 %v7503_v44  ;;  %v7583_v15 = vcombine.high %v4351_v10, %v4359_v11  ;;  %v7582_v27 = vcombine.low %v4351_v10, %v4359_v11  ;;  %v7489_v42 = vcombine.high %v4256_v30, %v4264_v31  ;;  %v4329_v59 = vld [vmem:[%s10067_s5 + $0x268] sm:$0xff] }
0x1922   : > { %5222 = vmatprep.mubr.bf16.mxu1 %v9378_v20  ;;  %5265 = vmatprep.mubr.bf16.mxu0 %v9378_v20  ;;  %v7491_v44 = vcombine.high %v4257_v35, %v4265_v38  ;;  %v4337_v10 = vld [vmem:[%s10067_s5 + $0x2a8] sm:$0xff] }
0x1923   : > { %v4345_v11 = vld [vmem:[%s10067_s5 + $0x2e8] sm:$0xff] }
0x1924   : > { %5193 = vmatpush1.bf16.msra.mxu1 %v7500_v62  ;;  %5236 = vmatpush1.bf16.msra.mxu0 %v7502_v7  ;;  %v7488_v62 = vcombine.low %v4256_v30, %v4264_v31  ;;  %v7490_v7 = vcombine.low %v4257_v35, %v4265_v38  ;;  %v4368_v30 = vld [vmem:[%s10067_s5 + $0x3a0] sm:$0xff]  ;;  %v4369_v35 = vld [vmem:[%s10067_s5 + $0x3a8] sm:$0xff] }
0x1925   : > { %5194 = vmatprep.subr.bf16.mxu1 %v7517_v8  ;;  %5237 = vmatprep.subr.bf16.mxu0 %v7519_v32  ;;  %v7505_v8 = vcombine.high %v4272_v21, %v4280_v16  ;;  %v7507_v32 = vcombine.high %v4273_v24, %v4281_v25  ;;  %v4376_v31 = vld [vmem:[%s10067_s5 + $0x3e0] sm:$0xff]  ;;  %v4377_v38 = vld [vmem:[%s10067_s5 + $0x3e8] sm:$0xff] }
0x1928   : > { %5195 = vmatpush1.bf16.msra.mxu1 %v7516_v43  ;;  %5238 = vmatpush1.bf16.msra.mxu0 %v7518_v52  ;;  %v7504_v43 = vcombine.low %v4272_v21, %v4280_v16  ;;  %v7506_v52 = vcombine.low %v4273_v24, %v4281_v25  ;;  %v4258_v21 = vld [vmem:[%s10067_s5 + $0x30] sm:$0xff]  ;;  %v4259_v24 = vld [vmem:[%s10067_s5 + $0x38] sm:$0xff] }
0x1929   : > { %5196 = vmatprep.subr.bf16.mxu1 %v7533_v53  ;;  %5239 = vmatprep.subr.bf16.mxu0 %v7535_v26  ;;  %v7521_v53 = vcombine.high %v4288_v40, %v4296_v41  ;;  %v7523_v26 = vcombine.high %v4289_v45, %v4297_v1  ;;  %v4266_v16 = vld [vmem:[%s10067_s5 + $0x70] sm:$0xff]  ;;  %v4267_v25 = vld [vmem:[%s10067_s5 + $0x78] sm:$0xff] }
0x192c   : > { %5197 = vmatpush1.bf16.msra.mxu1 %v7532_v50  ;;  %5240 = vmatpush1.bf16.msra.mxu0 %v7534_v54  ;;  %v7520_v50 = vcombine.low %v4288_v40, %v4296_v41  ;;  %v7522_v54 = vcombine.low %v4289_v45, %v4297_v1  ;;  %v4274_v40 = vld [vmem:[%s10067_s5 + $0xb0] sm:$0xff]  ;;  %v4275_v45 = vld [vmem:[%s10067_s5 + $0xb8] sm:$0xff] }
0x192d   : > { %5198 = vmatprep.subr.bf16.mxu1 %v7549_v56  ;;  %5241 = vmatprep.subr.bf16.mxu0 %v7551_v58  ;;  %v7537_v56 = vcombine.high %v4304_v33, %v4312_v34  ;;  %v7539_v58 = vcombine.high %v4305_v46, %v4313_v47  ;;  %v4282_v41 = vld [vmem:[%s10067_s5 + $0xf0] sm:$0xff]  ;;  %v4283_v1 = vld [vmem:[%s10067_s5 + $0xf8] sm:$0xff] }
0x1930   : > { %5199 = vmatpush1.bf16.msra.mxu1 %v7548_v0  ;;  %5242 = vmatpush1.bf16.msra.mxu0 %v7550_v2  ;;  %v7536_v0 = vcombine.low %v4304_v33, %v4312_v34  ;;  %v7538_v2 = vcombine.low %v4305_v46, %v4313_v47  ;;  %v4290_v33 = vld [vmem:[%s10067_s5 + $0x130] sm:$0xff]  ;;  %v4291_v46 = vld [vmem:[%s10067_s5 + $0x138] sm:$0xff] }
0x1931   : > { %5200 = vmatprep.subr.bf16.mxu1 %v7565_v3  ;;  %5243 = vmatprep.subr.bf16.mxu0 %v7567_v5  ;;  %v7553_v3 = vcombine.high %v4320_v57, %v4328_v61  ;;  %v7555_v5 = vcombine.high %v4321_v63, %v4329_v59  ;;  %v4298_v34 = vld [vmem:[%s10067_s5 + $0x170] sm:$0xff]  ;;  %v4299_v47 = vld [vmem:[%s10067_s5 + $0x178] sm:$0xff] }
0x1934   : > { %5201 = vmatpush1.bf16.msra.mxu1 %v7564_v12  ;;  %5244 = vmatpush1.bf16.msra.mxu0 %v7566_v13  ;;  %v7552_v12 = vcombine.low %v4320_v57, %v4328_v61  ;;  %v7554_v13 = vcombine.low %v4321_v63, %v4329_v59  ;;  %v4306_v57 = vld [vmem:[%s10067_s5 + $0x1b0] sm:$0xff]  ;;  %v4307_v63 = vld [vmem:[%s10067_s5 + $0x1b8] sm:$0xff] }
0x1935   : > { %5202 = vmatprep.subr.bf16.mxu1 %v7581_v14  ;;  %5245 = vmatprep.subr.bf16.mxu0 %v7583_v15  ;;  %v7569_v14 = vcombine.high %v4336_v6, %v4344_v9  ;;  %v7571_v15 = vcombine.high %v4337_v10, %v4345_v11  ;;  %v4314_v61 = vld [vmem:[%s10067_s5 + $0x1f0] sm:$0xff]  ;;  %v4315_v59 = vld [vmem:[%s10067_s5 + $0x1f8] sm:$0xff] }
0x1938   : > { %5203 = vmatpush1.bf16.msra.mxu1 %v7580_v23  ;;  %5246 = vmatpush1.bf16.msra.mxu0 %v7582_v27  ;;  %v7568_v23 = vcombine.low %v4336_v6, %v4344_v9  ;;  %v7570_v27 = vcombine.low %v4337_v10, %v4345_v11  ;;  %v4322_v6 = vld [vmem:[%s10067_s5 + $0x230] sm:$0xff]  ;;  %v4323_v10 = vld [vmem:[%s10067_s5 + $0x238] sm:$0xff] }
0x1939   : > { %5204 = vmatprep.subr.bf16.mxu1 %v7597_v28  ;;  %5247 = vmatprep.subr.bf16.mxu0 %v7599_v29  ;;  %v7585_v28 = vcombine.high %v4352_v17, %v4360_v18  ;;  %v7587_v29 = vcombine.high %v4353_v19, %v4361_v22  ;;  %v4330_v9 = vld [vmem:[%s10067_s5 + $0x270] sm:$0xff]  ;;  %v4331_v11 = vld [vmem:[%s10067_s5 + $0x278] sm:$0xff] }
0x193c   : > { %5205 = vmatpush1.bf16.msra.mxu1 %v7596_v37  ;;  %5248 = vmatpush1.bf16.msra.mxu0 %v7598_v36  ;;  %v7584_v37 = vcombine.low %v4352_v17, %v4360_v18  ;;  %v7586_v36 = vcombine.low %v4353_v19, %v4361_v22  ;;  %v4346_v17 = vld [vmem:[%s10067_s5 + $0x2f0] sm:$0xff]  ;;  %v4339_v18 = vld [vmem:[%s10067_s5 + $0x2b8] sm:$0xff]  ;;  %v7556_v22 = vcombine.low %v4322_v6, %v4330_v9 }
0x193d   : > { %5276 = vmatprep.subr.bf16.mxu1 %v7489_v42  ;;  %5319 = vmatprep.subr.bf16.mxu0 %v7491_v44  ;;  %v7601_v42 = vcombine.high %v4368_v30, %v4376_v31  ;;  %v7603_v44 = vcombine.high %v4369_v35, %v4377_v38  ;;  %v4347_v19 = vld [vmem:[%s10067_s5 + $0x2f8] sm:$0xff] }
0x193f   : > { %5223 = vmatmul.mubr.bf16.vlgmr.msra.gmra.mrb[48].mxu1 %v10556_v4  ;;  %5266 = vmatmul.mubr.bf16.vlgmr.msra.gmra.mrb[36].mxu0 %v10556_v4 }
0x1940   : > { %5277 = vmatpush1.bf16.msra.mxu1 %v7488_v62  ;;  %5320 = vmatpush1.bf16.msra.mxu0 %v7490_v7  ;;  %v7600_v62 = vcombine.low %v4368_v30, %v4376_v31  ;;  %v7602_v7 = vcombine.low %v4369_v35, %v4377_v38  ;;  %v4362_v30 = vld [vmem:[%s10067_s5 + $0x370] sm:$0xff]  ;;  %v4355_v31 = vld [vmem:[%s10067_s5 + $0x338] sm:$0xff] }
0x1941   : > { %5278 = vmatprep.subr.bf16.mxu1 %v7505_v8  ;;  %5321 = vmatprep.subr.bf16.mxu0 %v7507_v32  ;;  %v7493_v8 = vcombine.high %v4258_v21, %v4266_v16  ;;  %v7495_v32 = vcombine.high %v4259_v24, %v4267_v25  ;;  %v4363_v35 = vld [vmem:[%s10067_s5 + $0x378] sm:$0xff] }
0x1942   : > { %5308 = vmatprep.mubr.bf16.mxu1 %v9378_v20  ;;  %5351 = vmatprep.mubr.bf16.mxu0 %v9378_v20 }
0x1944   : > { %5279 = vmatpush1.bf16.msra.mxu1 %v7504_v43  ;;  %5322 = vmatpush1.bf16.msra.mxu0 %v7506_v52  ;;  %v7492_v43 = vcombine.low %v4258_v21, %v4266_v16  ;;  %v7494_v52 = vcombine.low %v4259_v24, %v4267_v25  ;;  %v4378_v21 = vld [vmem:[%s10067_s5 + $0x3f0] sm:$0xff]  ;;  %v4371_v16 = vld [vmem:[%s10067_s5 + $0x3b8] sm:$0xff] }
0x1945   : > { %5280 = vmatprep.subr.bf16.mxu1 %v7521_v53  ;;  %5323 = vmatprep.subr.bf16.mxu0 %v7523_v26  ;;  %v7509_v53 = vcombine.high %v4274_v40, %v4282_v41  ;;  %v7511_v26 = vcombine.high %v4275_v45, %v4283_v1  ;;  %v4379_v24 = vld [vmem:[%s10067_s5 + $0x3f8] sm:$0xff] }
0x1948   : > { %5281 = vmatpush1.bf16.msra.mxu1 %v7520_v50  ;;  %5324 = vmatpush1.bf16.msra.mxu0 %v7522_v54  ;;  %v7508_v50 = vcombine.low %v4274_v40, %v4282_v41  ;;  %v7510_v54 = vcombine.low %v4275_v45, %v4283_v1  ;;  %v7606_v40 = vcombine.low %v4371_v16, %v4379_v24  ;;  %v8519_v41 = vld [vmem:[%s10071_s3 + $0x40] sm:$0xff]  }
0x1949   : > { %5282 = vmatprep.subr.bf16.mxu1 %v7537_v56  ;;  %5325 = vmatprep.subr.bf16.mxu0 %v7539_v58  ;;  %v7525_v56 = vcombine.high %v4290_v33, %v4298_v34  ;;  %v7527_v58 = vcombine.high %v4291_v46, %v4299_v47  ;;  %v8520_v45 = vld [vmem:[%s10071_s3 + $0xc0] sm:$0xff]  }
0x194a   : > { %v8521_v1 = vld [vmem:[%s10071_s3] sm:$0xff]  }
0x194c   : > { %5283 = vmatpush1.bf16.msra.mxu1 %v7536_v0  ;;  %5326 = vmatpush1.bf16.msra.mxu0 %v7538_v2  ;;  %v7524_v0 = vcombine.low %v4290_v33, %v4298_v34  ;;  %v7526_v2 = vcombine.low %v4291_v46, %v4299_v47  ;;  %v8526_v33 = vld [vmem:[%s10071_s3 + $0x88] sm:$0xff]   ;;  %v8527_v34 = vld [vmem:[%s10071_s3 + $0x50] sm:$0xff]  }
0x194d   : > { %5284 = vmatprep.subr.bf16.mxu1 %v7553_v3  ;;  %5327 = vmatprep.subr.bf16.mxu0 %v7555_v5  ;;  %v7541_v3 = vcombine.high %v4306_v57, %v4314_v61  ;;  %v7543_v5 = vcombine.high %v4307_v63, %v4315_v59  ;;  %v8528_v46 = vld [vmem:[%s10071_s3 + $0xd0] sm:$0xff]  }
0x194e   : > { %v8529_v47 = vld [vmem:[%s10071_s3 + $0x10] sm:$0xff]  }
0x1950   : > { %5285 = vmatpush1.bf16.msra.mxu1 %v7552_v12  ;;  %5328 = vmatpush1.bf16.msra.mxu0 %v7554_v13  ;;  %v7540_v12 = vcombine.low %v4306_v57, %v4314_v61  ;;  %v7557_v13 = vcombine.high %v4322_v6, %v4330_v9  ;;  %v8535_v57 = vld [vmem:[%s10071_s3 + $0x60] sm:$0xff]   ;;  %v8543_v6 = vld [vmem:[%s10071_s3 + $0x70] sm:$0xff]  }
0x1951   : > { %5286 = vmatprep.subr.bf16.mxu1 %v7569_v14  ;;  %5329 = vmatprep.subr.bf16.mxu0 %v7571_v15  ;;  %v7559_v14 = vcombine.high %v4323_v10, %v4331_v11  ;;  %v4338_v15 = vld [vmem:[%s10067_s5 + $0x2b0] sm:$0xff]  ;;  %v8536_v61 = vld [vmem:[%s10071_s3 + $0xe0] sm:$0xff]  }
0x1952   : > { %v7572_v38 = vcombine.low %v4338_v15, %v4346_v17  ;;  %v8544_v9 = vld [vmem:[%s10071_s3 + $0xf0] sm:$0xff]  }
0x1954   : > { %5287 = vmatpush1.bf16.msra.mxu1 %v7568_v23  ;;  %5330 = vmatpush1.bf16.msra.mxu0 %v7570_v27  ;;  %v7558_v23 = vcombine.low %v4323_v10, %v4331_v11  ;;  %v7573_v27 = vcombine.high %v4338_v15, %v4346_v17  ;;  %v8545_v10 = vld [vmem:[%s10071_s3 + $0x30] sm:$0xff]   ;;  %v8551_v15 = vld [vmem:[%s10071_s3 + $0x140] sm:$0xff]  }
0x1955   : > { %5288 = vmatprep.subr.bf16.mxu1 %v7585_v28  ;;  %5331 = vmatprep.subr.bf16.mxu0 %v7587_v29  ;;  %v7575_v28 = vcombine.high %v4339_v18, %v4347_v19  ;;  %v4354_v29 = vld [vmem:[%s10067_s5 + $0x330] sm:$0xff]  ;;  %v8552_v17 = vld [vmem:[%s10071_s3 + $0x1c0] sm:$0xff]  }
0x1956   : > { %v7588_v25 = vcombine.low %v4354_v29, %v4362_v30  ;;  %v8546_v11 = vld [vmem:[%s10071_s3 + $0xb0] sm:$0xff]  }
0x1958   : > { %5289 = vmatpush1.bf16.msra.mxu1 %v7584_v37  ;;  %5332 = vmatpush1.bf16.msra.mxu0 %v7586_v36  ;;  %v7574_v37 = vcombine.low %v4339_v18, %v4347_v19  ;;  %v7589_v36 = vcombine.high %v4354_v29, %v4362_v30  ;;  %v10695_v18 = vld [vmem:[%s10069_s29] sm:$0xff]  ;;  %v4398_v19 = vsub.s32 3, %v10127_v48 }
0x1959   : > { %5290 = vmatprep.subr.bf16.mxu1 %v7601_v42  ;;  %5333 = vmatprep.subr.bf16.mxu0 %v7603_v44  ;;  %v7591_v42 = vcombine.high %v4355_v31, %v4363_v35  ;;  %v4370_v44 = vld [vmem:[%s10067_s5 + $0x3b0] sm:$0xff] }
0x195c   : > { %5291 = vmatpush1.bf16.msra.mxu1 %v7600_v62  ;;  %5334 = vmatpush1.bf16.msra.mxu0 %v7602_v7  ;;  %v7590_v62 = vcombine.low %v4355_v31, %v4363_v35  ;;  %v7605_v7 = vcombine.high %v4370_v44, %v4378_v21 }
0x195d   : > { %5362 = vmatprep.subr.bf16.mxu1 %v7493_v8  ;;  %5405 = vmatprep.subr.bf16.mxu0 %v7495_v32  ;;  %v7607_v8 = vcombine.high %v4371_v16, %v4379_v24  ;;  %v7604_v32 = vcombine.low %v4370_v44, %v4378_v21 }
0x195f   : > { %5309 = vmatmul.mubr.bf16.vlgmr.msra.gmra.mrb[52].mxu1 %v10556_v4  ;;  %5352 = vmatmul.mubr.bf16.vlgmr.msra.gmra.mrb[40].mxu0 %v10556_v4 }
0x1960   : > { %5363 = vmatpush1.bf16.msra.mxu1 %v7492_v43  ;;  %5406 = vmatpush1.bf16.msra.mxu0 %v7494_v52  ;;  %v8522_v43 = vld [vmem:[%s10071_s3 + $0x80] sm:$0xff]   ;;  %v8523_v52 = vld [vmem:[%s10071_s3 + $0x48] sm:$0xff]  }
0x1961   : > { %5364 = vmatprep.subr.bf16.mxu1 %v7509_v53  ;;  %5407 = vmatprep.subr.bf16.mxu0 %v7511_v26  ;;  %v8524_v53 = vld [vmem:[%s10071_s3 + $0xc8] sm:$0xff]  }
0x1962   : > { %5394 = vmatprep.mubr.bf16.mxu1 %v9378_v20  ;;  %5437 = vmatprep.mubr.bf16.mxu0 %v9378_v20  ;;  %v7542_v20 = vcombine.low %v4307_v63, %v4315_v59  ;;  %v8525_v26 = vld [vmem:[%s10071_s3 + $0x8] sm:$0xff]   ;;  %v8537_v63 = vld [vmem:[%s10071_s3 + $0x20] sm:$0xff]  }
0x1963   : > { %v8538_v59 = vld [vmem:[%s10071_s3 + $0xa0] sm:$0xff]  }
0x1964   : > { %5365 = vmatpush1.bf16.msra.mxu1 %v7508_v50  ;;  %5408 = vmatpush1.bf16.msra.mxu0 %v7510_v54  ;;  %v8530_v50 = vld [vmem:[%s10071_s3 + $0x90] sm:$0xff]   ;;  %v8532_v54 = vld [vmem:[%s10071_s3 + $0xd8] sm:$0xff]  }
0x1965   : > { %5366 = vmatprep.subr.bf16.mxu1 %v7525_v56  ;;  %5409 = vmatprep.subr.bf16.mxu0 %v7527_v58  ;;  %v8533_v56 = vld [vmem:[%s10071_s3 + $0x18] sm:$0xff]  }
0x1966   : > { %v8534_v58 = vld [vmem:[%s10071_s3 + $0x98] sm:$0xff]  }
0x1968   : > { %5367 = vmatpush1.bf16.msra.mxu1 %v7524_v0  ;;  %5410 = vmatpush1.bf16.msra.mxu0 %v7526_v2  ;;  %v8539_v0 = vld [vmem:[%s10071_s3 + $0x68] sm:$0xff]  }
0x1969   : > { %5368 = vmatprep.subr.bf16.mxu1 %v7541_v3  ;;  %5411 = vmatprep.subr.bf16.mxu0 %v7543_v5  ;;  %v8540_v2 = vld [vmem:[%s10071_s3 + $0xe8] sm:$0xff]  }
0x196a   : > { %v8541_v3 = vld [vmem:[%s10071_s3 + $0x28] sm:$0xff]  }
0x196b   : > { %v8542_v5 = vld [vmem:[%s10071_s3 + $0xa8] sm:$0xff]  }
0x196c   : > { %5369 = vmatpush1.bf16.msra.mxu1 %v7540_v12  ;;  %5412 = vmatpush1.bf16.msra.mxu0 %v7542_v20  ;;  %v8547_v12 = vld [vmem:[%s10071_s3 + $0x78] sm:$0xff]  }
0x196d   : > { %5370 = vmatprep.subr.bf16.mxu1 %v7557_v13  ;;  %5413 = vmatprep.subr.bf16.mxu0 %v7559_v14  ;;  %v8548_v20 = vld [vmem:[%s10071_s3 + $0xf8] sm:$0xff]  }
0x196e   : > { %v8549_v13 = vld [vmem:[%s10071_s3 + $0x38] sm:$0xff]  }
0x196f   : > { %v8550_v14 = vld [vmem:[%s10071_s3 + $0xb8] sm:$0xff]  }
0x1970   : > { %5371 = vmatpush1.bf16.msra.mxu1 %v7556_v22  ;;  %5414 = vmatpush1.bf16.msra.mxu0 %v7558_v23  ;;  %v4387_v22 = vrot.slane %v10695_v18, %v10130_v49  ;;  %v4395_v23 = vrot.slane %v10695_v18, %v10147_v60 }
0x1971   : > { %5372 = vmatprep.subr.bf16.mxu1 %v7573_v27  ;;  %5415 = vmatprep.subr.bf16.mxu0 %v7575_v28  ;;  %v4391_v27 = vrot.slane %v10695_v18, %v10134_v51  ;;  %v4399_v28 = vrot.slane %v10695_v18, %v4398_v19 }
0x1974   : > { %5373 = vmatpush1.bf16.msra.mxu1 %v7572_v38  ;;  %5416 = vmatpush1.bf16.msra.mxu0 %v7574_v37 }
0x1975   : > { %5374 = vmatprep.subr.bf16.mxu1 %v7589_v36  ;;  %5417 = vmatprep.subr.bf16.mxu0 %v7591_v42 }
0x1978   : > { %5375 = vmatpush1.bf16.msra.mxu1 %v7588_v25  ;;  %5418 = vmatpush1.bf16.msra.mxu0 %v7590_v62 }
0x1979   : > { %5376 = vmatprep.subr.bf16.mxu1 %v7605_v7  ;;  %5419 = vmatprep.subr.bf16.mxu0 %v7607_v8 }
0x197c   : > { %5377 = vmatpush1.bf16.msra.mxu1 %v7604_v32  ;;  %5420 = vmatpush1.bf16.msra.mxu0 %v7606_v40 }
0x197d   : > { %7841 = vmatprep.subr.bf16.mxu1 %v8519_v41  ;;  %7863 = vmatprep.subr.bf16.mxu0 %v8520_v45 }
0x197f   : > { %5395 = vmatmul.mubr.bf16.vlgmr.msra.gmra.mrb[56].mxu1 %v10556_v4  ;;  %5438 = vmatmul.mubr.bf16.vlgmr.msra.gmra.mrb[44].mxu0 %v10556_v4  ;;  %v8531_v4 = vld [vmem:[%s10071_s3 + $0x58] sm:$0xff]  }
0x1980   : > { %7842 = vmatpush3.bf16.msra.mxu1 %v8521_v1  ;;  %7864 = vmatpush3.bf16.msra.mxu0 %v8522_v43 }
0x1981   : > { %7843 = vmatprep.subr.bf16.mxu1 %v8523_v52  ;;  %7865 = vmatprep.subr.bf16.mxu0 %v8524_v53 }
0x1984   : > { %7844 = vmatpush3.bf16.msra.mxu1 %v8525_v26  ;;  %7866 = vmatpush3.bf16.msra.mxu0 %v8526_v33 }
0x1985   : > { %7845 = vmatprep.subr.bf16.mxu1 %v8527_v34  ;;  %7867 = vmatprep.subr.bf16.mxu0 %v8528_v46 }
0x1988   : > { %7846 = vmatpush3.bf16.msra.mxu1 %v8529_v47  ;;  %7868 = vmatpush3.bf16.msra.mxu0 %v8530_v50  ;;  %v8553_v47 = vld [vmem:[%s10071_s3 + $0x100] sm:$0xff]  }
0x1989   : > { %7847 = vmatprep.subr.bf16.mxu1 %v8531_v4  ;;  %7869 = vmatprep.subr.bf16.mxu0 %v8532_v54  ;;  %v8554_v50 = vld [vmem:[%s10071_s3 + $0x180] sm:$0xff]   ;;  %v8555_v4 = vld [vmem:[%s10071_s3 + $0x148] sm:$0xff]  }
0x198a   : > { %v8556_v54 = vld [vmem:[%s10071_s3 + $0x1c8] sm:$0xff]  }
0x198c   : > { %7848 = vmatpush3.bf16.msra.mxu1 %v8533_v56  ;;  %7870 = vmatpush3.bf16.msra.mxu0 %v8534_v58  ;;  %v8557_v56 = vld [vmem:[%s10071_s3 + $0x108] sm:$0xff]  }
0x198d   : > { %7849 = vmatprep.subr.bf16.mxu1 %v8535_v57  ;;  %7871 = vmatprep.subr.bf16.mxu0 %v8536_v61  ;;  %v8558_v58 = vld [vmem:[%s10071_s3 + $0x188] sm:$0xff]   ;;  %v8559_v57 = vld [vmem:[%s10071_s3 + $0x150] sm:$0xff]  }
0x198e   : > { %v8560_v61 = vld [vmem:[%s10071_s3 + $0x1d0] sm:$0xff]  }
0x1990   : > { %7850 = vmatpush3.bf16.msra.mxu1 %v8537_v63  ;;  %7872 = vmatpush3.bf16.msra.mxu0 %v8538_v59  ;;  %v8561_v63 = vld [vmem:[%s10071_s3 + $0x110] sm:$0xff]  }
0x1991   : > { %7851 = vmatprep.subr.bf16.mxu1 %v8539_v0  ;;  %7873 = vmatprep.subr.bf16.mxu0 %v8540_v2  ;;  %v8562_v59 = vld [vmem:[%s10071_s3 + $0x190] sm:$0xff]   ;;  %v8563_v0 = vld [vmem:[%s10071_s3 + $0x158] sm:$0xff]  }
0x1992   : > { %v8564_v2 = vld [vmem:[%s10071_s3 + $0x1d8] sm:$0xff]  }
0x1994   : > { %7852 = vmatpush3.bf16.msra.mxu1 %v8541_v3  ;;  %7874 = vmatpush3.bf16.msra.mxu0 %v8542_v5  ;;  %v8565_v3 = vld [vmem:[%s10071_s3 + $0x118] sm:$0xff]  }
0x1995   : > { %7853 = vmatprep.subr.bf16.mxu1 %v8543_v6  ;;  %7875 = vmatprep.subr.bf16.mxu0 %v8544_v9  ;;  %v8566_v5 = vld [vmem:[%s10071_s3 + $0x198] sm:$0xff]   ;;  %v8567_v6 = vld [vmem:[%s10071_s3 + $0x160] sm:$0xff]  }
0x1996   : > { %v8568_v9 = vld [vmem:[%s10071_s3 + $0x1e0] sm:$0xff]  }
0x1998   : > { %7854 = vmatpush3.bf16.msra.mxu1 %v8545_v10  ;;  %7876 = vmatpush3.bf16.msra.mxu0 %v8546_v11  ;;  %v8569_v10 = vld [vmem:[%s10071_s3 + $0x120] sm:$0xff]  }
0x1999   : > { %7855 = vmatprep.subr.bf16.mxu1 %v8547_v12  ;;  %7877 = vmatprep.subr.bf16.mxu0 %v8548_v20  ;;  %v8570_v11 = vld [vmem:[%s10071_s3 + $0x1a0] sm:$0xff]   ;;  %v8571_v12 = vld [vmem:[%s10071_s3 + $0x168] sm:$0xff]  }
0x199a   : > { %v8572_v20 = vld [vmem:[%s10071_s3 + $0x1e8] sm:$0xff]  }
0x199c   : > { %7856 = vmatpush3.bf16.msra.mxu1 %v8549_v13  ;;  %7878 = vmatpush3.bf16.msra.mxu0 %v8550_v14  ;;  %v4402_v13 = vsub.s32 4, %v10127_v48  ;;  %v4410_v14 = vsub.s32 6, %v10127_v48 }
0x199d   : > { %7885 = vmatprep.subr.bf16.mxu1 %v8551_v15  ;;  %7907 = vmatprep.subr.bf16.mxu0 %v8552_v17  ;;  %v4406_v15 = vsub.s32 5, %v10127_v48  ;;  %v4414_v17 = vsub.s32 7, %v10127_v48 }
0x19f2   : > { %v5138_v29 = vpop.f32.mrb[44].mxu1  ;;  %v5181_v30 = vpop.f32.mrb[32].mxu0 }
0x19f3   : > { %v5139_v31 = vadd.f32 %v5138_v29, %v4387_v22  ;;  %v5182_v35 = vadd.f32 %v5181_v30, %v4395_v23  ;;  %v5140_v38 = vpop.f32.mrb[45].mxu1  ;;  %v5183_v37 = vpop.f32.mrb[33].mxu0  ;;  %v8575_v29 = vld [vmem:[%s10071_s3 + $0x170] sm:$0xff]  }
0x19f4   : > { %v5141_v36 = vadd.f32 %v5140_v38, %v4391_v27  ;;  %v5184_v42 = vadd.f32 %v5183_v37, %v4399_v28  ;;  %v5142_v44 = vpop.f32.mrb[46].mxu1  ;;  %v5185_v21 = vpop.f32.mrb[34].mxu0  ;;  %v8576_v30 = vld [vmem:[%s10071_s3 + $0x1f0] sm:$0xff]  }
0x19f5   : > { %v5143_v16 = vadd.f32 %v5142_v44, %v4387_v22  ;;  %v5186_v24 = vadd.f32 %v5185_v21, %v4395_v23  ;;  %v5144_v25 = vpop.f32.mrb[47].mxu1  ;;  %v5187_v62 = vpop.f32.mrb[35].mxu0  ;;  %v5448_v32 = vmax.f32 %v5139_v31, 0.0  ;;  %v5450_v40 = vmax.f32 %v5182_v35, 0.0  ;;  %v8573_v22 = vld [vmem:[%s10071_s3 + $0x128] sm:$0xff]  }
0x19f6   : > { %v5145_v7 = vadd.f32 %v5144_v25, %v4391_v27  ;;  %v5188_v8 = vadd.f32 %v5187_v62, %v4399_v28  ;;  %v5449_v1 = vmax.f32 %v5141_v36, 0.0  ;;  %v5451_v43 = vmax.f32 %v5184_v42, 0.0  ;;  %v8574_v23 = vld [vmem:[%s10071_s3 + $0x1a8] sm:$0xff]   ;;  %v8577_v36 = vld [vmem:[%s10071_s3 + $0x130] sm:$0xff]   ;;  %v8579_v25 = vld [vmem:[%s10071_s3 + $0x178] sm:$0xff]  }
0x19f7   : > { %v5464_v41 = vmax.f32 %v5143_v16, 0.0  ;;  %v5466_v45 = vmax.f32 %v5186_v24, 0.0  ;;  %v4403_v27 = vrot.slane %v10695_v18, %v4402_v13  ;;  %v4411_v28 = vrot.slane %v10695_v18, %v4410_v14  ;;  %v8578_v42 = vld [vmem:[%s10071_s3 + $0x1b0] sm:$0xff]   ;;  %v8580_v62 = vld [vmem:[%s10071_s3 + $0x1f8] sm:$0xff]  }
0x19f8   : > { %v5465_v52 = vmax.f32 %v5145_v7, 0.0  ;;  %v5467_v53 = vmax.f32 %v5188_v8, 0.0  ;;  %v4407_v31 = vrot.slane %v10695_v18, %v4406_v15  ;;  %v4415_v35 = vrot.slane %v10695_v18, %v4414_v17 }
0x19f9   : > { %v5480_v26 = vpack.c.bf16 %v5464_v41, %v5448_v32  ;;  %v5482_v33 = vpack.c.bf16 %v5466_v45, %v5450_v40 }
0x19fa   : > { %v5481_v34 = vpack.c.bf16 %v5465_v52, %v5449_v1  ;;  %v5483_v46 = vpack.c.bf16 %v5467_v53, %v5451_v43  ;;  %v8581_v53 = vld [vmem:[%s10071_s3 + $0x138] sm:$0xff]  }
0x19fc   : > { %6559 = vmatprep.mubr.bf16.mxu1 %v5481_v34  ;;  %6600 = vmatprep.mubr.bf16.mxu0 %v5483_v46 }
0x19fd   : > { %6560 = vmatmul.mubr.bf16.vlgmr.msra.gmra.mrb[60].mxu1 %v5480_v26  ;;  %6601 = vmatmul.mubr.bf16.vlgmr.msra.gmra.mrb[48].mxu0 %v5482_v33  ;;  %v8582_v26 = vld [vmem:[%s10071_s3 + $0x1b8] sm:$0xff]  }
0x19fe   : > { %7886 = vmatpush3.bf16.msra.mxu1 %v8553_v47  ;;  %7908 = vmatpush3.bf16.msra.mxu0 %v8554_v50  ;;  %v8583_v50 = vld [vmem:[%s10071_s3 + $0x240] sm:$0xff]  }
0x19ff   : > { %7887 = vmatprep.subr.bf16.mxu1 %v8555_v4  ;;  %7909 = vmatprep.subr.bf16.mxu0 %v8556_v54  ;;  %v8584_v4 = vld [vmem:[%s10071_s3 + $0x2c0] sm:$0xff]  }
0x1a02   : > { %7888 = vmatpush3.bf16.msra.mxu1 %v8557_v56  ;;  %7910 = vmatpush3.bf16.msra.mxu0 %v8558_v58 }
0x1a03   : > { %7889 = vmatprep.subr.bf16.mxu1 %v8559_v57  ;;  %7911 = vmatprep.subr.bf16.mxu0 %v8560_v61 }
0x1a06   : > { %7890 = vmatpush3.bf16.msra.mxu1 %v8561_v63  ;;  %7912 = vmatpush3.bf16.msra.mxu0 %v8562_v59 }
0x1a07   : > { %7891 = vmatprep.subr.bf16.mxu1 %v8563_v0  ;;  %7913 = vmatprep.subr.bf16.mxu0 %v8564_v2  ;;  %v8585_v2 = vld [vmem:[%s10071_s3 + $0x200] sm:$0xff]  }
0x1a0a   : > { %7892 = vmatpush3.bf16.msra.mxu1 %v8565_v3  ;;  %7914 = vmatpush3.bf16.msra.mxu0 %v8566_v5  ;;  %v8586_v3 = vld [vmem:[%s10071_s3 + $0x280] sm:$0xff]   ;;  %v8587_v5 = vld [vmem:[%s10071_s3 + $0x248] sm:$0xff]  }
0x1a0b   : > { %7893 = vmatprep.subr.bf16.mxu1 %v8567_v6  ;;  %7915 = vmatprep.subr.bf16.mxu0 %v8568_v9  ;;  %v8588_v6 = vld [vmem:[%s10071_s3 + $0x2c8] sm:$0xff]  }
0x1a0c   : > { %v8589_v9 = vld [vmem:[%s10071_s3 + $0x208] sm:$0xff]  }
0x1a0e   : > { %7894 = vmatpush3.bf16.msra.mxu1 %v8569_v10  ;;  %7916 = vmatpush3.bf16.msra.mxu0 %v8570_v11  ;;  %v8590_v10 = vld [vmem:[%s10071_s3 + $0x288] sm:$0xff]   ;;  %v8591_v11 = vld [vmem:[%s10071_s3 + $0x250] sm:$0xff]  }
0x1a0f   : > { %7895 = vmatprep.subr.bf16.mxu1 %v8571_v12  ;;  %7917 = vmatprep.subr.bf16.mxu0 %v8572_v20  ;;  %v8592_v12 = vld [vmem:[%s10071_s3 + $0x2d0] sm:$0xff]  }
0x1a10   : > { %v8593_v20 = vld [vmem:[%s10071_s3 + $0x210] sm:$0xff]  }
0x1a12   : > { %v5224_v38 = vpop.f32.mrb[48].mxu1  ;;  %v5267_v37 = vpop.f32.mrb[36].mxu0  ;;  %7896 = vmatpush3.bf16.msra.mxu1 %v8573_v22  ;;  %7918 = vmatpush3.bf16.msra.mxu0 %v8574_v23  ;;  %v8594_v22 = vld [vmem:[%s10071_s3 + $0x290] sm:$0xff]   ;;  %v8595_v23 = vld [vmem:[%s10071_s3 + $0x258] sm:$0xff]  }
0x1a13   : > { %v5225_v44 = vadd.f32 %v5224_v38, %v4403_v27  ;;  %v5268_v21 = vadd.f32 %v5267_v37, %v4411_v28  ;;  %v5226_v16 = vpop.f32.mrb[49].mxu1  ;;  %v5269_v24 = vpop.f32.mrb[37].mxu0  ;;  %7897 = vmatprep.subr.bf16.mxu1 %v8575_v29  ;;  %7919 = vmatprep.subr.bf16.mxu0 %v8576_v30  ;;  %v8598_v29 = vld [vmem:[%s10071_s3 + $0x298] sm:$0xff]   ;;  %v8599_v30 = vld [vmem:[%s10071_s3 + $0x260] sm:$0xff]   ;;  %v8603_v37 = vld [vmem:[%s10071_s3 + $0x268] sm:$0xff]  }
0x1a14   : > { %v5227_v7 = vadd.f32 %v5226_v16, %v4407_v31  ;;  %v5270_v8 = vadd.f32 %v5269_v24, %v4415_v35  ;;  %v5228_v32 = vpop.f32.mrb[50].mxu1  ;;  %v5271_v18 = vpop.f32.mrb[38].mxu0  ;;  %v8602_v38 = vld [vmem:[%s10071_s3 + $0x2a0] sm:$0xff]  }
0x1a15   : > { %v5229_v40 = vadd.f32 %v5228_v32, %v4403_v27  ;;  %v5272_v41 = vadd.f32 %v5271_v18, %v4411_v28  ;;  %v5230_v45 = vpop.f32.mrb[51].mxu1  ;;  %v5273_v1 = vpop.f32.mrb[39].mxu0  ;;  %v5452_v33 = vmax.f32 %v5225_v44, 0.0  ;;  %v5454_v34 = vmax.f32 %v5268_v21, 0.0  ;;  %v8596_v27 = vld [vmem:[%s10071_s3 + $0x2d8] sm:$0xff]   ;;  %v8605_v44 = vld [vmem:[%s10071_s3 + $0x228] sm:$0xff]  }
0x1a16   : > { %v5231_v43 = vadd.f32 %v5230_v45, %v4407_v31  ;;  %v5274_v52 = vadd.f32 %v5273_v1, %v4415_v35  ;;  %7898 = vmatpush3.bf16.msra.mxu1 %v8577_v36  ;;  %7920 = vmatpush3.bf16.msra.mxu0 %v8578_v42  ;;  %v5453_v54 = vmax.f32 %v5227_v7, 0.0  ;;  %v5455_v56 = vmax.f32 %v5270_v8, 0.0  ;;  %v8597_v28 = vld [vmem:[%s10071_s3 + $0x218] sm:$0xff]   ;;  %v8600_v31 = vld [vmem:[%s10071_s3 + $0x2e0] sm:$0xff]   ;;  %v8604_v36 = vld [vmem:[%s10071_s3 + $0x2e8] sm:$0xff]  }
0x1a17   : > { %v5468_v46 = vmax.f32 %v5229_v40, 0.0  ;;  %v5470_v47 = vmax.f32 %v5272_v41, 0.0  ;;  %7899 = vmatprep.subr.bf16.mxu1 %v8579_v25  ;;  %7921 = vmatprep.subr.bf16.mxu0 %v8580_v62  ;;  %v8601_v35 = vld [vmem:[%s10071_s3 + $0x220] sm:$0xff]   ;;  %v10776_v42 = vld [vmem:[%s10069_s29 + $0x8] sm:$0xff]  ;;  %v8607_v25 = vld [vmem:[%s10071_s3 + $0x270] sm:$0xff]  }
0x1a18   : > { %v5469_v58 = vmax.f32 %v5231_v43, 0.0  ;;  %v5471_v57 = vmax.f32 %v5274_v52, 0.0  ;;  %v8606_v21 = vld [vmem:[%s10071_s3 + $0x2a8] sm:$0xff]   ;;  %v4419_v16 = vrot.slane %v10776_v42, %v10130_v49  ;;  %v4427_v24 = vrot.slane %v10776_v42, %v10147_v60  ;;  %v8608_v62 = vld [vmem:[%s10071_s3 + $0x2f0] sm:$0xff]   ;;  %v8611_v43 = vld [vmem:[%s10071_s3 + $0x278] sm:$0xff]  }
0x1a19   : > { %v5484_v61 = vpack.c.bf16 %v5468_v46, %v5452_v33  ;;  %v5486_v63 = vpack.c.bf16 %v5470_v47, %v5454_v34  ;;  %v4423_v7 = vrot.slane %v10776_v42, %v10134_v51  ;;  %v4431_v8 = vrot.slane %v10776_v42, %v4398_v19  ;;  %v8609_v40 = vld [vmem:[%s10071_s3 + $0x230] sm:$0xff]   ;;  %v8612_v51 = vld [vmem:[%s10071_s3 + $0x2f8] sm:$0xff]  }
0x1a1a   : > { %v5485_v59 = vpack.c.bf16 %v5469_v58, %v5453_v54  ;;  %v5487_v0 = vpack.c.bf16 %v5471_v57, %v5455_v56  ;;  %7900 = vmatpush3.bf16.msra.mxu1 %v8581_v53  ;;  %7922 = vmatpush3.bf16.msra.mxu0 %v8582_v26  ;;  %v8610_v49 = vld [vmem:[%s10071_s3 + $0x2b0] sm:$0xff]   ;;  %v8613_v54 = vld [vmem:[%s10071_s3 + $0x238] sm:$0xff]  }
0x1a1b   : > { %7929 = vmatprep.subr.bf16.mxu1 %v8583_v50  ;;  %7951 = vmatprep.subr.bf16.mxu0 %v8584_v4  ;;  %v8614_v56 = vld [vmem:[%s10071_s3 + $0x2b8] sm:$0xff]  }
0x1a1c   : > { %6641 = vmatprep.mubr.bf16.mxu1 %v5485_v59  ;;  %6682 = vmatprep.mubr.bf16.mxu0 %v5487_v0  ;;  %v8615_v59 = vld [vmem:[%s10071_s3 + $0x340] sm:$0xff]  }
0x1a1d   : > { %6642 = vmatmul.mubr.bf16.vlgmr.msra.gmra.mrb[64].mxu1 %v5484_v61  ;;  %6683 = vmatmul.mubr.bf16.vlgmr.msra.gmra.mrb[52].mxu0 %v5486_v63  ;;  %v8616_v0 = vld [vmem:[%s10071_s3 + $0x3c0] sm:$0xff]  }
0x1a1e   : > { %7930 = vmatpush3.bf16.msra.mxu1 %v8585_v2  ;;  %7952 = vmatpush3.bf16.msra.mxu0 %v8586_v3 }
0x1a1f   : > { %7931 = vmatprep.subr.bf16.mxu1 %v8587_v5  ;;  %7953 = vmatprep.subr.bf16.mxu0 %v8588_v6 }
0x1a22   : > { %7932 = vmatpush3.bf16.msra.mxu1 %v8589_v9  ;;  %7954 = vmatpush3.bf16.msra.mxu0 %v8590_v10 }
0x1a23   : > { %7933 = vmatprep.subr.bf16.mxu1 %v8591_v11  ;;  %7955 = vmatprep.subr.bf16.mxu0 %v8592_v12 }
0x1a26   : > { %7934 = vmatpush3.bf16.msra.mxu1 %v8593_v20  ;;  %7956 = vmatpush3.bf16.msra.mxu0 %v8594_v22  ;;  %v8617_v20 = vld [vmem:[%s10071_s3 + $0x300] sm:$0xff]  }
0x1a27   : > { %7935 = vmatprep.subr.bf16.mxu1 %v8595_v23  ;;  %7957 = vmatprep.subr.bf16.mxu0 %v8596_v27  ;;  %v8618_v22 = vld [vmem:[%s10071_s3 + $0x380] sm:$0xff]   ;;  %v8619_v23 = vld [vmem:[%s10071_s3 + $0x348] sm:$0xff]  }
0x1a28   : > { %v8620_v27 = vld [vmem:[%s10071_s3 + $0x3c8] sm:$0xff]  }
0x1a2a   : > { %7936 = vmatpush3.bf16.msra.mxu1 %v8597_v28  ;;  %7958 = vmatpush3.bf16.msra.mxu0 %v8598_v29  ;;  %v8621_v28 = vld [vmem:[%s10071_s3 + $0x308] sm:$0xff]  }
0x1a2b   : > { %7937 = vmatprep.subr.bf16.mxu1 %v8599_v30  ;;  %7959 = vmatprep.subr.bf16.mxu0 %v8600_v31  ;;  %v8622_v29 = vld [vmem:[%s10071_s3 + $0x388] sm:$0xff]   ;;  %v8623_v30 = vld [vmem:[%s10071_s3 + $0x350] sm:$0xff]  }
0x1a2c   : > { %v8624_v31 = vld [vmem:[%s10071_s3 + $0x3d0] sm:$0xff]  }
0x1a2e   : > { %7938 = vmatpush3.bf16.msra.mxu1 %v8601_v35  ;;  %7960 = vmatpush3.bf16.msra.mxu0 %v8602_v38  ;;  %v8625_v35 = vld [vmem:[%s10071_s3 + $0x310] sm:$0xff]  }
0x1a2f   : > { %7939 = vmatprep.subr.bf16.mxu1 %v8603_v37  ;;  %7961 = vmatprep.subr.bf16.mxu0 %v8604_v36  ;;  %v8626_v38 = vld [vmem:[%s10071_s3 + $0x390] sm:$0xff]   ;;  %v8627_v37 = vld [vmem:[%s10071_s3 + $0x358] sm:$0xff]  }
0x1a30   : > { %v8628_v36 = vld [vmem:[%s10071_s3 + $0x3d8] sm:$0xff]  }
0x1a32   : > { %v5310_v32 = vpop.f32.mrb[52].mxu1  ;;  %v5353_v18 = vpop.f32.mrb[40].mxu0  ;;  %7940 = vmatpush3.bf16.msra.mxu1 %v8605_v44  ;;  %7962 = vmatpush3.bf16.msra.mxu0 %v8606_v21  ;;  %v8629_v44 = vld [vmem:[%s10071_s3 + $0x318] sm:$0xff]  }
0x1a33   : > { %v5311_v41 = vadd.f32 %v5310_v32, %v4419_v16  ;;  %v5354_v45 = vadd.f32 %v5353_v18, %v4427_v24  ;;  %v5312_v60 = vpop.f32.mrb[53].mxu1  ;;  %v5355_v1 = vpop.f32.mrb[41].mxu0  ;;  %7941 = vmatprep.subr.bf16.mxu1 %v8607_v25  ;;  %7963 = vmatprep.subr.bf16.mxu0 %v8608_v62  ;;  %v8630_v21 = vld [vmem:[%s10071_s3 + $0x398] sm:$0xff]   ;;  %v8633_v25 = vld [vmem:[%s10071_s3 + $0x320] sm:$0xff]   ;;  %v8637_v32 = vld [vmem:[%s10071_s3 + $0x328] sm:$0xff]  }
0x1a34   : > { %v5313_v52 = vadd.f32 %v5312_v60, %v4423_v7  ;;  %v5356_v53 = vadd.f32 %v5355_v1, %v4431_v8  ;;  %v5314_v26 = vpop.f32.mrb[54].mxu1  ;;  %v5357_v19 = vpop.f32.mrb[42].mxu0  ;;  %v8634_v62 = vld [vmem:[%s10071_s3 + $0x3a0] sm:$0xff]   ;;  %v8638_v18 = vld [vmem:[%s10071_s3 + $0x3a8] sm:$0xff]   ;;  %v4439_v60 = vrot.slane %v10776_v42, %v4406_v15  ;;  %v4447_v1 = vrot.slane %v10776_v42, %v4414_v17  ;;  %v8644_v15 = vld [vmem:[%s10071_s3 + $0x3f8] sm:$0xff]  }
0x1a35   : > { %v5315_v33 = vadd.f32 %v5314_v26, %v4419_v16  ;;  %v5358_v34 = vadd.f32 %v5357_v19, %v4427_v24  ;;  %v5316_v46 = vpop.f32.mrb[55].mxu1  ;;  %v5359_v47 = vpop.f32.mrb[43].mxu0  ;;  %v5456_v58 = vmax.f32 %v5311_v41, 0.0  ;;  %v5458_v57 = vmax.f32 %v5354_v45, 0.0  ;;  %v8631_v16 = vld [vmem:[%s10071_s3 + $0x360] sm:$0xff]   ;;  %v8639_v41 = vld [vmem:[%s10071_s3 + $0x370] sm:$0xff]  }
0x1a36   : > { %v5317_v50 = vadd.f32 %v5316_v46, %v4423_v7  ;;  %v5360_v4 = vadd.f32 %v5359_v47, %v4431_v8  ;;  %7942 = vmatpush3.bf16.msra.mxu1 %v8609_v40  ;;  %7964 = vmatpush3.bf16.msra.mxu0 %v8610_v49  ;;  %v5457_v2 = vmax.f32 %v5313_v52, 0.0  ;;  %v5459_v3 = vmax.f32 %v5356_v53, 0.0  ;;  %v8632_v24 = vld [vmem:[%s10071_s3 + $0x3e0] sm:$0xff]   ;;  %v8635_v7 = vld [vmem:[%s10071_s3 + $0x368] sm:$0xff]   ;;  %v8640_v45 = vld [vmem:[%s10071_s3 + $0x3f0] sm:$0xff]  }
0x1a37   : > { %v5472_v61 = vmax.f32 %v5315_v33, 0.0  ;;  %v5474_v63 = vmax.f32 %v5358_v34, 0.0  ;;  %7943 = vmatprep.subr.bf16.mxu1 %v8611_v43  ;;  %7965 = vmatprep.subr.bf16.mxu0 %v8612_v51  ;;  %v8636_v8 = vld [vmem:[%s10071_s3 + $0x3e8] sm:$0xff]   ;;  %v4435_v40 = vrot.slane %v10776_v42, %v4402_v13  ;;  %v4443_v49 = vrot.slane %v10776_v42, %v4410_v14  ;;  %v8641_v13 = vld [vmem:[%s10071_s3 + $0x330] sm:$0xff]   ;;  %v8643_v33 = vld [vmem:[%s10071_s3 + $0x378] sm:$0xff]  }
0x1a38   : > { %v5473_v5 = vmax.f32 %v5317_v50, 0.0  ;;  %v5475_v6 = vmax.f32 %v5360_v4, 0.0  ;;  %v8642_v52 = vld [vmem:[%s10071_s3 + $0x3b0] sm:$0xff]  }
0x1a39   : > { %v5488_v9 = vpack.c.bf16 %v5472_v61, %v5456_v58  ;;  %v5490_v10 = vpack.c.bf16 %v5474_v63, %v5458_v57  ;;  %v8645_v58 = vld [vmem:[%s10071_s3 + $0x338] sm:$0xff]  }
0x1a3a   : > { %v5489_v11 = vpack.c.bf16 %v5473_v5, %v5457_v2  ;;  %v5491_v12 = vpack.c.bf16 %v5475_v6, %v5459_v3  ;;  %7944 = vmatpush3.bf16.msra.mxu1 %v8613_v54  ;;  %7966 = vmatpush3.bf16.msra.mxu0 %v8614_v56  ;;  %v8646_v57 = vld [vmem:[%s10071_s3 + $0x3b8] sm:$0xff]  }
0x1a3b   : > { %7973 = vmatprep.subr.bf16.mxu1 %v8615_v59  ;;  %7995 = vmatprep.subr.bf16.mxu0 %v8616_v0 }
0x1a3c   : > { %6723 = vmatprep.mubr.bf16.mxu1 %v5489_v11  ;;  %6764 = vmatprep.mubr.bf16.mxu0 %v5491_v12 }
0x1a3d   : > { %6724 = vmatmul.mubr.bf16.vlgmr.msra.gmra.mrb[68].mxu1 %v5488_v9  ;;  %6765 = vmatmul.mubr.bf16.vlgmr.msra.gmra.mrb[56].mxu0 %v5490_v10 }
0x1a3e   : > { %7974 = vmatpush3.bf16.msra.mxu1 %v8617_v20  ;;  %7996 = vmatpush3.bf16.msra.mxu0 %v8618_v22 }
0x1a3f   : > { %7975 = vmatprep.subr.bf16.mxu1 %v8619_v23  ;;  %7997 = vmatprep.subr.bf16.mxu0 %v8620_v27  ;;  %v7608_v23 = vld [vmem:[%s908_s20] ss:$0 sm:$0xff] }
0x1a42   : > { %7976 = vmatpush3.bf16.msra.mxu1 %v8621_v28  ;;  %7998 = vmatpush3.bf16.msra.mxu0 %v8622_v29 }
0x1a43   : > { %7977 = vmatprep.subr.bf16.mxu1 %v8623_v30  ;;  %7999 = vmatprep.subr.bf16.mxu0 %v8624_v31 }
0x1a46   : > { %7978 = vmatpush3.bf16.msra.mxu1 %v8625_v35  ;;  %8000 = vmatpush3.bf16.msra.mxu0 %v8626_v38 }
0x1a47   : > { %7979 = vmatprep.subr.bf16.mxu1 %v8627_v37  ;;  %8001 = vmatprep.subr.bf16.mxu0 %v8628_v36 }
0x1a4a   : > { %7980 = vmatpush3.bf16.msra.mxu1 %v8629_v44  ;;  %8002 = vmatpush3.bf16.msra.mxu0 %v8630_v21 }
0x1a4b   : > { %7981 = vmatprep.subr.bf16.mxu1 %v8631_v16  ;;  %8003 = vmatprep.subr.bf16.mxu0 %v8632_v24 }
0x1a4e   : > { %7982 = vmatpush3.bf16.msra.mxu1 %v8633_v25  ;;  %8004 = vmatpush3.bf16.msra.mxu0 %v8634_v62 }
0x1a4f   : > { %7983 = vmatprep.subr.bf16.mxu1 %v8635_v7  ;;  %8005 = vmatprep.subr.bf16.mxu0 %v8636_v8 }
0x1a52   : > { %v5396_v43 = vpop.f32.mrb[56].mxu1  ;;  %v5439_v51 = vpop.f32.mrb[44].mxu0  ;;  %7984 = vmatpush3.bf16.msra.mxu1 %v8637_v32  ;;  %8006 = vmatpush3.bf16.msra.mxu0 %v8638_v18 }
0x1a53   : > { %v5397_v53 = vadd.f32 %v5396_v43, %v4435_v40  ;;  %v5440_v14 = vadd.f32 %v5439_v51, %v4443_v49  ;;  %v5398_v26 = vpop.f32.mrb[57].mxu1  ;;  %v5441_v19 = vpop.f32.mrb[45].mxu0  ;;  %7985 = vmatprep.subr.bf16.mxu1 %v8639_v41  ;;  %8007 = vmatprep.subr.bf16.mxu0 %v8640_v45 }
0x1a54   : > { %v5399_v34 = vadd.f32 %v5398_v26, %v4439_v60  ;;  %v5442_v48 = vadd.f32 %v5441_v19, %v4447_v1  ;;  %v5400_v46 = vpop.f32.mrb[58].mxu1  ;;  %v5443_v17 = vpop.f32.mrb[46].mxu0 }
0x1a55   : > { %v5401_v42 = vadd.f32 %v5400_v46, %v4435_v40  ;;  %v5444_v47 = vadd.f32 %v5443_v17, %v4443_v49  ;;  %v5402_v50 = vpop.f32.mrb[59].mxu1  ;;  %v5445_v4 = vpop.f32.mrb[47].mxu0  ;;  %v5460_v61 = vmax.f32 %v5397_v53, 0.0  ;;  %v5462_v63 = vmax.f32 %v5440_v14, 0.0 }
0x1a56   : > { %v5403_v54 = vadd.f32 %v5402_v50, %v4439_v60  ;;  %v5446_v56 = vadd.f32 %v5445_v4, %v4447_v1  ;;  %7986 = vmatpush3.bf16.msra.mxu1 %v8641_v13  ;;  %8008 = vmatpush3.bf16.msra.mxu0 %v8642_v52  ;;  %v5461_v2 = vmax.f32 %v5399_v34, 0.0  ;;  %v5463_v3 = vmax.f32 %v5442_v48, 0.0 }
0x1a57   : > { %v5476_v59 = vmax.f32 %v5401_v42, 0.0  ;;  %v5478_v0 = vmax.f32 %v5444_v47, 0.0  ;;  %7987 = vmatprep.subr.bf16.mxu1 %v8643_v33  ;;  %8009 = vmatprep.subr.bf16.mxu0 %v8644_v15 }
0x1a58   : > { %v5477_v5 = vmax.f32 %v5403_v54, 0.0  ;;  %v5479_v6 = vmax.f32 %v5446_v56, 0.0 }
0x1a59   : > { %v5492_v9 = vpack.c.bf16 %v5476_v59, %v5460_v61  ;;  %v5494_v10 = vpack.c.bf16 %v5478_v0, %v5462_v63 }
0x1a5a   : > { %v5493_v11 = vpack.c.bf16 %v5477_v5, %v5461_v2  ;;  %v5495_v12 = vpack.c.bf16 %v5479_v6, %v5463_v3  ;;  %7988 = vmatpush3.bf16.msra.mxu1 %v8645_v58  ;;  %8010 = vmatpush3.bf16.msra.mxu0 %v8646_v57 }
0x1a5c   : > { %6805 = vmatprep.mubr.bf16.mxu1 %v5493_v11  ;;  %6846 = vmatprep.mubr.bf16.mxu0 %v5495_v12 }
0x1a5d   : > { %6806 = vmatmul.mubr.bf16.vlgmr.msra.gmra.mrb[72].mxu1 %v5492_v9  ;;  %6847 = vmatmul.mubr.bf16.vlgmr.msra.gmra.mrb[60].mxu0 %v5494_v10 }
0x1ad0   : > { %v7857_v20 = vpop.f32.mrb[60].mxu1  ;;  %v7879_v22 = vpop.f32.mrb[48].mxu0 }
0x1ad1   : > { %v7858_v27 = vpop.f32.mrb[61].mxu1  ;;  %v7880_v28 = vpop.f32.mrb[49].mxu0 }
0x1ad2   : > { %v7859_v29 = vadd.f32 %v7858_v27, %v7857_v20  ;;  %v7881_v30 = vadd.f32 %v7880_v28, %v7879_v22  ;;  %v7860_v31 = vpop.f32.mrb[62].mxu1  ;;  %v7882_v35 = vpop.f32.mrb[50].mxu0 }
0x1ad3   : > { %v7861_v38 = vpop.f32.mrb[63].mxu1  ;;  %v7883_v37 = vpop.f32.mrb[51].mxu0 }
0x1ad4   : > { %v6562_v36 = vadd.f32 %v7859_v29, %v7608_v23  ;;  %v7862_v44 = vadd.f32 %v7861_v38, %v7860_v31  ;;  %v7884_v21 = vadd.f32 %v7883_v37, %v7882_v35 }
0x1ad6   : > { %v6603_v16 = vadd.f32 %v7881_v30, %v6562_v36  ;;  %v6565_v24 = vadd.f32 %v7862_v44, %v7608_v23 }
0x1ad8   : > { %v6606_v25 = vadd.f32 %v7884_v21, %v6565_v24 }
0x1af0   : > { %v7901_v62 = vpop.f32.mrb[64].mxu1  ;;  %v7923_v7 = vpop.f32.mrb[52].mxu0 }
0x1af1   : > { %v7902_v8 = vpop.f32.mrb[65].mxu1  ;;  %v7924_v32 = vpop.f32.mrb[53].mxu0 }
0x1af2   : > { %v7903_v18 = vadd.f32 %v7902_v8, %v7901_v62  ;;  %v7925_v40 = vadd.f32 %v7924_v32, %v7923_v7  ;;  %v7904_v49 = vpop.f32.mrb[66].mxu1  ;;  %v7926_v41 = vpop.f32.mrb[54].mxu0  ;;  %v7737_v7 = vld [vmem:[%s916_s7] ss:$0 sm:$0xff] }
0x1af3   : > { %v7905_v45 = vpop.f32.mrb[67].mxu1  ;;  %v7927_v60 = vpop.f32.mrb[55].mxu0 }
0x1af4   : > { %v6644_v1 = vadd.f32 %v7903_v18, %v6603_v16  ;;  %v7906_v43 = vadd.f32 %v7905_v45, %v7904_v49  ;;  %v7928_v51 = vadd.f32 %v7927_v60, %v7926_v41  ;;  %v7738_v18 = vld [vmem:[%s924_s17] ss:$0 sm:$0xff] }
0x1af6   : > { %v6685_v13 = vadd.f32 %v7925_v40, %v6644_v1  ;;  %v6647_v52 = vadd.f32 %v7906_v43, %v6606_v25  ;;  %v8721_v1 = vld [vmem:[#allocation23] sm:$0xff] (!%p7739_p6)   ;;  %v9388_v43 = vmov (!%p7739_p6), 0.0  }
0x1af7   : > { %8232 = vmatprep.subr.bf16.mxu0 (!%p7739_p6), %v9388_v43  ;;  %8248 = vmatprep.mubr.msk.bf16.mxu0 (!%p7739_p6), %vm9389_vm11, %v9388_v43 }
0x1af8   : > { %v6688_v53 = vadd.f32 %v7928_v51, %v6647_v52  ;;  %8233 = vmatpush3.bf16.msra.mxu0 (!%p7739_p6), %v8721_v1  ;;  %v8722_v51 = vld [vmem:[#allocation23 + $0x8] sm:$0xff] (!%p7739_p6)   ;;  %v8724_v52 = vld [vmem:[#allocation23 + $0x18] sm:$0xff] (!%p7739_p6)  }
0x1af9   : > { %8234 = vmatprep.subr.bf16.mxu0 (!%p7739_p6), %v9388_v43 }
0x1afc   : > { %8235 = vmatpush3.bf16.msra.mxu0 (!%p7739_p6), %v8722_v51 }
0x1afd   : > { %8236 = vmatprep.subr.bf16.mxu0 (!%p7739_p6), %v9388_v43 }
0x1b10   : > { %v7945_v14 = vpop.f32.mrb[68].mxu1  ;;  %v7967_v26 = vpop.f32.mrb[56].mxu0 }
0x1b11   : > { %v7946_v19 = vpop.f32.mrb[69].mxu1  ;;  %v7968_v33 = vpop.f32.mrb[57].mxu0 }
0x1b12   : > { %v7947_v15 = vadd.f32 %v7946_v19, %v7945_v14  ;;  %v7969_v34 = vadd.f32 %v7968_v33, %v7967_v26  ;;  %v7948_v48 = vpop.f32.mrb[70].mxu1  ;;  %v7970_v46 = vpop.f32.mrb[58].mxu0  ;;  %v8726_v14 = vld [vmem:[#allocation23 + $0x28] sm:$0xff] (!%p7739_p6)   ;;  %v8727_v26 = vld [vmem:[#allocation23 + $0x30] sm:$0xff] (!%p7739_p6)   ;;  %v8728_v19 = vld [vmem:[#allocation23 + $0x38] sm:$0xff] (!%p7739_p6)  }
0x1b13   : > { %v7949_v17 = vpop.f32.mrb[71].mxu1  ;;  %v7971_v42 = vpop.f32.mrb[59].mxu0 }
0x1b14   : > { %v6726_v47 = vadd.f32 %v7947_v15, %v6685_v13  ;;  %v7950_v50 = vadd.f32 %v7949_v17, %v7948_v48  ;;  %v7972_v4 = vadd.f32 %v7971_v42, %v7970_v46  ;;  %v8723_v13 = vld [vmem:[#allocation23 + $0x10] sm:$0xff] (!%p7739_p6)   ;;  %v7740_v15 = vld [vmem:[#allocation24] ss:$0 sm:$0xff] (!%p7739_p6) }
0x1b15   : > { %8237 = vmatpush3.bf16.msra.mxu0 (!%p7739_p6), %v8723_v13 }
0x1b16   : > { %v6767_v54 = vadd.f32 %v7969_v34, %v6726_v47  ;;  %v6729_v56 = vadd.f32 %v7950_v50, %v6688_v53  ;;  %8238 = vmatprep.subr.bf16.mxu0 (!%p7739_p6), %v9388_v43  ;;  %v8725_v53 = vld [vmem:[#allocation23 + $0x20] sm:$0xff] (!%p7739_p6)  }
0x1b18   : > { %v6770_v58 = vadd.f32 %v7972_v4, %v6729_v56 }
0x1b19   : > { %8239 = vmatpush3.bf16.msra.mxu0 (!%p7739_p6), %v8724_v52 }
0x1b1a   : > { %8240 = vmatprep.subr.bf16.mxu0 (!%p7739_p6), %v9388_v43 }
0x1b1d   : > { %8241 = vmatpush3.bf16.msra.mxu0 (!%p7739_p6), %v8725_v53 }
0x1b1e   : > { %8242 = vmatprep.subr.bf16.mxu0 (!%p7739_p6), %v9388_v43 }
0x1b21   : > { %8243 = vmatpush3.bf16.msra.mxu0 (!%p7739_p6), %v8726_v14 }
0x1b22   : > { %8244 = vmatprep.subr.bf16.mxu0 (!%p7739_p6), %v9388_v43 }
0x1b25   : > { %8245 = vmatpush3.bf16.msra.mxu0 (!%p7739_p6), %v8727_v26 }
0x1b26   : > { %8246 = vmatprep.subr.bf16.mxu0 (!%p7739_p6), %v9388_v43 }
0x1b29   : > { %8247 = vmatpush3.bf16.msra.mxu0 (!%p7739_p6), %v8728_v19 }
0x1b30   : > { %v7989_v57 = vpop.f32.mrb[72].mxu1  ;;  %v8011_v61 = vpop.f32.mrb[60].mxu0 }
0x1b31   : > { %v7990_v63 = vpop.f32.mrb[73].mxu1  ;;  %v8012_v59 = vpop.f32.mrb[61].mxu0 }
0x1b32   : > { %v7991_v0 = vadd.f32 %v7990_v63, %v7989_v57  ;;  %v8013_v2 = vadd.f32 %v8012_v59, %v8011_v61  ;;  %v7992_v3 = vpop.f32.mrb[74].mxu1  ;;  %v8014_v5 = vpop.f32.mrb[62].mxu0 }
0x1b33   : > { %v7993_v6 = vpop.f32.mrb[75].mxu1  ;;  %v8015_v9 = vpop.f32.mrb[63].mxu0 }
0x1b34   : > { %v6808_v10 = vadd.f32 %v7991_v0, %v6767_v54  ;;  %v7994_v11 = vadd.f32 %v7993_v6, %v7992_v3  ;;  %v8016_v12 = vadd.f32 %v8015_v9, %v8014_v5 }
0x1b36   : > { %v6849_v20 = vadd.f32 %v8013_v2, %v6808_v10  ;;  %v6811_v22 = vadd.f32 %v7994_v11, %v6770_v58 }
0x1b38   : > { %v6852_v23 = vadd.f32 %v8016_v12, %v6811_v22  ;;  %v6855_v27 = vadd.f32 %v6849_v20, %v10550_v39 }
0x1b3a   : > { %6859 = vadd.xlane.f32.xlu1 %v6855_v27  ;;  %v6856_v28 = vadd.f32 %v6852_v23, %v10552_v55 }
0x1b3c   : > { %6861 = vadd.xlane.f32.xlu0 %v6856_v28 }
0x1bc7   : > { %v6860_v29 = vpop.xlane.xlu1 %6859 }
0x1bc8   : > { %v6863_v30 = vmul.f32 0.0078125, %v6860_v29 }
0x1bc9   : > { %v6862_v31 = vpop.xlane.xlu0 %6861 }
0x1bca   : > { %v6865_v35 = vsub.f32 %v6855_v27, %v6863_v30  ;;  %v6864_v38 = vmul.f32 0.0078125, %v6862_v31 }
0x1bcc   : > { %v6866_v37 = vsub.f32 %v6856_v28, %v6864_v38  ;;  %v6867_v36 = vmul.f32 %v6865_v35, %v6865_v35 }
0x1bce   : > { %6869 = vadd.xlane.f32.xlu1 %v6867_v36  ;;  %v6868_v44 = vmul.f32 %v6866_v37, %v6866_v37 }
0x1bd0   : > { %6871 = vadd.xlane.f32.xlu0 %v6868_v44 }
0x1c5b   : > { %v6870_v21 = vpop.xlane.xlu1 %6869 }
0x1c5c   : > { %v6873_v16 = vmul.f32 0.0078125, %v6870_v21 }
0x1c5d   : > { %v6872_v24 = vpop.xlane.xlu0 %6871 }
0x1c5e   : > { %v6875_v39 = vadd.f32 1e-05, %v6873_v16  ;;  %v6874_v25 = vmul.f32 0.0078125, %v6872_v24 }
0x1c60   : > { %8715 = vrsqrt.f32 %v6875_v39  ;;  %v6876_v55 = vadd.f32 1e-05, %v6874_v25 }
0x1c62   : > { %8717 = vrsqrt.f32 %v6876_v55 }
0x1c6a   : > { %v8716_v62 = vpop.eup %8715 }
0x1c6b   : > { %v6879_v8 = vmul.f32 %v8716_v62, %v6865_v35 }
0x1c6c   : > { %v8718_v32 = vpop.eup %8717 }
0x1c6d   : > { %v6887_v40 = vmul.f32 %v7737_v7, %v6879_v8  ;;  %v6880_v49 = vmul.f32 %v8718_v32, %v6866_v37  ;;  %6902 = sbr.rel (%p7739_p6) target bundleno = 7816 (0x1e88), region = 172 }
0x1c6f   : > { %v6895_v41 = vadd.f32 %v7738_v18, %v6887_v40  ;;  %v6888_v45 = vmul.f32 %v7737_v7, %v6880_v49 }
0x1c71   : > { %6897 = vst [vmem:[#allocation2] sm:$0xff] %v6895_v41  ;;  %v6896_v60 = vadd.f32 %v7738_v18, %v6888_v45 }
0x1c73   : > { %6898 = vst [vmem:[#allocation2 + $0x8] sm:$0xff] %v6896_v60  ;;  %v6903_v33 = vpack.c.bf16 (!%p7739_p6), %v6896_v60, %v6895_v41 }
0x1c75   : > { %8249 = vmatmul.mubr.bf16.vlgmr.msra.gmra.mrb[0].mxu0 %v6903_v33 }
0x1d48   : > { %v7009_v34 = vpop.f32.mrb[0].mxu0 }
0x1d49   : > { %v7010_v48 = vadd.f32 %v7740_v15, %v7009_v34  ;;  %v8250_v46 = vpop.f32.mrb[1].mxu0 }
0x1d4a   : > { %v7012_v17 = vpop.f32.mrb[2].mxu0 }
0x1d4b   : > { %7016 = vmax.xlane.f32.xlu0 %v7010_v48  ;;  %v8251_v42 = vpop.f32.mrb[3].mxu0  ;;  %v7013_v47 = vadd.f32 %v7740_v15, %v7012_v17 }
0x1d4f   : > { %7018 = vmax.xlane.f32.xlu0 %v7013_v47 }
0x1dd8   : > { %v7017_v50 = vpop.xlane.xlu0 %7016 }
0x1dd9   : > { %v7020_v4 = vsub.f32 %v7010_v48, %v7017_v50 }
0x1ddb   : > { %v7022_v54 = vmul.f32 1.442695, %v7020_v4 }
0x1ddc   : > { %v7019_v56 = vpop.xlane.xlu0 %7018 }
0x1ddd   : > { %8729 = vpow2.f32 %v7022_v54  ;;  %v7021_v58 = vsub.f32 %v7013_v47, %v7019_v56 }
0x1ddf   : > { %v7024_v57 = vmul.f32 1.442695, %v7021_v58 }
0x1de1   : > { %8731 = vpow2.f32 %v7024_v57 }
0x1de7   : > { %v8730_v61 = vpop.eup %8729 }
0x1de8   : > { %7026 = vadd.xlane.f32.xlu1 %v8730_v61 }
0x1deb   : > { %v8732_v63 = vpop.eup %8731 }
0x1dec   : > { %7028 = vadd.xlane.f32.xlu1 %v8732_v63 }
0x1e75   : > { %v7027_v59 = vpop.xlane.xlu1 %7026 }
0x1e76   : > { %8733 = vrcp.f32 %v7027_v59 }
0x1e79   : > { %v7029_v0 = vpop.xlane.xlu1 %7028 }
0x1e7a   : > { %8735 = vrcp.f32 %v7029_v0 }
0x1e80   : > { %v8734_v2 = vpop.eup %8733 }
0x1e81   : > { %v7031_v3 = vmul.f32 %v8734_v2, %v8730_v61 }
0x1e83   : > { %7034 = vst [vmem:[#allocation25] sm:$0xff] %v7031_v3 }
0x1e84   : > { %v8736_v5 = vpop.eup %8735 }
0x1e85   : > { %v7033_v6 = vmul.f32 %v8736_v5, %v8732_v63 }
0x1e87   : > { %7035 = vst [vmem:[#allocation25 + $0x8] sm:$0xff] %v7033_v6 }
0x1e88 PF: > { %s11033_s30 = sld [smem:[#allocation35_spill]]  ;;  %s9390_s8 = smov [#allocation25]  }
0x1e89   : > { %s7042_s27 = sshll.u32 %s9390_s8, 4  ;;  %s7043_s27 = int_to_ptr.vmem [resolvable:$true] %s7042_s27 }
0x1e8a   : > { %s9265_s1 = scalar_lea.vmem %s7043_s27, 256  ;;  %p9272_p10 = scmp.lt.s32.totalorder %s7043_s27, %s7043_s27 }
0x1e8b   : > { %p9266_p4 = scmp.ne.s32.totalorder %s7043_s27, %s9265_s1  ;;  %p9273_p8 = scmp.lt.s32.totalorder %s9265_s1, %s9265_s1 }
0x1e8d   : > { %p9274_p5 = por %p9273_p8, %p9272_p10 }
0x1e8e   : > { %p8379_p13 = scmp.eq.s32.totalorder %s11033_s30, 15 }
0x1e90   : > { %p9267_p12 = pnand %p9266_p4, %p8379_p13 }
0x1e92   : > { %p9268_p0 = pneg %p9267_p12 }
0x1e94   : > { %p9275_p9 = pnand %p9274_p5, %p9268_p0 }
0x1e96   : > { %9278 = shalt.err (!%p9275_p9)
}
0x1e97   : > { %s11034_s29 = sld [smem:[#allocation54_spill]] }
0x1e9d   : > { %s11035_s3 = smov %s11034_s29  ;;  %s9279_s20 = scalar_lea.hbm %s11034_s29, 256 }
0x1e9e   : > { %p9280_p1 = scmp.ne.s32.totalorder %s11035_s3, %s9279_s20  ;;  %p9285_p2 = scmp.lt.u32.totalorder %s9279_s20, %s11035_s3 }
0x1ea0   : > { %p9281_p11 = pnand %p9280_p1, %p8379_p13 }
0x1ea2   : > { %p9282_p7 = pneg %p9281_p11 }
0x1ea4   : > { %p9287_p3 = pnand %p9285_p2, %p9282_p7 }
0x1ea6   : > { %9290 = shalt.err (!%p9287_p3)
}
0x1ea7   : > { %s9391_s13 = smov 128   ;;  %s9392_s26 = smov 8  }
0x1ea8   : > { %8307 = dma.vmem_to_hbm [thread:$0]  (%p8379_p13), %s7043_s27, 256, %s11035_s3, [#allocation5], %s9391_s13, %s9391_s13, %s9392_s26  }
0x1ea9   : > { %9332 = dma.done.wait (%p8379_p13), [#allocation5], 256  }
0x1eaa   : > { %9334 = vsyncadd (%p8379_p13), [#allocation5], 4294967040 }
0x1eab PF: > { %s11036_s30 = sld [smem:[#allocation36_spill]]  ;;  %s11037_s27 = sld [smem:[#allocation33_spill]] }
0x1eac   : > { %s11038_s28 = sld [smem:[#allocation34_spill]]  ;;  %s11039_s29 = sld [smem:[#allocation37_spill]] }
0x1eb1   : > { %p29_p6 = scmp.ge.s32.totalorder %s11036_s30, 18  }
0x1eb3   :  { %31 = sbr.rel (!%p29_p6) target bundleno = 21 (0x15), region = 281 }
0x1eba   :  { %7058 = vsyncpa [#allocation4], 1 }
0x1ebb   :  { %7060 = vsyncpa [#allocation4 + $0x1], 1 }
0x1ebc   :  { %7061 = vsyncpa [#allocation7], 1 }
0x1ebd   :  { %7062 = vsyncpa [#allocation10], 1 }
0x1ebe   :  { %7063 = vsyncpa [#allocation5], 1 }
0x1ebf   :  { %7065 = vsyncpa [#allocation5 + $0x1], 1 }

</bundles_post_ra>
